<compile_context>
chip_gen: v7x
topology: tpu7x:2x2x1
jax: 0.10.0
libtpu: 0.0.40
codegen_flags: <defaults>
</compile_context>

<pallas_src>
import jax
import jax.numpy as jnp
from jax.experimental import pallas as pl
from jax.experimental.pallas import tpu as pltpu

IN_FEATURES = 64 * 64 * 3   # 12288
HIDDEN = 100
HIDDEN_PAD = 128            # lane-aligned hidden dim (zero-padded, exact)
OUT = 6
OUT_PAD = 128               # lane-dense output (zero-padded, sliced off in wrapper)


def mlp_kernel(x_ref, w1_ref, b1_ref, w2_ref, b2_ref, o_ref):
    # x tile arrives as f32; cast to bf16 on the VPU (hidden under the DMA) for the MXU.
    x = x_ref[...].astype(jnp.bfloat16)
    h = jnp.dot(x, w1_ref[...], preferred_element_type=jnp.float32)   # (tb, 128), f32 acc
    h = jnp.maximum(h + b1_ref[...], 0.0)                             # bias + ReLU (VPU)
    y = jnp.dot(h, w2_ref[...], preferred_element_type=jnp.float32)   # (tb, 128)
    o_ref[...] = (y + b2_ref[...]).astype(o_ref.dtype)


def _round_up(x, m):
    return ((x + m - 1) // m) * m


def mlp_classifier_forward(x_nchw, w1, b1, w2, b2, *, tb=None):
    """x_nchw: (B, 3, 64, 64) float32 -> logits (B, 6) float32."""
    batch = x_nchw.shape[0]
    # Same C,H,W flattening order as torch's x.view(batch, -1); contiguous reshape is free.
    x2d = x_nchw.reshape(batch, -1)   # stays f32 — bf16 cast happens inside the kernel

    # Zero-pad hidden 100->128 and logits 6->128 (exact: zero cols/rows contribute nothing).
    hpad, opad = HIDDEN_PAD - HIDDEN, OUT_PAD - OUT
    w1p = jnp.pad(w1, ((0, 0), (0, hpad))).astype(jnp.bfloat16)   # resident, MXU-native
    b1p = jnp.pad(b1, ((0, 0), (0, hpad)))
    w2p = jnp.pad(w2, ((0, hpad), (0, opad)))
    b2p = jnp.pad(b2, ((0, 0), (0, opad)))

    # ---- batch tile sized against VMEM (v7x: 64 MiB/TC, v5e/v6e: 128 MiB) ----
    vmem_cap = 64 << 20                       # conservative fallback = v7x per-TC VMEM
    try:
        vmem_cap = int(pltpu.get_tpu_info().vmem_capacity_bytes)
    except Exception:
        pass
    per_row = 2 * IN_FEATURES * 4 + 2 * OUT_PAD * 4       # double-buffered f32 x tile + out tile
    fixed = 2 * (IN_FEATURES * HIDDEN_PAD * 2 + HIDDEN_PAD * OUT_PAD * 4) + (2 << 20)  # W1/W2 + slack
    budget = int(vmem_cap * 0.7)
    tb_max = max(8, min(1024, ((budget - fixed) // per_row) // 8 * 8))
    tb = tb_max if tb is None else max(8, min(_round_up(tb, 8), tb_max))
    tb = min(tb, _round_up(batch, 8))          # never a tile larger than the batch
    # Guarantee >=2 grid steps for non-trivial batches so the "parallel" batch axis can
    # shard across v7x's two TensorCores (one extra ~0.35us step is noise elsewhere).
    if batch > 16 and pl.cdiv(batch, tb) < 2:
        tb = max(8, _round_up(pl.cdiv(batch, 2), 8))

    grid = (pl.cdiv(batch, tb),)               # ragged last block handled by Pallas masking

    vmem_usage = fixed + tb * per_row
    vmem_limit = max(32 << 20, min(int(vmem_cap * 0.85), vmem_usage + (8 << 20)))

    bytes_accessed = (
        batch * IN_FEATURES * 4                                      # streamed x (f32)
        + IN_FEATURES * HIDDEN_PAD * 2                               # resident W1 (bf16)
        + HIDDEN_PAD * 4 + HIDDEN_PAD * OUT_PAD * 4 + OUT_PAD * 4    # b1, W2, b2 (f32)
        + batch * OUT_PAD * 4                                        # logits out (f32)
    )
    flops = 2 * batch * IN_FEATURES * HIDDEN_PAD + 2 * batch * HIDDEN_PAD * OUT_PAD

    out = pl.pallas_call(
        mlp_kernel,
        out_shape=jax.ShapeDtypeStruct((batch, OUT_PAD), jnp.float32),
        grid=grid,
        in_specs=[
            pl.BlockSpec((tb, IN_FEATURES), lambda i: (i, 0)),           # x: streamed (f32)
            pl.BlockSpec((IN_FEATURES, HIDDEN_PAD), lambda i: (0, 0)),   # W1: resident (bf16)
            pl.BlockSpec((1, HIDDEN_PAD), lambda i: (0, 0)),             # b1: resident
            pl.BlockSpec((HIDDEN_PAD, OUT_PAD), lambda i: (0, 0)),       # W2: resident
            pl.BlockSpec((1, OUT_PAD), lambda i: (0, 0)),                # b2: resident
        ],
        out_specs=pl.BlockSpec((tb, OUT_PAD), lambda i: (i, 0)),
        compiler_params=pltpu.CompilerParams(
            dimension_semantics=("parallel",),   # batch axis -> both TCs on v7x
            vmem_limit_bytes=int(vmem_limit),
        ),
        cost_estimate=pl.CostEstimate(
            flops=flops, transcendentals=0, bytes_accessed=bytes_accessed),
    )(x2d, w1p, b1p, w2p, b2p)

    return out[:, :OUT]


def init_params(key):
    # Deterministic init mirroring nn.Linear defaults: U(-1/sqrt(fan_in), 1/sqrt(fan_in)).
    k1, k2, k3, k4 = jax.random.split(key, 4)
    bound1 = 1.0 / jnp.sqrt(jnp.float32(IN_FEATURES))
    bound2 = 1.0 / jnp.sqrt(jnp.float32(HIDDEN))
    w1 = jax.random.uniform(k1, (IN_FEATURES, HIDDEN), jnp.float32, -bound1, bound1)
    b1 = jax.random.uniform(k2, (1, HIDDEN), jnp.float32, -bound1, bound1)
    w2 = jax.random.uniform(k3, (HIDDEN, OUT), jnp.float32, -bound2, bound2)
    b2 = jax.random.uniform(k4, (1, OUT), jnp.float32, -bound2, bound2)
    return w1, b1, w2, b2


if __name__ == "__main__":
    key = jax.random.PRNGKey(0)
    k_params, k_x, k_x2 = jax.random.split(key, 3)
    w1, b1, w2, b2 = init_params(k_params)

    def ref_bf16(xa):  # reference matching the kernel's bf16 first-matmul inputs
        x2d = xa.reshape(xa.shape[0], -1)
        xb = x2d.astype(jnp.bfloat16).astype(jnp.float32)
        w1b = w1.astype(jnp.bfloat16).astype(jnp.float32)
        return jnp.maximum(xb @ w1b + b1, 0.0) @ w2 + b2

    def ref_f32(xa):   # pure-f32 PyTorch-equivalent forward
        x2d = xa.reshape(xa.shape[0], -1)
        return jnp.maximum(x2d @ w1 + b1, 0.0) @ w2 + b2

    # Spatial/channel dims are fixed by the Linear(64*64*3, ...) layer; batch kept small.
    batch = 2
    x = jax.random.normal(k_x, (batch, 3, 64, 64), jnp.float32)  # NCHW like PyTorch
    out = jax.block_until_ready(mlp_classifier_forward(x, w1, b1, w2, b2))
    assert out.shape == (batch, OUT)
    assert jnp.allclose(out, ref_bf16(x), atol=1e-3, rtol=1e-3)
    assert jnp.allclose(out, ref_f32(x), atol=5e-2, rtol=5e-2)

    # Ragged-last-block check: batch not a multiple of the tile (grid of 3, last block partial)
    # -- confirms edge masking never contaminates valid rows.
    x_r = jax.random.normal(k_x2, (20, 3, 64, 64), jnp.float32)
    out_r = jax.block_until_ready(mlp_classifier_forward(x_r, w1, b1, w2, b2, tb=8))
    assert out_r.shape == (20, OUT)
    assert jnp.allclose(out_r, ref_bf16(x_r), atol=1e-3, rtol=1e-3)

    print("KERNEL_OK")
</pallas_src>

<mosaic_0001>
module attributes {stable_mosaic.version = 11 : i64} {
  func.func @mlp_kernel(%arg0: i32, %arg1: memref<8x12288xf32, #tpu.memory_space<vmem>>, %arg2: memref<12288x128xbf16, #tpu.memory_space<vmem>>, %arg3: memref<1x128xf32, #tpu.memory_space<vmem>>, %arg4: memref<128x128xf32, #tpu.memory_space<vmem>>, %arg5: memref<1x128xf32, #tpu.memory_space<vmem>>, %arg6: memref<8x128xf32, #tpu.memory_space<vmem>>) attributes {dimension_semantics = [#tpu.dimension_semantics<parallel>], iteration_bounds = array<i64: 1>, scalar_prefetch = 0 : i64, scratch_operands = 0 : i64, tpu.core_type = #tpu.core_type<tc>, window_params = [{transform_indices = @transform_0, window_bounds = array<i64: 8, 12288>}, {pipeline_mode = #tpu.pipeline_mode<synchronous>, transform_indices = @transform_1, window_bounds = array<i64: 12288, 128>}, {pipeline_mode = #tpu.pipeline_mode<synchronous>, transform_indices = @transform_2, window_bounds = array<i64: 1, 128>}, {pipeline_mode = #tpu.pipeline_mode<synchronous>, transform_indices = @transform_3, window_bounds = array<i64: 128, 128>}, {pipeline_mode = #tpu.pipeline_mode<synchronous>, transform_indices = @transform_4, window_bounds = array<i64: 1, 128>}, {transform_indices = @transform_5, window_bounds = array<i64: 8, 128>}]} {
    %c0 = arith.constant 0 : index
    %c0_0 = arith.constant 0 : index
    %0 = vector.load %arg1[%c0, %c0_0] : memref<8x12288xf32, #tpu.memory_space<vmem>>, vector<8x12288xf32>
    %1 = arith.truncf %0 : vector<8x12288xf32> to vector<8x12288xbf16>
    %c0_1 = arith.constant 0 : index
    %c0_2 = arith.constant 0 : index
    %2 = vector.load %arg2[%c0_1, %c0_2] : memref<12288x128xbf16, #tpu.memory_space<vmem>>, vector<12288x128xbf16>
    %cst = arith.constant dense<0.000000e+00> : vector<8x128xf32>
    %3 = tpu.matmul %1, %2, %cst {dimension_numbers = #tpu.dot_dimension_numbers<[1], [0], [0], [1], [0, 0, 1, 1], [], []>} : vector<8x12288xbf16>, vector<12288x128xbf16>, vector<8x128xf32> -> vector<8x128xf32>
    %c0_3 = arith.constant 0 : index
    %c0_4 = arith.constant 0 : index
    %4 = vector.load %arg3[%c0_3, %c0_4] : memref<1x128xf32, #tpu.memory_space<vmem>>, vector<1x128xf32>
    %5 = vector.broadcast %4 : vector<1x128xf32> to vector<8x128xf32>
    %6 = arith.addf %3, %5 : vector<8x128xf32>
    %cst_5 = arith.constant 0.000000e+00 : f32
    %7 = vector.broadcast %cst_5 : f32 to vector<8x128xf32>
    %8 = arith.maximumf %6, %7 : vector<8x128xf32>
    %c0_6 = arith.constant 0 : index
    %c0_7 = arith.constant 0 : index
    %9 = vector.load %arg4[%c0_6, %c0_7] : memref<128x128xf32, #tpu.memory_space<vmem>>, vector<128x128xf32>
    %cst_8 = arith.constant dense<0.000000e+00> : vector<8x128xf32>
    %10 = tpu.matmul %8, %9, %cst_8 {dimension_numbers = #tpu.dot_dimension_numbers<[1], [0], [0], [1], [0, 0, 1, 1], [], []>} : vector<8x128xf32>, vector<128x128xf32>, vector<8x128xf32> -> vector<8x128xf32>
    %c0_9 = arith.constant 0 : index
    %c0_10 = arith.constant 0 : index
    %11 = vector.load %arg5[%c0_9, %c0_10] : memref<1x128xf32, #tpu.memory_space<vmem>>, vector<1x128xf32>
    %12 = vector.broadcast %11 : vector<1x128xf32> to vector<8x128xf32>
    %13 = arith.addf %10, %12 : vector<8x128xf32>
    %c0_11 = arith.constant 0 : index
    %c0_12 = arith.constant 0 : index
    %14 = vector.load %arg6[%c0_11, %c0_12] : memref<8x128xf32, #tpu.memory_space<vmem>>, vector<8x128xf32>
    tpu.vector_store %arg6[%c0_11, %c0_12], %13 {strides = array<i32>} : memref<8x128xf32, #tpu.memory_space<vmem>>, vector<8x128xf32>,
    return
  }
  func.func @transform_0(%arg0: i32) -> (i32, i32) {
    %c0_i32 = arith.constant 0 : i32
    %c0_i32_0 = arith.constant 0 : i32
    return %arg0, %c0_i32 : i32, i32
  }
  func.func @transform_1(%arg0: i32) -> (i32, i32) {
    %c0_i32 = arith.constant 0 : i32
    %c0_i32_0 = arith.constant 0 : i32
    %c0_i32_1 = arith.constant 0 : i32
    return %c0_i32, %c0_i32_0 : i32, i32
  }
  func.func @transform_2(%arg0: i32) -> (i32, i32) {
    %c0_i32 = arith.constant 0 : i32
    %c0_i32_0 = arith.constant 0 : i32
    %c0_i32_1 = arith.constant 0 : i32
    return %c0_i32, %c0_i32_0 : i32, i32
  }
  func.func @transform_3(%arg0: i32) -> (i32, i32) {
    %c0_i32 = arith.constant 0 : i32
    %c0_i32_0 = arith.constant 0 : i32
    %c0_i32_1 = arith.constant 0 : i32
    return %c0_i32, %c0_i32_0 : i32, i32
  }
  func.func @transform_4(%arg0: i32) -> (i32, i32) {
    %c0_i32 = arith.constant 0 : i32
    %c0_i32_0 = arith.constant 0 : i32
    %c0_i32_1 = arith.constant 0 : i32
    return %c0_i32, %c0_i32_0 : i32, i32
  }
  func.func @transform_5(%arg0: i32) -> (i32, i32) {
    %c0_i32 = arith.constant 0 : i32
    %c0_i32_0 = arith.constant 0 : i32
    return %arg0, %c0_i32 : i32, i32
  }
}

</mosaic_0001>

<bundles_post_ra>
// kernel: tpu_custom_call.1
= control target key start
LH: loop header
LB: loop body
LE: loop exit
PB: predicated region body
PF: predicated region fallthrough
CT: control target
= control target key end

     0   :  { %10 = vsyncpa [#allocation3], 0  ;;  %s12613_s0 = inlined_call_operand.hbm [shape: f32[2,12288], index: 0, kind: input, shape index: {}]   ;;  %s12614_s1 = inlined_call_operand.hbm [shape: bf16[12288,128], index: 1, kind: input, shape index: {}]   ;;  %s12615_s2 = inlined_call_operand.hbm [shape: f32[1,128], index: 2, kind: input, shape index: {}]   ;;  %s12616_s3 = inlined_call_operand.hbm [shape: f32[128,128], index: 3, kind: input, shape index: {}]   ;;  %s12617_s4 = inlined_call_operand.hbm [shape: f32[1,128], index: 4, kind: input, shape index: {}]   ;;  %s12618_s5 = inlined_call_operand.hbm [shape: f32[2,128], index: 5, kind: output, shape index: {}]  }
   0x1   :  { %11 = vsyncpa [#allocation6], 0 }
   0x2   :  { %12 = vsyncpa [#allocation9], 0 }
   0x3   :  { %13 = vsyncpa [#allocation4], 0 }
   0x4   :  { %18 = vsyncadd [#allocation3], 9216  ;;  %s12347_s18 = smov [#allocation5]   ;;  %s12207_s22 = scalar_lea.hbm %s12614_s1, 98304 }
   0x5   :  { %s31_s19 = sshll.u32 %s12347_s18, 4  ;;  %p12208_p0 = scmp.ne.s32.totalorder %s12614_s1, %s12207_s22  ;;  %s32_s19 = int_to_ptr.vmem [resolvable:$true] %s31_s19 }
   0x6   :  { %p12211_p1 = scmp.lt.u32.totalorder %s12207_s22, %s12614_s1 }
   0x8   :  { %p12213_p2 = pnand %p12211_p1, %p12208_p0 }
   0xa   :  { %12216 = shalt.err (!%p12213_p2)
}
   0xb   :  { %s12217_s27 = scalar_lea.vmem %s32_s19, 98304  ;;  %p12222_p4 = scmp.lt.s32.totalorder %s32_s19, %s32_s19 }
   0xc   :  { %p12218_p3 = scmp.ne.s32.totalorder %s32_s19, %s12217_s27  ;;  %p12223_p5 = scmp.lt.s32.totalorder %s12217_s27, %s12217_s27 }
   0xe   :  { %p12224_p6 = por %p12223_p5, %p12222_p4 }
  0x10   :  { %p12225_p7 = pnand %p12224_p6, %p12218_p3 }
  0x12   :  { %12228 = shalt.err (!%p12225_p7)
}
  0x13   :  { %s12348_s28 = smov 64   ;;  %s12349_s29 = smov 4  }
  0x14   :  { %37 = dma.hbm_to_vmem [thread:$0]  %s12614_s1, 98304, %s32_s19, [#allocation6], %s12348_s28, %s12348_s28, %s12349_s29  }
  0x15   :  { %s12350_s7 = smov [#allocation8]   ;;  %s12229_s11 = scalar_lea.hbm %s12616_s3, 2048 }
  0x16   :  { %s53_s8 = sshll.u32 %s12350_s7, 4  ;;  %p12230_p8 = scmp.ne.s32.totalorder %s12616_s3, %s12229_s11  ;;  %s54_s8 = int_to_ptr.vmem [resolvable:$true] %s53_s8 }
  0x17   :  { %p12233_p9 = scmp.lt.u32.totalorder %s12229_s11, %s12616_s3 }
  0x19   :  { %p12235_p10 = pnand %p12233_p9, %p12230_p8 }
  0x1b   :  { %12238 = shalt.err (!%p12235_p10)
}
  0x1c   :  { %s12239_s16 = scalar_lea.vmem %s54_s8, 2048  ;;  %p12244_p12 = scmp.lt.s32.totalorder %s54_s8, %s54_s8 }
  0x1d   :  { %p12240_p11 = scmp.ne.s32.totalorder %s54_s8, %s12239_s16  ;;  %p12245_p13 = scmp.lt.s32.totalorder %s12239_s16, %s12239_s16 }
  0x1f   :  { %p12246_p0 = por %p12245_p13, %p12244_p12 }
  0x21   :  { %p12247_p1 = pnand %p12246_p0, %p12240_p11 }
  0x23   :  { %12250 = shalt.err (!%p12247_p1)
}
  0x24   :  { %s12351_s1 = smov 128   ;;  %s12352_s17 = smov 8  }
  0x25   :  { %59 = dma.hbm_to_vmem [thread:$0]  %s12616_s3, 2048, %s54_s8, [#allocation9], %s12351_s1, %s12351_s1, %s12352_s17  }
  0x26   :  { %s12353_s20 = smov [#allocation2]   ;;  %s12251_s24 = scalar_lea.hbm %s12613_s0, 3072 }
  0x27   :  { %s19_s21 = sshll.u32 %s12353_s20, 4  ;;  %p12252_p2 = scmp.ne.s32.totalorder %s12613_s0, %s12251_s24  ;;  %s20_s21 = int_to_ptr.vmem [resolvable:$true] %s19_s21 }
  0x28   :  { %p12255_p3 = scmp.lt.u32.totalorder %s12251_s24, %s12613_s0 }
  0x2a   :  { %p12257_p4 = pnand %p12255_p3, %p12252_p2 }
  0x2c   :  { %12260 = shalt.err (!%p12257_p4)
}
  0x2d   :  { %s12261_s29 = scalar_lea.vmem %s20_s21, 3072  ;;  %s12265_s3 = scalar_lea.vmem %s20_s21, 12288 }
  0x2e   :  { %p12262_p5 = scmp.ne.s32.totalorder %s20_s21, %s12261_s29  ;;  %p12266_p6 = scmp.lt.s32.totalorder %s20_s21, %s20_s21 }
  0x2f   :  { %p12267_p7 = scmp.lt.s32.totalorder %s12265_s3, %s12261_s29 }
  0x31   :  { %p12268_p8 = por %p12267_p7, %p12266_p6 }
  0x33   :  { %p12269_p9 = pnand %p12268_p8, %p12262_p5 }
  0x35   :  { %12272 = shalt.err (!%p12269_p9)
}
  0x36   :  { %s12354_s30 = smov 3072   ;;  %s12355_s6 = smov 192  }
  0x37   :  { %25 = dma.hbm_to_vmem [thread:$0]  %s12613_s0, 3072, %s20_s21, [#allocation3], %s12354_s30, %s12354_s30, %s12355_s6  }
  0x38   :  { %s12356_s9 = smov [#allocation7]   ;;  %s12357_s11 = smov [#allocation10]  }
  0x39   :  { %s44_s10 = sshll.u32 %s12356_s9, 4  ;;  %s66_s12 = sshll.u32 %s12357_s11, 4  ;;  %s45_s10 = int_to_ptr.vmem [resolvable:$true] %s44_s10  ;;  %s67_s12 = int_to_ptr.vmem [resolvable:$true] %s66_s12 }
  0x3a   :  { %s12273_s15 = scalar_lea.hbm %s12615_s2, 16 }
  0x3b   :  { %p12274_p10 = scmp.ne.s32.totalorder %s12615_s2, %s12273_s15  ;;  %p12277_p11 = scmp.lt.u32.totalorder %s12273_s15, %s12615_s2 }
  0x3d   :  { %p12279_p12 = pnand %p12277_p11, %p12274_p10 }
  0x3f   :  { %12282 = shalt.err (!%p12279_p12)
}
  0x40   :  { %s12283_s0 = scalar_lea.vmem %s45_s10, 16  ;;  %s12287_s19 = scalar_lea.vmem %s45_s10, 32 }
  0x41   :  { %p12284_p13 = scmp.ne.s32.totalorder %s45_s10, %s12283_s0  ;;  %p12288_p0 = scmp.lt.s32.totalorder %s45_s10, %s45_s10 }
  0x42   :  { %p12289_p1 = scmp.lt.s32.totalorder %s12287_s19, %s12283_s0 }
  0x44   :  { %p12290_p2 = por %p12289_p1, %p12288_p0 }
  0x46   :  { %p12291_p3 = pnand %p12290_p2, %p12284_p13 }
  0x48   :  { %12294 = shalt.err (!%p12291_p3)
}
  0x49   :  { %47 = dma.hbm_to_vmem [thread:$0]  %s12615_s2, 16, %s45_s10, [#allocation6]  }
  0x4a   :  { %s12295_s24 = scalar_lea.hbm %s12617_s4, 16 }
  0x4b   :  { %p12296_p4 = scmp.ne.s32.totalorder %s12617_s4, %s12295_s24  ;;  %p12299_p5 = scmp.lt.u32.totalorder %s12295_s24, %s12617_s4 }
  0x4d   :  { %p12301_p6 = pnand %p12299_p5, %p12296_p4 }
  0x4f   :  { %12304 = shalt.err (!%p12301_p6)
}
  0x50   :  { %s12305_s29 = scalar_lea.vmem %s67_s12, 16  ;;  %s12309_s3 = scalar_lea.vmem %s67_s12, 32 }
  0x51   :  { %p12306_p7 = scmp.ne.s32.totalorder %s67_s12, %s12305_s29  ;;  %p12310_p8 = scmp.lt.s32.totalorder %s67_s12, %s67_s12 }
  0x52   :  { %p12311_p9 = scmp.lt.s32.totalorder %s12309_s3, %s12305_s29 }
  0x54   :  { %p12312_p10 = por %p12311_p9, %p12310_p8 }
  0x56   :  { %p12313_p11 = pnand %p12312_p10, %p12306_p7 }
  0x58   :  { %12316 = shalt.err (!%p12313_p11)
}
  0x59   :  { %69 = dma.hbm_to_vmem [thread:$0]  %s12617_s4, 16, %s67_s12, [#allocation9]  }
  0x5a   :  { %12339 = dma.done.wait [#allocation3], 12288  }
  0x5b   :  { %12340 = vsyncadd [#allocation3], 4294955008 }
  0x5c   :  { %12341 = dma.done.wait [#allocation6], 98320  }
  0x5d   :  { %12342 = vsyncadd [#allocation6], 4294868976 }
  0x5e   :  { %12343 = dma.done.wait [#allocation9], 2064  }
  0x5f   :  { %12344 = vsyncadd [#allocation9], 4294965232  ;;  %v11439_v0 = vld [vmem:[#allocation5 + $0x40] sm:$0xff]   ;;  %v11443_v4 = vld [vmem:[#allocation5 + $0x48] sm:$0xff]   ;;  %v12358_v24 = vmov 1983009808   ;;  %v285_v26 = vlaneseq }
  0x60   :  { %v11440_v1 = vld [vmem:[#allocation5 + $0xc0] sm:$0xff]   ;;  %10289 = vmatprep.subr.bf16.mxu0 %v11439_v0  ;;  %v11444_v5 = vld [vmem:[#allocation5 + $0xc8] sm:$0xff]   ;;  %v11447_v8 = vld [vmem:[#allocation5 + $0x50] sm:$0xff]   ;;  %v283_v25 = vunpack.c.l.s4 %v12358_v24  ;;  %vm12360_vm0 = vmmov 0  }
  0x61   :  { %v11441_v2 = vld [vmem:[#allocation5] sm:$0xff]   ;;  %10311 = vmatprep.subr.bf16.mxu1 %v11440_v1  ;;  %v11445_v6 = vld [vmem:[#allocation5 + $0x8] sm:$0xff]   ;;  %v11448_v9 = vld [vmem:[#allocation5 + $0xd0] sm:$0xff]   ;;  %v286_v32 = vshrl.u32 %v285_v26, 7 }
  0x62   :  { %v11442_v3 = vld [vmem:[#allocation5 + $0x80] sm:$0xff]   ;;  %10290 = vmatpush3.bf16.msra.mxu0 %v11441_v2  ;;  %v11446_v7 = vld [vmem:[#allocation5 + $0x88] sm:$0xff]   ;;  %v11449_v10 = vld [vmem:[#allocation5 + $0x10] sm:$0xff]   ;;  %v284_v31 = vunpack.c.0.s8 %v283_v25 }
  0x63   :  { %10312 = vmatpush3.bf16.msra.mxu1 %v11442_v3  ;;  %10291 = vmatprep.subr.bf16.mxu0 %v11443_v4  ;;  %v11450_v11 = vld [vmem:[#allocation5 + $0x90] sm:$0xff]   ;;  %v11451_v12 = vld [vmem:[#allocation5 + $0x58] sm:$0xff]   ;;  %v11455_v16 = vld [vmem:[#allocation5 + $0x60] sm:$0xff]  }
  0x64   :  { %10313 = vmatprep.subr.bf16.mxu1 %v11444_v5  ;;  %v11452_v13 = vld [vmem:[#allocation5 + $0xd8] sm:$0xff]   ;;  %v11456_v17 = vld [vmem:[#allocation5 + $0xe0] sm:$0xff]   ;;  %v11459_v20 = vld [vmem:[#allocation5 + $0x68] sm:$0xff]   ;;  %v12455_v37 = vsub.s32 %v284_v31, %v286_v32 }
  0x65   :  { %v11453_v14 = vld [vmem:[#allocation5 + $0x18] sm:$0xff]   ;;  %v11457_v18 = vld [vmem:[#allocation5 + $0x20] sm:$0xff]   ;;  %v11460_v21 = vld [vmem:[#allocation5 + $0xe8] sm:$0xff]  }
  0x66   :  { %10292 = vmatpush3.bf16.msra.mxu0 %v11445_v6  ;;  %v11454_v15 = vld [vmem:[#allocation5 + $0x98] sm:$0xff]   ;;  %v11458_v19 = vld [vmem:[#allocation5 + $0xa0] sm:$0xff]   ;;  %v11461_v22 = vld [vmem:[#allocation5 + $0x28] sm:$0xff]  }
  0x67   :  { %10314 = vmatpush3.bf16.msra.mxu1 %v11446_v7  ;;  %10293 = vmatprep.subr.bf16.mxu0 %v11447_v8  ;;  %v11462_v23 = vld [vmem:[#allocation5 + $0xa8] sm:$0xff]   ;;  %v11463_v27 = vld [vmem:[#allocation5 + $0x70] sm:$0xff]   ;;  %v11467_v33 = vld [vmem:[#allocation5 + $0x78] sm:$0xff]  }
  0x68   :  { %10315 = vmatprep.subr.bf16.mxu1 %v11448_v9  ;;  %v11464_v28 = vld [vmem:[#allocation5 + $0xf0] sm:$0xff]   ;;  %v11468_v34 = vld [vmem:[#allocation5 + $0xf8] sm:$0xff]   ;;  %v86_v38 = vld [vmem:[#allocation2] sm:$0xff] }
  0x69   :  { %v11465_v29 = vld [vmem:[#allocation5 + $0x30] sm:$0xff]   ;;  %v11469_v35 = vld [vmem:[#allocation5 + $0x38] sm:$0xff]   ;;  %v110_v39 = vld [vmem:[#allocation2 + $0xc0] sm:$0xff] }
  0x6a   :  { %10294 = vmatpush3.bf16.msra.mxu0 %v11449_v10  ;;  %v11466_v30 = vld [vmem:[#allocation5 + $0xb0] sm:$0xff]   ;;  %v11470_v36 = vld [vmem:[#allocation5 + $0xb8] sm:$0xff]   ;;  %v134_v40 = vld [vmem:[#allocation2 + $0x180] sm:$0xff]  ;;  %v278_v42 = vcombine.low %v86_v38, %v110_v39  ;;  %v279_v43 = vcombine.high %v86_v38, %v110_v39 }
  0x6b   :  { %10316 = vmatpush3.bf16.msra.mxu1 %v11450_v11  ;;  %10295 = vmatprep.subr.bf16.mxu0 %v11451_v12  ;;  %v158_v41 = vld [vmem:[#allocation2 + $0x240] sm:$0xff]  ;;  %v11475_v62 = vld [vmem:[#allocation5 + $0x148] sm:$0xff]   ;;  %v11479_v2 = vld [vmem:[#allocation5 + $0x150] sm:$0xff]  }
  0x6c   :  { %10317 = vmatprep.subr.bf16.mxu1 %v11452_v13  ;;  %v280_v44 = vcombine.low %v134_v40, %v158_v41  ;;  %v281_v45 = vcombine.high %v134_v40, %v158_v41  ;;  %v11471_v46 = vld [vmem:[#allocation5 + $0x140] sm:$0xff]   ;;  %v288_v47 = vrot.slane %v278_v42, %v12455_v37  ;;  %v295_v48 = vrot.slane %v279_v43, %v12455_v37  ;;  %v11476_v63 = vld [vmem:[#allocation5 + $0x1c8] sm:$0xff]   ;;  %v11480_v3 = vld [vmem:[#allocation5 + $0x1d0] sm:$0xff]  }
  0x6d   :  { %v11472_v49 = vld [vmem:[#allocation5 + $0x1c0] sm:$0xff]   ;;  %v11477_v0 = vld [vmem:[#allocation5 + $0x108] sm:$0xff]   ;;  %v11481_v4 = vld [vmem:[#allocation5 + $0x110] sm:$0xff]  }
  0x6e   :  { %10296 = vmatpush3.bf16.msra.mxu0 %v11453_v14  ;;  %v302_v50 = vrot.slane %v280_v44, %v12455_v37  ;;  %v309_v51 = vrot.slane %v281_v45, %v12455_v37  ;;  %v11473_v56 = vld [vmem:[#allocation5 + $0x100] sm:$0xff]   ;;  %v11478_v1 = vld [vmem:[#allocation5 + $0x188] sm:$0xff]   ;;  %v11482_v5 = vld [vmem:[#allocation5 + $0x190] sm:$0xff]  }
  0x6f   :  { %10318 = vmatpush3.bf16.msra.mxu1 %v11454_v15  ;;  %10297 = vmatprep.subr.bf16.mxu0 %v11455_v16  ;;  %v11474_v57 = vld [vmem:[#allocation5 + $0x180] sm:$0xff]   ;;  %v11483_v6 = vld [vmem:[#allocation5 + $0x158] sm:$0xff]   ;;  %v11491_v14 = vld [vmem:[#allocation5 + $0x168] sm:$0xff]  }
  0x70   :  { %10319 = vmatprep.subr.bf16.mxu1 %v11456_v17  ;;  %v311_v52 = vcombine.high %v288_v47, %v302_v50  ;;  %v313_v53 = vcombine.high %v295_v48, %v309_v51  ;;  %v310_v54 = vcombine.low %v288_v47, %v302_v50  ;;  %v312_v55 = vcombine.low %v295_v48, %v309_v51  ;;  %v11484_v7 = vld [vmem:[#allocation5 + $0x1d8] sm:$0xff]   ;;  %v11487_v10 = vld [vmem:[#allocation5 + $0x160] sm:$0xff]   ;;  %v11492_v15 = vld [vmem:[#allocation5 + $0x1e8] sm:$0xff]  }
  0x71   :  { %v11485_v8 = vld [vmem:[#allocation5 + $0x118] sm:$0xff]   ;;  %v11488_v11 = vld [vmem:[#allocation5 + $0x1e0] sm:$0xff]   ;;  %v11493_v16 = vld [vmem:[#allocation5 + $0x128] sm:$0xff]  }
  0x72   :  { %10298 = vmatpush3.bf16.msra.mxu0 %v11457_v18  ;;  %v1239_v58 = vpack.c.bf16 %v311_v52, %v311_v52  ;;  %v1241_v59 = vpack.c.bf16 %v313_v53, %v313_v53  ;;  %v1238_v60 = vpack.c.bf16 %v310_v54, %v310_v54  ;;  %v1240_v61 = vpack.c.bf16 %v312_v55, %v312_v55  ;;  %v11486_v9 = vld [vmem:[#allocation5 + $0x198] sm:$0xff]   ;;  %v11489_v12 = vld [vmem:[#allocation5 + $0x120] sm:$0xff]   ;;  %v11494_v17 = vld [vmem:[#allocation5 + $0x1a8] sm:$0xff]  }
  0x73   :  { %10320 = vmatpush3.bf16.msra.mxu1 %v11458_v19  ;;  %10299 = vmatprep.subr.bf16.mxu0 %v11459_v20  ;;  %v11490_v13 = vld [vmem:[#allocation5 + $0x1a0] sm:$0xff]   ;;  %v11495_v18 = vld [vmem:[#allocation5 + $0x170] sm:$0xff]   ;;  %v87_v24 = vld [vmem:[#allocation2 + $0x8] sm:$0xff] }
  0x74   :  { %10321 = vmatprep.subr.bf16.mxu1 %v11460_v21  ;;  %7517 = vmatprep.mubr.bf16.mxu0 %v1239_v58  ;;  %v11496_v19 = vld [vmem:[#allocation5 + $0x1f0] sm:$0xff]   ;;  %v111_v25 = vld [vmem:[#allocation2 + $0xc8] sm:$0xff]  ;;  %v11503_v39 = vld [vmem:[#allocation5 + $0x240] sm:$0xff]  }
  0x75   :  { %7557 = vmatprep.mubr.bf16.mxu1 %v1241_v59  ;;  %v11497_v20 = vld [vmem:[#allocation5 + $0x130] sm:$0xff]   ;;  %v135_v26 = vld [vmem:[#allocation2 + $0x188] sm:$0xff]  ;;  %v11504_v40 = vld [vmem:[#allocation5 + $0x2c0] sm:$0xff]  }
  0x76   :  { %10300 = vmatpush3.bf16.msra.mxu0 %v11461_v22  ;;  %v11498_v21 = vld [vmem:[#allocation5 + $0x1b0] sm:$0xff]   ;;  %v11499_v22 = vld [vmem:[#allocation5 + $0x178] sm:$0xff]   ;;  %v11505_v45 = vld [vmem:[#allocation5 + $0x200] sm:$0xff]  }
  0x77   :  { %10322 = vmatpush3.bf16.msra.mxu1 %v11462_v23  ;;  %10301 = vmatprep.subr.bf16.mxu0 %v11463_v27  ;;  %v11500_v23 = vld [vmem:[#allocation5 + $0x1f8] sm:$0xff]   ;;  %v159_v27 = vld [vmem:[#allocation2 + $0x248] sm:$0xff]  ;;  %v11511_v55 = vld [vmem:[#allocation5 + $0x250] sm:$0xff]  }
  0x78   :  { %10323 = vmatprep.subr.bf16.mxu1 %v11464_v28  ;;  %v314_v28 = vcombine.low %v87_v24, %v111_v25  ;;  %v316_v31 = vcombine.low %v135_v26, %v159_v27  ;;  %v317_v32 = vcombine.high %v135_v26, %v159_v27  ;;  %v11507_v51 = vld [vmem:[#allocation5 + $0x248] sm:$0xff]   ;;  %v11514_v58 = vld [vmem:[#allocation5 + $0x290] sm:$0xff]   ;;  %v11515_v59 = vld [vmem:[#allocation5 + $0x258] sm:$0xff]  }
  0x79   :  { %v11508_v52 = vld [vmem:[#allocation5 + $0x2c8] sm:$0xff]   ;;  %v11536_v27 = vld [vmem:[#allocation5 + $0x3c0] sm:$0xff]  }
  0x7a   :  { %10302 = vmatpush3.bf16.msra.mxu0 %v11465_v29  ;;  %v315_v29 = vcombine.high %v87_v24, %v111_v25  ;;  %v345_v38 = vrot.slane %v317_v32, %v12455_v37  ;;  %v11509_v53 = vld [vmem:[#allocation5 + $0x208] sm:$0xff]  }
  0x7b   :  { %10324 = vmatpush3.bf16.msra.mxu1 %v11466_v30  ;;  %10303 = vmatprep.subr.bf16.mxu0 %v11467_v33  ;;  %v11501_v30 = vld [vmem:[#allocation5 + $0x138] sm:$0xff]   ;;  %v11510_v54 = vld [vmem:[#allocation5 + $0x288] sm:$0xff]  }
  0x7c   :  { %10325 = vmatprep.subr.bf16.mxu1 %v11468_v34  ;;  %v11502_v33 = vld [vmem:[#allocation5 + $0x1b8] sm:$0xff]   ;;  %v324_v34 = vrot.slane %v314_v28, %v12455_v37 }
  0x7e   :  { %10304 = vmatpush3.bf16.msra.mxu0 %v11469_v35  ;;  %v331_v35 = vrot.slane %v315_v29, %v12455_v37 }
  0x7f   :  { %10326 = vmatpush3.bf16.msra.mxu1 %v11470_v36  ;;  %10333 = vmatprep.subr.bf16.mxu0 %v11471_v46  ;;  %v338_v36 = vrot.slane %v316_v31, %v12455_v37  ;;  %v11506_v46 = vld [vmem:[#allocation5 + $0x280] sm:$0xff]  }
  0x80   :  { %10355 = vmatprep.subr.bf16.mxu1 %v11472_v49  ;;  %v349_v42 = vcombine.high %v331_v35, %v345_v38  ;;  %v348_v44 = vcombine.low %v331_v35, %v345_v38  ;;  %v11537_v31 = vld [vmem:[#allocation5 + $0x300] sm:$0xff]   ;;  %v11539_v38 = vld [vmem:[#allocation5 + $0x348] sm:$0xff]  }
  0x81   :  { %7518 = vmatmul.mubr.bf16.vlgmr.msra.gmra.mrb[0].mxu0 %v1238_v60  ;;  %v347_v41 = vcombine.high %v324_v34, %v338_v36  ;;  %v346_v43 = vcombine.low %v324_v34, %v338_v36  ;;  %v11516_v60 = vld [vmem:[#allocation5 + $0x2d8] sm:$0xff]   ;;  %v11538_v34 = vld [vmem:[#allocation5 + $0x380] sm:$0xff]  }
  0x82   :  { %7558 = vmatmul.mubr.bf16.vlgmr.msra.gmra.mrb[0].mxu1 %v1240_v61  ;;  %10334 = vmatpush3.bf16.msra.mxu0 %v11473_v56  ;;  %v1245_v48 = vpack.c.bf16 %v349_v42, %v349_v42  ;;  %v1244_v50 = vpack.c.bf16 %v348_v44, %v348_v44  ;;  %v11512_v56 = vld [vmem:[#allocation5 + $0x2d0] sm:$0xff]   ;;  %v11517_v61 = vld [vmem:[#allocation5 + $0x218] sm:$0xff]   ;;  %v11541_v42 = vld [vmem:[#allocation5 + $0x308] sm:$0xff]  }
  0x83   :  { %10356 = vmatpush3.bf16.msra.mxu1 %v11474_v57  ;;  %10335 = vmatprep.subr.bf16.mxu0 %v11475_v62  ;;  %v1243_v47 = vpack.c.bf16 %v347_v41, %v347_v41  ;;  %v1242_v49 = vpack.c.bf16 %v346_v43, %v346_v43  ;;  %v11513_v57 = vld [vmem:[#allocation5 + $0x210] sm:$0xff]   ;;  %v11518_v62 = vld [vmem:[#allocation5 + $0x298] sm:$0xff]   ;;  %v11540_v41 = vld [vmem:[#allocation5 + $0x3c8] sm:$0xff]  }
  0x84   :  { %10357 = vmatprep.subr.bf16.mxu1 %v11476_v63  ;;  %7637 = vmatprep.mubr.bf16.mxu1 %v1245_v48  ;;  %v11519_v63 = vld [vmem:[#allocation5 + $0x260] sm:$0xff]   ;;  %v11542_v43 = vld [vmem:[#allocation5 + $0x388] sm:$0xff]   ;;  %v11543_v44 = vld [vmem:[#allocation5 + $0x350] sm:$0xff]  }
  0x85   :  { %7597 = vmatprep.mubr.bf16.mxu0 %v1243_v47  ;;  %v11546_v47 = vld [vmem:[#allocation5 + $0x390] sm:$0xff]   ;;  %v11547_v48 = vld [vmem:[#allocation5 + $0x358] sm:$0xff]  }
  0x86   :  { %10336 = vmatpush3.bf16.msra.mxu0 %v11477_v0  ;;  %v11520_v0 = vld [vmem:[#allocation5 + $0x2e0] sm:$0xff]  }
  0x87   :  { %10358 = vmatpush3.bf16.msra.mxu1 %v11478_v1  ;;  %10337 = vmatprep.subr.bf16.mxu0 %v11479_v2  ;;  %v11521_v1 = vld [vmem:[#allocation5 + $0x220] sm:$0xff]  }
  0x88   :  { %10359 = vmatprep.subr.bf16.mxu1 %v11480_v3  ;;  %v11522_v2 = vld [vmem:[#allocation5 + $0x2a0] sm:$0xff]   ;;  %v11523_v3 = vld [vmem:[#allocation5 + $0x268] sm:$0xff]  }
  0x8a   :  { %10338 = vmatpush3.bf16.msra.mxu0 %v11481_v4  ;;  %v11524_v4 = vld [vmem:[#allocation5 + $0x2e8] sm:$0xff]  }
  0x8b   :  { %10360 = vmatpush3.bf16.msra.mxu1 %v11482_v5  ;;  %10339 = vmatprep.subr.bf16.mxu0 %v11483_v6  ;;  %v11525_v5 = vld [vmem:[#allocation5 + $0x228] sm:$0xff]  }
  0x8c   :  { %10361 = vmatprep.subr.bf16.mxu1 %v11484_v7  ;;  %v11526_v6 = vld [vmem:[#allocation5 + $0x2a8] sm:$0xff]   ;;  %v11527_v7 = vld [vmem:[#allocation5 + $0x270] sm:$0xff]  }
  0x8e   :  { %10340 = vmatpush3.bf16.msra.mxu0 %v11485_v8  ;;  %v11528_v8 = vld [vmem:[#allocation5 + $0x2f0] sm:$0xff]  }
  0x8f   :  { %10362 = vmatpush3.bf16.msra.mxu1 %v11486_v9  ;;  %10341 = vmatprep.subr.bf16.mxu0 %v11487_v10  ;;  %v11529_v9 = vld [vmem:[#allocation5 + $0x230] sm:$0xff]  }
  0x90   :  { %10363 = vmatprep.subr.bf16.mxu1 %v11488_v11  ;;  %v11530_v10 = vld [vmem:[#allocation5 + $0x2b0] sm:$0xff]   ;;  %v11531_v11 = vld [vmem:[#allocation5 + $0x278] sm:$0xff]  }
  0x92   :  { %10342 = vmatpush3.bf16.msra.mxu0 %v11489_v12  ;;  %v11532_v12 = vld [vmem:[#allocation5 + $0x2f8] sm:$0xff]  }
  0x93   :  { %10364 = vmatpush3.bf16.msra.mxu1 %v11490_v13  ;;  %10343 = vmatprep.subr.bf16.mxu0 %v11491_v14  ;;  %v88_v13 = vld [vmem:[#allocation2 + $0x10] sm:$0xff]  ;;  %v11533_v14 = vld [vmem:[#allocation5 + $0x238] sm:$0xff]  }
  0x94   :  { %10365 = vmatprep.subr.bf16.mxu1 %v11492_v15  ;;  %v112_v15 = vld [vmem:[#allocation2 + $0xd0] sm:$0xff] }
  0x96   :  { %10344 = vmatpush3.bf16.msra.mxu0 %v11493_v16  ;;  %v136_v16 = vld [vmem:[#allocation2 + $0x190] sm:$0xff] }
  0x97   :  { %10366 = vmatpush3.bf16.msra.mxu1 %v11494_v17  ;;  %10345 = vmatprep.subr.bf16.mxu0 %v11495_v18  ;;  %v160_v17 = vld [vmem:[#allocation2 + $0x250] sm:$0xff]  ;;  %v11534_v18 = vld [vmem:[#allocation5 + $0x2b8] sm:$0xff]  }
  0x98   :  { %10367 = vmatprep.subr.bf16.mxu1 %v11496_v19  ;;  %v350_v19 = vcombine.low %v88_v13, %v112_v15 }
  0x9a   :  { %10346 = vmatpush3.bf16.msra.mxu0 %v11497_v20  ;;  %v352_v20 = vcombine.low %v136_v16, %v160_v17  ;;  %v360_v24 = vrot.slane %v350_v19, %v12455_v37 }
  0x9b   :  { %10368 = vmatpush3.bf16.msra.mxu1 %v11498_v21  ;;  %10347 = vmatprep.subr.bf16.mxu0 %v11499_v22  ;;  %v351_v21 = vcombine.high %v88_v13, %v112_v15  ;;  %v353_v22 = vcombine.high %v136_v16, %v160_v17  ;;  %v11568_v17 = vld [vmem:[#allocation5 + $0x4c0] sm:$0xff]  }
  0x9c   :  { %10369 = vmatprep.subr.bf16.mxu1 %v11500_v23  ;;  %v11535_v23 = vld [vmem:[#allocation5 + $0x340] sm:$0xff]   ;;  %v374_v25 = vrot.slane %v352_v20, %v12455_v37 }
  0x9d   :  { %v367_v26 = vrot.slane %v351_v21, %v12455_v37  ;;  %v381_v28 = vrot.slane %v353_v22, %v12455_v37  ;;  %v11569_v22 = vld [vmem:[#allocation5 + $0x400] sm:$0xff]  }
  0x9e   :  { %10348 = vmatpush3.bf16.msra.mxu0 %v11501_v30  ;;  %v383_v29 = vcombine.high %v360_v24, %v374_v25  ;;  %v382_v30 = vcombine.low %v360_v24, %v374_v25 }
  0x9f   :  { %10370 = vmatpush3.bf16.msra.mxu1 %v11502_v33  ;;  %10377 = vmatprep.subr.bf16.mxu0 %v11503_v39  ;;  %v385_v32 = vcombine.high %v367_v26, %v381_v28  ;;  %v384_v33 = vcombine.low %v367_v26, %v381_v28  ;;  %v11571_v28 = vld [vmem:[#allocation5 + $0x448] sm:$0xff]  }
  0xa0   :  { %10399 = vmatprep.subr.bf16.mxu1 %v11504_v40  ;;  %v1247_v35 = vpack.c.bf16 %v383_v29, %v383_v29  ;;  %v1246_v36 = vpack.c.bf16 %v382_v30, %v382_v30  ;;  %v11572_v29 = vld [vmem:[#allocation5 + $0x4c8] sm:$0xff]  }
  0xa1   :  { %7598 = vmatmul.mubr.bf16.vlgmr.msra.gmra.mrb[4].mxu0 %v1242_v49  ;;  %v1249_v39 = vpack.c.bf16 %v385_v32, %v385_v32  ;;  %v1248_v40 = vpack.c.bf16 %v384_v33, %v384_v33  ;;  %v11548_v49 = vld [vmem:[#allocation5 + $0x3d8] sm:$0xff]   ;;  %v11573_v30 = vld [vmem:[#allocation5 + $0x408] sm:$0xff]   ;;  %v11575_v32 = vld [vmem:[#allocation5 + $0x450] sm:$0xff]  }
  0xa2   :  { %7638 = vmatmul.mubr.bf16.vlgmr.msra.gmra.mrb[4].mxu1 %v1244_v50  ;;  %10378 = vmatpush3.bf16.msra.mxu0 %v11505_v45  ;;  %v11544_v45 = vld [vmem:[#allocation5 + $0x3d0] sm:$0xff]   ;;  %v11549_v50 = vld [vmem:[#allocation5 + $0x318] sm:$0xff]  }
  0xa3   :  { %10400 = vmatpush3.bf16.msra.mxu1 %v11506_v46  ;;  %10379 = vmatprep.subr.bf16.mxu0 %v11507_v51  ;;  %v11545_v46 = vld [vmem:[#allocation5 + $0x310] sm:$0xff]   ;;  %v11550_v51 = vld [vmem:[#allocation5 + $0x398] sm:$0xff]  }
  0xa4   :  { %10401 = vmatprep.subr.bf16.mxu1 %v11508_v52  ;;  %7677 = vmatprep.mubr.bf16.mxu0 %v1247_v35  ;;  %v11551_v52 = vld [vmem:[#allocation5 + $0x360] sm:$0xff]   ;;  %v11576_v33 = vld [vmem:[#allocation5 + $0x4d0] sm:$0xff]  }
  0xa5   :  { %7717 = vmatprep.mubr.bf16.mxu1 %v1249_v39  ;;  %v11578_v35 = vld [vmem:[#allocation5 + $0x490] sm:$0xff]   ;;  %v11581_v39 = vld [vmem:[#allocation5 + $0x418] sm:$0xff]  }
  0xa6   :  { %10380 = vmatpush3.bf16.msra.mxu0 %v11509_v53  ;;  %v11552_v53 = vld [vmem:[#allocation5 + $0x3e0] sm:$0xff]  }
  0xa7   :  { %10402 = vmatpush3.bf16.msra.mxu1 %v11510_v54  ;;  %10381 = vmatprep.subr.bf16.mxu0 %v11511_v55  ;;  %v11553_v54 = vld [vmem:[#allocation5 + $0x320] sm:$0xff]  }
  0xa8   :  { %10403 = vmatprep.subr.bf16.mxu1 %v11512_v56  ;;  %v11554_v55 = vld [vmem:[#allocation5 + $0x3a0] sm:$0xff]   ;;  %v11555_v56 = vld [vmem:[#allocation5 + $0x368] sm:$0xff]  }
  0xaa   :  { %10382 = vmatpush3.bf16.msra.mxu0 %v11513_v57  ;;  %v11556_v57 = vld [vmem:[#allocation5 + $0x3e8] sm:$0xff]  }
  0xab   :  { %10404 = vmatpush3.bf16.msra.mxu1 %v11514_v58  ;;  %10383 = vmatprep.subr.bf16.mxu0 %v11515_v59  ;;  %v11557_v58 = vld [vmem:[#allocation5 + $0x328] sm:$0xff]  }
  0xac   :  { %10405 = vmatprep.subr.bf16.mxu1 %v11516_v60  ;;  %v11558_v59 = vld [vmem:[#allocation5 + $0x3a8] sm:$0xff]   ;;  %v11559_v60 = vld [vmem:[#allocation5 + $0x370] sm:$0xff]  }
  0xae   :  { %10384 = vmatpush3.bf16.msra.mxu0 %v11517_v61  ;;  %v11560_v61 = vld [vmem:[#allocation5 + $0x3f0] sm:$0xff]  }
  0xaf   :  { %10406 = vmatpush3.bf16.msra.mxu1 %v11518_v62  ;;  %10385 = vmatprep.subr.bf16.mxu0 %v11519_v63  ;;  %v11561_v62 = vld [vmem:[#allocation5 + $0x330] sm:$0xff]  }
  0xb0   :  { %10407 = vmatprep.subr.bf16.mxu1 %v11520_v0  ;;  %v11562_v63 = vld [vmem:[#allocation5 + $0x3b0] sm:$0xff]   ;;  %v11563_v0 = vld [vmem:[#allocation5 + $0x378] sm:$0xff]  }
  0xb2   :  { %10386 = vmatpush3.bf16.msra.mxu0 %v11521_v1  ;;  %v11564_v1 = vld [vmem:[#allocation5 + $0x3f8] sm:$0xff]  }
  0xb3   :  { %10408 = vmatpush3.bf16.msra.mxu1 %v11522_v2  ;;  %10387 = vmatprep.subr.bf16.mxu0 %v11523_v3  ;;  %v11565_v2 = vld [vmem:[#allocation5 + $0x338] sm:$0xff]  }
  0xb4   :  { %10409 = vmatprep.subr.bf16.mxu1 %v11524_v4  ;;  %v89_v3 = vld [vmem:[#allocation2 + $0x18] sm:$0xff] }
  0xb5   :  { %v113_v4 = vld [vmem:[#allocation2 + $0xd8] sm:$0xff] }
  0xb6   :  { %10388 = vmatpush3.bf16.msra.mxu0 %v11525_v5  ;;  %v137_v5 = vld [vmem:[#allocation2 + $0x198] sm:$0xff] }
  0xb7   :  { %10410 = vmatpush3.bf16.msra.mxu1 %v11526_v6  ;;  %10389 = vmatprep.subr.bf16.mxu0 %v11527_v7  ;;  %v161_v6 = vld [vmem:[#allocation2 + $0x258] sm:$0xff]  ;;  %v386_v7 = vcombine.low %v89_v3, %v113_v4 }
  0xb8   :  { %10411 = vmatprep.subr.bf16.mxu1 %v11528_v8  ;;  %v387_v8 = vcombine.high %v89_v3, %v113_v4 }
  0xba   :  { %10390 = vmatpush3.bf16.msra.mxu0 %v11529_v9  ;;  %v11566_v9 = vld [vmem:[#allocation5 + $0x3b8] sm:$0xff]   ;;  %v403_v13 = vrot.slane %v387_v8, %v12455_v37 }
  0xbb   :  { %10412 = vmatpush3.bf16.msra.mxu1 %v11530_v10  ;;  %10391 = vmatprep.subr.bf16.mxu0 %v11531_v11  ;;  %v388_v10 = vcombine.low %v137_v5, %v161_v6  ;;  %v389_v11 = vcombine.high %v137_v5, %v161_v6  ;;  %v11599_v5 = vld [vmem:[#allocation5 + $0x540] sm:$0xff]  }
  0xbc   :  { %10413 = vmatprep.subr.bf16.mxu1 %v11532_v12  ;;  %v396_v12 = vrot.slane %v386_v7, %v12455_v37  ;;  %v11600_v6 = vld [vmem:[#allocation5 + $0x5c0] sm:$0xff]  }
  0xbd   :  { %v410_v15 = vrot.slane %v388_v10, %v12455_v37  ;;  %v417_v16 = vrot.slane %v389_v11, %v12455_v37  ;;  %v11601_v11 = vld [vmem:[#allocation5 + $0x500] sm:$0xff]  }
  0xbe   :  { %10392 = vmatpush3.bf16.msra.mxu0 %v11533_v14  ;;  %v11567_v14 = vld [vmem:[#allocation5 + $0x440] sm:$0xff]  }
  0xbf   :  { %10414 = vmatpush3.bf16.msra.mxu1 %v11534_v18  ;;  %10421 = vmatprep.subr.bf16.mxu0 %v11535_v23  ;;  %v419_v18 = vcombine.high %v396_v12, %v410_v15  ;;  %v421_v19 = vcombine.high %v403_v13, %v417_v16  ;;  %v418_v20 = vcombine.low %v396_v12, %v410_v15  ;;  %v11570_v23 = vld [vmem:[#allocation5 + $0x480] sm:$0xff]  }
  0xc0   :  { %10443 = vmatprep.subr.bf16.mxu1 %v11536_v27  ;;  %v420_v21 = vcombine.low %v403_v13, %v417_v16  ;;  %v11602_v12 = vld [vmem:[#allocation5 + $0x580] sm:$0xff]  }
  0xc1   :  { %7678 = vmatmul.mubr.bf16.vlgmr.msra.gmra.mrb[8].mxu0 %v1246_v36  ;;  %v1251_v24 = vpack.c.bf16 %v419_v18, %v419_v18  ;;  %v1253_v25 = vpack.c.bf16 %v421_v19, %v421_v19  ;;  %v1250_v26 = vpack.c.bf16 %v418_v20, %v418_v20  ;;  %v11579_v36 = vld [vmem:[#allocation5 + $0x458] sm:$0xff]   ;;  %v11604_v18 = vld [vmem:[#allocation5 + $0x5c8] sm:$0xff]  }
  0xc2   :  { %7718 = vmatmul.mubr.bf16.vlgmr.msra.gmra.mrb[8].mxu1 %v1248_v40  ;;  %10422 = vmatpush3.bf16.msra.mxu0 %v11537_v31  ;;  %v1252_v27 = vpack.c.bf16 %v420_v21, %v420_v21  ;;  %v11574_v31 = vld [vmem:[#allocation5 + $0x488] sm:$0xff]   ;;  %v11582_v40 = vld [vmem:[#allocation5 + $0x498] sm:$0xff]   ;;  %v11607_v21 = vld [vmem:[#allocation5 + $0x550] sm:$0xff]  }
  0xc3   :  { %10444 = vmatpush3.bf16.msra.mxu1 %v11538_v34  ;;  %10423 = vmatprep.subr.bf16.mxu0 %v11539_v38  ;;  %v11577_v34 = vld [vmem:[#allocation5 + $0x410] sm:$0xff]   ;;  %v11580_v38 = vld [vmem:[#allocation5 + $0x4d8] sm:$0xff]   ;;  %v11605_v19 = vld [vmem:[#allocation5 + $0x508] sm:$0xff]  }
  0xc4   :  { %10445 = vmatprep.subr.bf16.mxu1 %v11540_v41  ;;  %7757 = vmatprep.mubr.bf16.mxu0 %v1251_v24  ;;  %v11583_v41 = vld [vmem:[#allocation5 + $0x460] sm:$0xff]   ;;  %v11606_v20 = vld [vmem:[#allocation5 + $0x588] sm:$0xff]   ;;  %v11610_v24 = vld [vmem:[#allocation5 + $0x590] sm:$0xff]  }
  0xc5   :  { %7797 = vmatprep.mubr.bf16.mxu1 %v1253_v25  ;;  %v11611_v25 = vld [vmem:[#allocation5 + $0x558] sm:$0xff]  }
  0xc6   :  { %10424 = vmatpush3.bf16.msra.mxu0 %v11541_v42  ;;  %v11584_v42 = vld [vmem:[#allocation5 + $0x4e0] sm:$0xff]  }
  0xc7   :  { %10446 = vmatpush3.bf16.msra.mxu1 %v11542_v43  ;;  %10425 = vmatprep.subr.bf16.mxu0 %v11543_v44  ;;  %v11585_v43 = vld [vmem:[#allocation5 + $0x420] sm:$0xff]  }
  0xc8   :  { %10447 = vmatprep.subr.bf16.mxu1 %v11544_v45  ;;  %v11586_v44 = vld [vmem:[#allocation5 + $0x4a0] sm:$0xff]   ;;  %v11587_v45 = vld [vmem:[#allocation5 + $0x468] sm:$0xff]  }
  0xca   :  { %10426 = vmatpush3.bf16.msra.mxu0 %v11545_v46  ;;  %v11588_v46 = vld [vmem:[#allocation5 + $0x4e8] sm:$0xff]  }
  0xcb   :  { %10448 = vmatpush3.bf16.msra.mxu1 %v11546_v47  ;;  %10427 = vmatprep.subr.bf16.mxu0 %v11547_v48  ;;  %v11589_v47 = vld [vmem:[#allocation5 + $0x428] sm:$0xff]  }
  0xcc   :  { %10449 = vmatprep.subr.bf16.mxu1 %v11548_v49  ;;  %v11590_v48 = vld [vmem:[#allocation5 + $0x4a8] sm:$0xff]   ;;  %v11591_v49 = vld [vmem:[#allocation5 + $0x470] sm:$0xff]  }
  0xce   :  { %10428 = vmatpush3.bf16.msra.mxu0 %v11549_v50  ;;  %v11592_v50 = vld [vmem:[#allocation5 + $0x4f0] sm:$0xff]  }
  0xcf   :  { %10450 = vmatpush3.bf16.msra.mxu1 %v11550_v51  ;;  %10429 = vmatprep.subr.bf16.mxu0 %v11551_v52  ;;  %v11593_v51 = vld [vmem:[#allocation5 + $0x430] sm:$0xff]  }
  0xd0   :  { %10451 = vmatprep.subr.bf16.mxu1 %v11552_v53  ;;  %v11594_v52 = vld [vmem:[#allocation5 + $0x4b0] sm:$0xff]   ;;  %v11595_v53 = vld [vmem:[#allocation5 + $0x478] sm:$0xff]  }
  0xd2   :  { %10430 = vmatpush3.bf16.msra.mxu0 %v11553_v54  ;;  %v11596_v54 = vld [vmem:[#allocation5 + $0x4f8] sm:$0xff]  }
  0xd3   :  { %10452 = vmatpush3.bf16.msra.mxu1 %v11554_v55  ;;  %10431 = vmatprep.subr.bf16.mxu0 %v11555_v56  ;;  %v90_v55 = vld [vmem:[#allocation2 + $0x20] sm:$0xff] }
  0xd4   :  { %10453 = vmatprep.subr.bf16.mxu1 %v11556_v57  ;;  %v114_v56 = vld [vmem:[#allocation2 + $0xe0] sm:$0xff] }
  0xd5   :  { %v138_v57 = vld [vmem:[#allocation2 + $0x1a0] sm:$0xff] }
  0xd6   :  { %10432 = vmatpush3.bf16.msra.mxu0 %v11557_v58  ;;  %v162_v58 = vld [vmem:[#allocation2 + $0x260] sm:$0xff] }
  0xd7   :  { %10454 = vmatpush3.bf16.msra.mxu1 %v11558_v59  ;;  %10433 = vmatprep.subr.bf16.mxu0 %v11559_v60  ;;  %v422_v59 = vcombine.low %v90_v55, %v114_v56  ;;  %v423_v60 = vcombine.high %v90_v55, %v114_v56 }
  0xd8   :  { %10455 = vmatprep.subr.bf16.mxu1 %v11560_v61  ;;  %v11597_v61 = vld [vmem:[#allocation5 + $0x438] sm:$0xff]  }
  0xda   :  { %10434 = vmatpush3.bf16.msra.mxu0 %v11561_v62  ;;  %v424_v62 = vcombine.low %v138_v57, %v162_v58 }
  0xdb   :  { %10456 = vmatpush3.bf16.msra.mxu1 %v11562_v63  ;;  %10435 = vmatprep.subr.bf16.mxu0 %v11563_v0  ;;  %v425_v63 = vcombine.high %v138_v57, %v162_v58  ;;  %v11598_v0 = vld [vmem:[#allocation5 + $0x4b8] sm:$0xff]   ;;  %v11632_v58 = vld [vmem:[#allocation5 + $0x6c0] sm:$0xff]  }
  0xdc   :  { %10457 = vmatprep.subr.bf16.mxu1 %v11564_v1  ;;  %v432_v1 = vrot.slane %v422_v59, %v12455_v37  ;;  %v446_v3 = vrot.slane %v424_v62, %v12455_v37  ;;  %v11633_v62 = vld [vmem:[#allocation5 + $0x600] sm:$0xff]  }
  0xdd   :  { %v453_v4 = vrot.slane %v425_v63, %v12455_v37 }
  0xde   :  { %10436 = vmatpush3.bf16.msra.mxu0 %v11565_v2  ;;  %v439_v2 = vrot.slane %v423_v60, %v12455_v37  ;;  %v455_v7 = vcombine.high %v432_v1, %v446_v3 }
  0xdf   :  { %10458 = vmatpush3.bf16.msra.mxu1 %v11566_v9  ;;  %10465 = vmatprep.subr.bf16.mxu0 %v11567_v14  ;;  %v454_v9 = vcombine.low %v432_v1, %v446_v3  ;;  %v11634_v1 = vld [vmem:[#allocation5 + $0x680] sm:$0xff]  }
  0xe0   :  { %10487 = vmatprep.subr.bf16.mxu1 %v11568_v17  ;;  %v457_v8 = vcombine.high %v439_v2, %v453_v4  ;;  %v456_v10 = vcombine.low %v439_v2, %v453_v4  ;;  %v1255_v13 = vpack.c.bf16 %v455_v7, %v455_v7  ;;  %v11603_v17 = vld [vmem:[#allocation5 + $0x548] sm:$0xff]  }
  0xe1   :  { %7758 = vmatmul.mubr.bf16.vlgmr.msra.gmra.mrb[12].mxu0 %v1250_v26  ;;  %v1254_v15 = vpack.c.bf16 %v454_v9, %v454_v9  ;;  %v11612_v26 = vld [vmem:[#allocation5 + $0x5d8] sm:$0xff]   ;;  %v11635_v4 = vld [vmem:[#allocation5 + $0x648] sm:$0xff]  }
  0xe2   :  { %7798 = vmatmul.mubr.bf16.vlgmr.msra.gmra.mrb[12].mxu1 %v1252_v27  ;;  %10466 = vmatpush3.bf16.msra.mxu0 %v11569_v22  ;;  %v1257_v14 = vpack.c.bf16 %v457_v8, %v457_v8  ;;  %v1256_v16 = vpack.c.bf16 %v456_v10, %v456_v10  ;;  %v11608_v22 = vld [vmem:[#allocation5 + $0x5d0] sm:$0xff]   ;;  %v11613_v27 = vld [vmem:[#allocation5 + $0x518] sm:$0xff]   ;;  %v11636_v7 = vld [vmem:[#allocation5 + $0x6c8] sm:$0xff]  }
  0xe3   :  { %10488 = vmatpush3.bf16.msra.mxu1 %v11570_v23  ;;  %10467 = vmatprep.subr.bf16.mxu0 %v11571_v28  ;;  %v11609_v23 = vld [vmem:[#allocation5 + $0x510] sm:$0xff]   ;;  %v11614_v28 = vld [vmem:[#allocation5 + $0x598] sm:$0xff]   ;;  %v11637_v8 = vld [vmem:[#allocation5 + $0x608] sm:$0xff]  }
  0xe4   :  { %10489 = vmatprep.subr.bf16.mxu1 %v11572_v29  ;;  %7837 = vmatprep.mubr.bf16.mxu0 %v1255_v13  ;;  %v11615_v29 = vld [vmem:[#allocation5 + $0x560] sm:$0xff]   ;;  %v11638_v9 = vld [vmem:[#allocation5 + $0x688] sm:$0xff]   ;;  %v11639_v10 = vld [vmem:[#allocation5 + $0x650] sm:$0xff]  }
  0xe5   :  { %7877 = vmatprep.mubr.bf16.mxu1 %v1257_v14  ;;  %v11642_v13 = vld [vmem:[#allocation5 + $0x690] sm:$0xff]   ;;  %v11643_v14 = vld [vmem:[#allocation5 + $0x658] sm:$0xff]  }
  0xe6   :  { %10468 = vmatpush3.bf16.msra.mxu0 %v11573_v30  ;;  %v11616_v30 = vld [vmem:[#allocation5 + $0x5e0] sm:$0xff]  }
  0xe7   :  { %10490 = vmatpush3.bf16.msra.mxu1 %v11574_v31  ;;  %10469 = vmatprep.subr.bf16.mxu0 %v11575_v32  ;;  %v11617_v31 = vld [vmem:[#allocation5 + $0x520] sm:$0xff]  }
  0xe8   :  { %10491 = vmatprep.subr.bf16.mxu1 %v11576_v33  ;;  %v11618_v32 = vld [vmem:[#allocation5 + $0x5a0] sm:$0xff]   ;;  %v11619_v33 = vld [vmem:[#allocation5 + $0x568] sm:$0xff]  }
  0xea   :  { %10470 = vmatpush3.bf16.msra.mxu0 %v11577_v34  ;;  %v11620_v34 = vld [vmem:[#allocation5 + $0x5e8] sm:$0xff]  }
  0xeb   :  { %10492 = vmatpush3.bf16.msra.mxu1 %v11578_v35  ;;  %10471 = vmatprep.subr.bf16.mxu0 %v11579_v36  ;;  %v11621_v35 = vld [vmem:[#allocation5 + $0x528] sm:$0xff]  }
  0xec   :  { %10493 = vmatprep.subr.bf16.mxu1 %v11580_v38  ;;  %v11622_v36 = vld [vmem:[#allocation5 + $0x5a8] sm:$0xff]   ;;  %v11623_v38 = vld [vmem:[#allocation5 + $0x570] sm:$0xff]  }
  0xee   :  { %10472 = vmatpush3.bf16.msra.mxu0 %v11581_v39  ;;  %v11624_v39 = vld [vmem:[#allocation5 + $0x5f0] sm:$0xff]  }
  0xef   :  { %10494 = vmatpush3.bf16.msra.mxu1 %v11582_v40  ;;  %10473 = vmatprep.subr.bf16.mxu0 %v11583_v41  ;;  %v11625_v40 = vld [vmem:[#allocation5 + $0x530] sm:$0xff]  }
  0xf0   :  { %10495 = vmatprep.subr.bf16.mxu1 %v11584_v42  ;;  %v11626_v41 = vld [vmem:[#allocation5 + $0x5b0] sm:$0xff]   ;;  %v11627_v42 = vld [vmem:[#allocation5 + $0x578] sm:$0xff]  }
  0xf2   :  { %10474 = vmatpush3.bf16.msra.mxu0 %v11585_v43  ;;  %v11628_v43 = vld [vmem:[#allocation5 + $0x5f8] sm:$0xff]  }
  0xf3   :  { %10496 = vmatpush3.bf16.msra.mxu1 %v11586_v44  ;;  %10475 = vmatprep.subr.bf16.mxu0 %v11587_v45  ;;  %v91_v44 = vld [vmem:[#allocation2 + $0x28] sm:$0xff]  ;;  %v11629_v45 = vld [vmem:[#allocation5 + $0x538] sm:$0xff]  }
  0xf4   :  { %10497 = vmatprep.subr.bf16.mxu1 %v11588_v46  ;;  %v115_v46 = vld [vmem:[#allocation2 + $0xe8] sm:$0xff] }
  0xf6   :  { %10476 = vmatpush3.bf16.msra.mxu0 %v11589_v47  ;;  %v139_v47 = vld [vmem:[#allocation2 + $0x1a8] sm:$0xff] }
  0xf7   :  { %10498 = vmatpush3.bf16.msra.mxu1 %v11590_v48  ;;  %10477 = vmatprep.subr.bf16.mxu0 %v11591_v49  ;;  %v163_v48 = vld [vmem:[#allocation2 + $0x268] sm:$0xff]  ;;  %v11630_v49 = vld [vmem:[#allocation5 + $0x5b8] sm:$0xff]  }
  0xf8   :  { %10499 = vmatprep.subr.bf16.mxu1 %v11592_v50  ;;  %v458_v50 = vcombine.low %v91_v44, %v115_v46 }
  0xfa   :  { %10478 = vmatpush3.bf16.msra.mxu0 %v11593_v51  ;;  %v460_v51 = vcombine.low %v139_v47, %v163_v48  ;;  %v468_v55 = vrot.slane %v458_v50, %v12455_v37 }
  0xfb   :  { %10500 = vmatpush3.bf16.msra.mxu1 %v11594_v52  ;;  %10479 = vmatprep.subr.bf16.mxu0 %v11595_v53  ;;  %v459_v52 = vcombine.high %v91_v44, %v115_v46  ;;  %v461_v53 = vcombine.high %v139_v47, %v163_v48  ;;  %v11664_v48 = vld [vmem:[#allocation5 + $0x7c0] sm:$0xff]  }
  0xfc   :  { %10501 = vmatprep.subr.bf16.mxu1 %v11596_v54  ;;  %v11631_v54 = vld [vmem:[#allocation5 + $0x640] sm:$0xff]   ;;  %v482_v56 = vrot.slane %v460_v51, %v12455_v37 }
  0xfd   :  { %v475_v57 = vrot.slane %v459_v52, %v12455_v37  ;;  %v489_v59 = vrot.slane %v461_v53, %v12455_v37  ;;  %v11665_v53 = vld [vmem:[#allocation5 + $0x700] sm:$0xff]  }
  0xfe   :  { %10480 = vmatpush3.bf16.msra.mxu0 %v11597_v61  ;;  %v491_v60 = vcombine.high %v468_v55, %v482_v56  ;;  %v490_v61 = vcombine.low %v468_v55, %v482_v56 }
  0xff   :  { %10502 = vmatpush3.bf16.msra.mxu1 %v11598_v0  ;;  %10509 = vmatprep.subr.bf16.mxu0 %v11599_v5  ;;  %v493_v63 = vcombine.high %v475_v57, %v489_v59  ;;  %v492_v0 = vcombine.low %v475_v57, %v489_v59  ;;  %v11667_v59 = vld [vmem:[#allocation5 + $0x748] sm:$0xff]  }
 0x100   :  { %10531 = vmatprep.subr.bf16.mxu1 %v11600_v6  ;;  %v1259_v2 = vpack.c.bf16 %v491_v60, %v491_v60  ;;  %v1258_v3 = vpack.c.bf16 %v490_v61, %v490_v61  ;;  %v11668_v60 = vld [vmem:[#allocation5 + $0x7c8] sm:$0xff]  }
 0x101   :  { %7838 = vmatmul.mubr.bf16.vlgmr.msra.gmra.mrb[16].mxu0 %v1254_v15  ;;  %v1261_v5 = vpack.c.bf16 %v493_v63, %v493_v63  ;;  %v1260_v6 = vpack.c.bf16 %v492_v0, %v492_v0  ;;  %v11644_v15 = vld [vmem:[#allocation5 + $0x6d8] sm:$0xff]   ;;  %v11669_v61 = vld [vmem:[#allocation5 + $0x708] sm:$0xff]   ;;  %v11671_v63 = vld [vmem:[#allocation5 + $0x750] sm:$0xff]  }
 0x102   :  { %7878 = vmatmul.mubr.bf16.vlgmr.msra.gmra.mrb[16].mxu1 %v1256_v16  ;;  %10510 = vmatpush3.bf16.msra.mxu0 %v11601_v11  ;;  %v11640_v11 = vld [vmem:[#allocation5 + $0x6d0] sm:$0xff]   ;;  %v11645_v16 = vld [vmem:[#allocation5 + $0x618] sm:$0xff]  }
 0x103   :  { %10532 = vmatpush3.bf16.msra.mxu1 %v11602_v12  ;;  %10511 = vmatprep.subr.bf16.mxu0 %v11603_v17  ;;  %v11641_v12 = vld [vmem:[#allocation5 + $0x610] sm:$0xff]   ;;  %v11646_v17 = vld [vmem:[#allocation5 + $0x698] sm:$0xff]  }
 0x104   :  { %10533 = vmatprep.subr.bf16.mxu1 %v11604_v18  ;;  %7917 = vmatprep.mubr.bf16.mxu0 %v1259_v2  ;;  %v11647_v18 = vld [vmem:[#allocation5 + $0x660] sm:$0xff]   ;;  %v11672_v0 = vld [vmem:[#allocation5 + $0x7d0] sm:$0xff]  }
 0x105   :  { %7957 = vmatprep.mubr.bf16.mxu1 %v1261_v5  ;;  %v11674_v2 = vld [vmem:[#allocation5 + $0x790] sm:$0xff]   ;;  %v11677_v5 = vld [vmem:[#allocation5 + $0x718] sm:$0xff]  }
 0x106   :  { %10512 = vmatpush3.bf16.msra.mxu0 %v11605_v19  ;;  %v11648_v19 = vld [vmem:[#allocation5 + $0x6e0] sm:$0xff]  }
 0x107   :  { %10534 = vmatpush3.bf16.msra.mxu1 %v11606_v20  ;;  %10513 = vmatprep.subr.bf16.mxu0 %v11607_v21  ;;  %v11649_v20 = vld [vmem:[#allocation5 + $0x620] sm:$0xff]  }
 0x108   :  { %10535 = vmatprep.subr.bf16.mxu1 %v11608_v22  ;;  %v11650_v21 = vld [vmem:[#allocation5 + $0x6a0] sm:$0xff]   ;;  %v11651_v22 = vld [vmem:[#allocation5 + $0x668] sm:$0xff]  }
 0x10a   :  { %10514 = vmatpush3.bf16.msra.mxu0 %v11609_v23  ;;  %v11652_v23 = vld [vmem:[#allocation5 + $0x6e8] sm:$0xff]  }
 0x10b   :  { %10536 = vmatpush3.bf16.msra.mxu1 %v11610_v24  ;;  %10515 = vmatprep.subr.bf16.mxu0 %v11611_v25  ;;  %v11653_v24 = vld [vmem:[#allocation5 + $0x628] sm:$0xff]  }
 0x10c   :  { %10537 = vmatprep.subr.bf16.mxu1 %v11612_v26  ;;  %v11654_v25 = vld [vmem:[#allocation5 + $0x6a8] sm:$0xff]   ;;  %v11655_v26 = vld [vmem:[#allocation5 + $0x670] sm:$0xff]  }
 0x10e   :  { %10516 = vmatpush3.bf16.msra.mxu0 %v11613_v27  ;;  %v11656_v27 = vld [vmem:[#allocation5 + $0x6f0] sm:$0xff]  }
 0x10f   :  { %10538 = vmatpush3.bf16.msra.mxu1 %v11614_v28  ;;  %10517 = vmatprep.subr.bf16.mxu0 %v11615_v29  ;;  %v11657_v28 = vld [vmem:[#allocation5 + $0x630] sm:$0xff]  }
 0x110   :  { %10539 = vmatprep.subr.bf16.mxu1 %v11616_v30  ;;  %v11658_v29 = vld [vmem:[#allocation5 + $0x6b0] sm:$0xff]   ;;  %v11659_v30 = vld [vmem:[#allocation5 + $0x678] sm:$0xff]  }
 0x112   :  { %10518 = vmatpush3.bf16.msra.mxu0 %v11617_v31  ;;  %v11660_v31 = vld [vmem:[#allocation5 + $0x6f8] sm:$0xff]  }
 0x113   :  { %10540 = vmatpush3.bf16.msra.mxu1 %v11618_v32  ;;  %10519 = vmatprep.subr.bf16.mxu0 %v11619_v33  ;;  %v11661_v32 = vld [vmem:[#allocation5 + $0x638] sm:$0xff]   ;;  %v92_v33 = vld [vmem:[#allocation2 + $0x30] sm:$0xff] }
 0x114   :  { %10541 = vmatprep.subr.bf16.mxu1 %v11620_v34  ;;  %v116_v34 = vld [vmem:[#allocation2 + $0xf0] sm:$0xff] }
 0x116   :  { %10520 = vmatpush3.bf16.msra.mxu0 %v11621_v35  ;;  %v140_v35 = vld [vmem:[#allocation2 + $0x1b0] sm:$0xff] }
 0x117   :  { %10542 = vmatpush3.bf16.msra.mxu1 %v11622_v36  ;;  %10521 = vmatprep.subr.bf16.mxu0 %v11623_v38  ;;  %v164_v36 = vld [vmem:[#allocation2 + $0x270] sm:$0xff]  ;;  %v494_v38 = vcombine.low %v92_v33, %v116_v34 }
 0x118   :  { %10543 = vmatprep.subr.bf16.mxu1 %v11624_v39  ;;  %v495_v39 = vcombine.high %v92_v33, %v116_v34  ;;  %v11692_v33 = vld [vmem:[#allocation5 + $0x7f8] sm:$0xff]  }
 0x119   :  { %v11693_v34 = vld [vmem:[#allocation5 + $0x738] sm:$0xff]  }
 0x11a   :  { %10522 = vmatpush3.bf16.msra.mxu0 %v11625_v40  ;;  %v11662_v40 = vld [vmem:[#allocation5 + $0x6b8] sm:$0xff]   ;;  %v511_v44 = vrot.slane %v495_v39, %v12455_v37 }
 0x11b   :  { %10544 = vmatpush3.bf16.msra.mxu1 %v11626_v41  ;;  %10523 = vmatprep.subr.bf16.mxu0 %v11627_v42  ;;  %v496_v41 = vcombine.low %v140_v35, %v164_v36  ;;  %v497_v42 = vcombine.high %v140_v35, %v164_v36  ;;  %v11694_v35 = vld [vmem:[#allocation5 + $0x7b8] sm:$0xff]  }
 0x11c   :  { %10545 = vmatprep.subr.bf16.mxu1 %v11628_v43  ;;  %v504_v43 = vrot.slane %v494_v38, %v12455_v37  ;;  %v93_v36 = vld [vmem:[#allocation2 + $0x38] sm:$0xff] }
 0x11d   :  { %v518_v46 = vrot.slane %v496_v41, %v12455_v37  ;;  %v525_v47 = vrot.slane %v497_v42, %v12455_v37  ;;  %v117_v38 = vld [vmem:[#allocation2 + $0xf8] sm:$0xff] }
 0x11e   :  { %10524 = vmatpush3.bf16.msra.mxu0 %v11629_v45  ;;  %v11663_v45 = vld [vmem:[#allocation5 + $0x740] sm:$0xff]   ;;  %v141_v39 = vld [vmem:[#allocation2 + $0x1b8] sm:$0xff]  ;;  %v530_v41 = vcombine.low %v93_v36, %v117_v38  ;;  %v531_v42 = vcombine.high %v93_v36, %v117_v38 }
 0x11f   :  { %10546 = vmatpush3.bf16.msra.mxu1 %v11630_v49  ;;  %10553 = vmatprep.subr.bf16.mxu0 %v11631_v54  ;;  %v527_v49 = vcombine.high %v504_v43, %v518_v46  ;;  %v529_v50 = vcombine.high %v511_v44, %v525_v47  ;;  %v526_v51 = vcombine.low %v504_v43, %v518_v46  ;;  %v11666_v54 = vld [vmem:[#allocation5 + $0x780] sm:$0xff]   ;;  %v11726_v36 = vld [vmem:[#allocation5 + $0x8b8] sm:$0xff]  }
 0x120   :  { %10575 = vmatprep.subr.bf16.mxu1 %v11632_v58  ;;  %v528_v52 = vcombine.low %v511_v44, %v525_v47  ;;  %v540_v46 = vrot.slane %v530_v41, %v12455_v37  ;;  %v547_v47 = vrot.slane %v531_v42, %v12455_v37  ;;  %v94_v38 = vld [vmem:[#allocation2 + $0x40] sm:$0xff] }
 0x121   :  { %7918 = vmatmul.mubr.bf16.vlgmr.msra.gmra.mrb[20].mxu0 %v1258_v3  ;;  %v1263_v55 = vpack.c.bf16 %v527_v49, %v527_v49  ;;  %v1265_v56 = vpack.c.bf16 %v529_v50, %v529_v50  ;;  %v1262_v57 = vpack.c.bf16 %v526_v51, %v526_v51  ;;  %v11675_v3 = vld [vmem:[#allocation5 + $0x758] sm:$0xff]   ;;  %v166_v41 = vld [vmem:[#allocation2 + $0x280] sm:$0xff] }
 0x122   :  { %7958 = vmatmul.mubr.bf16.vlgmr.msra.gmra.mrb[20].mxu1 %v1260_v6  ;;  %10554 = vmatpush3.bf16.msra.mxu0 %v11633_v62  ;;  %v1264_v58 = vpack.c.bf16 %v528_v52, %v528_v52  ;;  %v11670_v62 = vld [vmem:[#allocation5 + $0x788] sm:$0xff]   ;;  %v11678_v6 = vld [vmem:[#allocation5 + $0x798] sm:$0xff]  }
 0x123   :  { %10576 = vmatpush3.bf16.msra.mxu1 %v11634_v1  ;;  %10555 = vmatprep.subr.bf16.mxu0 %v11635_v4  ;;  %v11673_v1 = vld [vmem:[#allocation5 + $0x710] sm:$0xff]   ;;  %v11676_v4 = vld [vmem:[#allocation5 + $0x7d8] sm:$0xff]  }
 0x124   :  { %10577 = vmatprep.subr.bf16.mxu1 %v11636_v7  ;;  %7997 = vmatprep.mubr.bf16.mxu0 %v1263_v55  ;;  %v11679_v7 = vld [vmem:[#allocation5 + $0x760] sm:$0xff]  }
 0x125   :  { %8037 = vmatprep.mubr.bf16.mxu1 %v1265_v56  ;;  %v11698_v56 = vld [vmem:[#allocation5 + $0x880] sm:$0xff]  }
 0x126   :  { %10556 = vmatpush3.bf16.msra.mxu0 %v11637_v8  ;;  %v11680_v8 = vld [vmem:[#allocation5 + $0x7e0] sm:$0xff]  }
 0x127   :  { %10578 = vmatpush3.bf16.msra.mxu1 %v11638_v9  ;;  %10557 = vmatprep.subr.bf16.mxu0 %v11639_v10  ;;  %v11681_v9 = vld [vmem:[#allocation5 + $0x720] sm:$0xff]  }
 0x128   :  { %10579 = vmatprep.subr.bf16.mxu1 %v11640_v11  ;;  %v11682_v10 = vld [vmem:[#allocation5 + $0x7a0] sm:$0xff]  }
 0x12a   :  { %10558 = vmatpush3.bf16.msra.mxu0 %v11641_v12 }
 0x12b   :  { %10580 = vmatpush3.bf16.msra.mxu1 %v11642_v13  ;;  %10559 = vmatprep.subr.bf16.mxu0 %v11643_v14  ;;  %v9519_v13 = vld [vmem:[#allocation7] ss:$0 sm:$0xff] }
 0x12c   :  { %10581 = vmatprep.subr.bf16.mxu1 %v11644_v15 }
 0x12e   :  { %10560 = vmatpush3.bf16.msra.mxu0 %v11645_v16  ;;  %v11683_v16 = vld [vmem:[#allocation5 + $0x768] sm:$0xff]  }
 0x12f   :  { %10582 = vmatpush3.bf16.msra.mxu1 %v11646_v17  ;;  %10561 = vmatprep.subr.bf16.mxu0 %v11647_v18 }
 0x130   :  { %10583 = vmatprep.subr.bf16.mxu1 %v11648_v19 }
 0x132   :  { %10562 = vmatpush3.bf16.msra.mxu0 %v11649_v20 }
 0x133   :  { %10584 = vmatpush3.bf16.msra.mxu1 %v11650_v21  ;;  %10563 = vmatprep.subr.bf16.mxu0 %v11651_v22  ;;  %v11684_v21 = vld [vmem:[#allocation5 + $0x7e8] sm:$0xff]  }
 0x134   :  { %10585 = vmatprep.subr.bf16.mxu1 %v11652_v23 }
 0x136   :  { %10564 = vmatpush3.bf16.msra.mxu0 %v11653_v24  ;;  %v11685_v24 = vld [vmem:[#allocation5 + $0x728] sm:$0xff]  }
 0x137   :  { %10586 = vmatpush3.bf16.msra.mxu1 %v11654_v25  ;;  %10565 = vmatprep.subr.bf16.mxu0 %v11655_v26  ;;  %v11686_v26 = vld [vmem:[#allocation5 + $0x7a8] sm:$0xff]  }
 0x138   :  { %10587 = vmatprep.subr.bf16.mxu1 %v11656_v27 }
 0x13a   :  { %10566 = vmatpush3.bf16.msra.mxu0 %v11657_v28  ;;  %v11687_v28 = vld [vmem:[#allocation5 + $0x770] sm:$0xff]  }
 0x13b   :  { %10588 = vmatpush3.bf16.msra.mxu1 %v11658_v29  ;;  %10567 = vmatprep.subr.bf16.mxu0 %v11659_v30  ;;  %v11688_v29 = vld [vmem:[#allocation5 + $0x7f0] sm:$0xff]  }
 0x13c   :  { %10589 = vmatprep.subr.bf16.mxu1 %v11660_v31  ;;  %v11689_v30 = vld [vmem:[#allocation5 + $0x730] sm:$0xff]  }
 0x13d   :  { %v11690_v31 = vld [vmem:[#allocation5 + $0x7b0] sm:$0xff]  }
 0x13e   :  { %10568 = vmatpush3.bf16.msra.mxu0 %v11661_v32  ;;  %v11691_v32 = vld [vmem:[#allocation5 + $0x778] sm:$0xff]  }
 0x13f   :  { %10590 = vmatpush3.bf16.msra.mxu1 %v11662_v40  ;;  %10597 = vmatprep.subr.bf16.mxu0 %v11663_v45  ;;  %v165_v40 = vld [vmem:[#allocation2 + $0x278] sm:$0xff]  ;;  %v11695_v45 = vld [vmem:[#allocation5 + $0x840] sm:$0xff]  }
 0x140   :  { %10619 = vmatprep.subr.bf16.mxu1 %v11664_v48  ;;  %v532_v43 = vcombine.low %v141_v39, %v165_v40  ;;  %v533_v44 = vcombine.high %v141_v39, %v165_v40  ;;  %v11696_v48 = vld [vmem:[#allocation5 + $0x8c0] sm:$0xff]  }
 0x141   :  { %7998 = vmatmul.mubr.bf16.vlgmr.msra.gmra.mrb[24].mxu0 %v1262_v57  ;;  %v118_v39 = vld [vmem:[#allocation2 + $0x100] sm:$0xff] }
 0x142   :  { %8038 = vmatmul.mubr.bf16.vlgmr.msra.gmra.mrb[24].mxu1 %v1264_v58  ;;  %10598 = vmatpush3.bf16.msra.mxu0 %v11665_v53  ;;  %v554_v49 = vrot.slane %v532_v43, %v12455_v37  ;;  %v561_v50 = vrot.slane %v533_v44, %v12455_v37  ;;  %v142_v40 = vld [vmem:[#allocation2 + $0x1c0] sm:$0xff]  ;;  %v566_v42 = vcombine.low %v94_v38, %v118_v39 }
 0x143   :  { %10620 = vmatpush3.bf16.msra.mxu1 %v11666_v54  ;;  %10599 = vmatprep.subr.bf16.mxu0 %v11667_v59  ;;  %v11697_v54 = vld [vmem:[#allocation5 + $0x800] sm:$0xff]   ;;  %v567_v43 = vcombine.high %v94_v38, %v118_v39  ;;  %v568_v44 = vcombine.low %v142_v40, %v166_v41  ;;  %v11757_v38 = vld [vmem:[#allocation5 + $0x938] sm:$0xff]   ;;  %v119_v39 = vld [vmem:[#allocation2 + $0x108] sm:$0xff] }
 0x144   :  { %10621 = vmatprep.subr.bf16.mxu1 %v11668_v60  ;;  %v563_v51 = vcombine.high %v540_v46, %v554_v49  ;;  %v565_v52 = vcombine.high %v547_v47, %v561_v50  ;;  %v562_v53 = vcombine.low %v540_v46, %v554_v49  ;;  %v564_v55 = vcombine.low %v547_v47, %v561_v50  ;;  %v11699_v60 = vld [vmem:[#allocation5 + $0x848] sm:$0xff]   ;;  %v11727_v46 = vld [vmem:[#allocation5 + $0x940] sm:$0xff]  }
 0x145   :  { %v576_v47 = vrot.slane %v566_v42, %v12455_v37  ;;  %v11728_v49 = vld [vmem:[#allocation5 + $0x9c0] sm:$0xff]   ;;  %v590_v50 = vrot.slane %v568_v44, %v12455_v37  ;;  %v11758_v42 = vld [vmem:[#allocation5 + $0x9b8] sm:$0xff]  }
 0x146   :  { %10600 = vmatpush3.bf16.msra.mxu0 %v11669_v61  ;;  %v1267_v57 = vpack.c.bf16 %v563_v51, %v563_v51  ;;  %v1269_v58 = vpack.c.bf16 %v565_v52, %v565_v52  ;;  %v1266_v59 = vpack.c.bf16 %v562_v53, %v562_v53  ;;  %v1268_v61 = vpack.c.bf16 %v564_v55, %v564_v55  ;;  %v11729_v55 = vld [vmem:[#allocation5 + $0x900] sm:$0xff]  }
 0x147   :  { %10622 = vmatpush3.bf16.msra.mxu1 %v11670_v62  ;;  %10601 = vmatprep.subr.bf16.mxu0 %v11671_v63  ;;  %v11700_v62 = vld [vmem:[#allocation5 + $0x8c8] sm:$0xff]   ;;  %v599_v52 = vcombine.high %v576_v47, %v590_v50 }
 0x148   :  { %10623 = vmatprep.subr.bf16.mxu1 %v11672_v0  ;;  %8077 = vmatprep.mubr.bf16.mxu0 %v1267_v57  ;;  %v11701_v63 = vld [vmem:[#allocation5 + $0x808] sm:$0xff]   ;;  %v11730_v57 = vld [vmem:[#allocation5 + $0x980] sm:$0xff]  }
 0x149   :  { %8117 = vmatprep.mubr.bf16.mxu1 %v1269_v58  ;;  %v11702_v0 = vld [vmem:[#allocation5 + $0x888] sm:$0xff]   ;;  %v1271_v58 = vpack.c.bf16 %v599_v52, %v599_v52 }
 0x14a   :  { %10602 = vmatpush3.bf16.msra.mxu0 %v11673_v1  ;;  %v11703_v1 = vld [vmem:[#allocation5 + $0x850] sm:$0xff]  }
 0x14b   :  { %10624 = vmatpush3.bf16.msra.mxu1 %v11674_v2  ;;  %10603 = vmatprep.subr.bf16.mxu0 %v11675_v3  ;;  %v11704_v2 = vld [vmem:[#allocation5 + $0x8d0] sm:$0xff]  }
 0x14c   :  { %10625 = vmatprep.subr.bf16.mxu1 %v11676_v4  ;;  %v11705_v3 = vld [vmem:[#allocation5 + $0x810] sm:$0xff]  }
 0x14d   :  { %v11706_v4 = vld [vmem:[#allocation5 + $0x890] sm:$0xff]  }
 0x14e   :  { %10604 = vmatpush3.bf16.msra.mxu0 %v11677_v5  ;;  %v11707_v5 = vld [vmem:[#allocation5 + $0x858] sm:$0xff]  }
 0x14f   :  { %10626 = vmatpush3.bf16.msra.mxu1 %v11678_v6  ;;  %10605 = vmatprep.subr.bf16.mxu0 %v11679_v7  ;;  %v11708_v6 = vld [vmem:[#allocation5 + $0x8d8] sm:$0xff]  }
 0x150   :  { %10627 = vmatprep.subr.bf16.mxu1 %v11680_v8  ;;  %v11709_v7 = vld [vmem:[#allocation5 + $0x818] sm:$0xff]  }
 0x151   :  { %v11710_v8 = vld [vmem:[#allocation5 + $0x898] sm:$0xff]  }
 0x152   :  { %10606 = vmatpush3.bf16.msra.mxu0 %v11681_v9  ;;  %v11711_v9 = vld [vmem:[#allocation5 + $0x860] sm:$0xff]  }
 0x153   :  { %10628 = vmatpush3.bf16.msra.mxu1 %v11682_v10  ;;  %10607 = vmatprep.subr.bf16.mxu0 %v11683_v16  ;;  %v11712_v10 = vld [vmem:[#allocation5 + $0x8e0] sm:$0xff]  }
 0x154   :  { %v10305_v11 = vpop.f32.mrb[0].mxu0  ;;  %10629 = vmatprep.subr.bf16.mxu1 %v11684_v21  ;;  %v11714_v16 = vld [vmem:[#allocation5 + $0x8a0] sm:$0xff]  }
 0x155   :  { %v10327_v12 = vpop.f32.mrb[0].mxu1  ;;  %v10306_v14 = vpop.f32.mrb[1].mxu0 }
 0x156   :  { %v10328_v15 = vpop.f32.mrb[1].mxu1  ;;  %v10307_v17 = vadd.f32 %v10306_v14, %v10305_v11  ;;  %v10308_v19 = vpop.f32.mrb[2].mxu0  ;;  %10608 = vmatpush3.bf16.msra.mxu0 %v11685_v24 }
 0x157   :  { %v10329_v18 = vadd.f32 %v10328_v15, %v10327_v12  ;;  %v10330_v20 = vpop.f32.mrb[2].mxu1  ;;  %v10309_v22 = vpop.f32.mrb[3].mxu0  ;;  %10630 = vmatpush3.bf16.msra.mxu1 %v11686_v26  ;;  %10609 = vmatprep.subr.bf16.mxu0 %v11687_v28 }
 0x158   :  { %v7520_v23 = vadd.f32 %v10307_v17, %v9519_v13  ;;  %v10331_v25 = vpop.f32.mrb[3].mxu1  ;;  %10631 = vmatprep.subr.bf16.mxu1 %v11688_v29  ;;  %v11713_v13 = vld [vmem:[#allocation5 + $0x820] sm:$0xff]   ;;  %v11715_v20 = vld [vmem:[#allocation5 + $0x868] sm:$0xff]  }
 0x159   :  { %v11717_v25 = vld [vmem:[#allocation5 + $0x828] sm:$0xff]  }
 0x15a   :  { %v12485_v27 = vadd.f32 %v10329_v18, %v7520_v23  ;;  %10610 = vmatpush3.bf16.msra.mxu0 %v11689_v30  ;;  %v11716_v23 = vld [vmem:[#allocation5 + $0x8e8] sm:$0xff]   ;;  %v11719_v30 = vld [vmem:[#allocation5 + $0x870] sm:$0xff]  }
 0x15b   :  { %10632 = vmatpush3.bf16.msra.mxu1 %v11690_v31  ;;  %10611 = vmatprep.subr.bf16.mxu0 %v11691_v32  ;;  %v11718_v29 = vld [vmem:[#allocation5 + $0x8a8] sm:$0xff]   ;;  %v11720_v31 = vld [vmem:[#allocation5 + $0x8f0] sm:$0xff]  }
 0x15c   :  { %10633 = vmatprep.subr.bf16.mxu1 %v11692_v33  ;;  %v11721_v32 = vld [vmem:[#allocation5 + $0x830] sm:$0xff]  }
 0x15d   :  { %v11722_v33 = vld [vmem:[#allocation5 + $0x8b0] sm:$0xff]  }
 0x15e   :  { %10612 = vmatpush3.bf16.msra.mxu0 %v11693_v34  ;;  %v11723_v34 = vld [vmem:[#allocation5 + $0x878] sm:$0xff]  }
 0x15f   :  { %10634 = vmatpush3.bf16.msra.mxu1 %v11694_v35  ;;  %10641 = vmatprep.subr.bf16.mxu0 %v11695_v45  ;;  %v11725_v35 = vld [vmem:[#allocation5 + $0x838] sm:$0xff]   ;;  %v569_v45 = vcombine.high %v142_v40, %v166_v41  ;;  %v143_v40 = vld [vmem:[#allocation2 + $0x1c8] sm:$0xff] }
 0x160   :  { %10663 = vmatprep.subr.bf16.mxu1 %v11696_v48  ;;  %v583_v48 = vrot.slane %v567_v43, %v12455_v37  ;;  %v167_v41 = vld [vmem:[#allocation2 + $0x288] sm:$0xff] }
 0x161   :  { %8078 = vmatmul.mubr.bf16.vlgmr.msra.gmra.mrb[28].mxu0 %v1266_v59  ;;  %v597_v51 = vrot.slane %v569_v45, %v12455_v37  ;;  %v604_v44 = vcombine.low %v143_v40, %v167_v41 }
 0x162   :  { %8118 = vmatmul.mubr.bf16.vlgmr.msra.gmra.mrb[28].mxu1 %v1268_v61  ;;  %10642 = vmatpush3.bf16.msra.mxu0 %v11697_v54  ;;  %v598_v54 = vcombine.low %v576_v47, %v590_v50  ;;  %v11731_v61 = vld [vmem:[#allocation5 + $0x948] sm:$0xff]   ;;  %v11759_v47 = vld [vmem:[#allocation5 + $0xa40] sm:$0xff]  }
 0x163   :  { %10664 = vmatpush3.bf16.msra.mxu1 %v11698_v56  ;;  %10643 = vmatprep.subr.bf16.mxu0 %v11699_v60  ;;  %v601_v53 = vcombine.high %v583_v48, %v597_v51  ;;  %v600_v56 = vcombine.low %v583_v48, %v597_v51  ;;  %v11760_v51 = vld [vmem:[#allocation5 + $0xac0] sm:$0xff]  }
 0x164   :  { %10665 = vmatprep.subr.bf16.mxu1 %v11700_v62  ;;  %v1270_v60 = vpack.c.bf16 %v598_v54, %v598_v54  ;;  %8157 = vmatprep.mubr.bf16.mxu0 %v1271_v58  ;;  %v11762_v58 = vld [vmem:[#allocation5 + $0xa80] sm:$0xff]  }
 0x165   :  { %v1273_v59 = vpack.c.bf16 %v601_v53, %v601_v53  ;;  %v1272_v62 = vpack.c.bf16 %v600_v56, %v600_v56 }
 0x166   :  { %10644 = vmatpush3.bf16.msra.mxu0 %v11701_v63  ;;  %v11732_v63 = vld [vmem:[#allocation5 + $0x9c8] sm:$0xff]  }
 0x167   :  { %10666 = vmatpush3.bf16.msra.mxu1 %v11702_v0  ;;  %10645 = vmatprep.subr.bf16.mxu0 %v11703_v1  ;;  %v11733_v0 = vld [vmem:[#allocation5 + $0x908] sm:$0xff]  }
 0x168   :  { %10667 = vmatprep.subr.bf16.mxu1 %v11704_v2  ;;  %8197 = vmatprep.mubr.bf16.mxu1 %v1273_v59  ;;  %v11734_v1 = vld [vmem:[#allocation5 + $0x988] sm:$0xff]   ;;  %v11735_v2 = vld [vmem:[#allocation5 + $0x950] sm:$0xff]  }
 0x16a   :  { %10646 = vmatpush3.bf16.msra.mxu0 %v11705_v3  ;;  %v11736_v3 = vld [vmem:[#allocation5 + $0x9d0] sm:$0xff]  }
 0x16b   :  { %10668 = vmatpush3.bf16.msra.mxu1 %v11706_v4  ;;  %10647 = vmatprep.subr.bf16.mxu0 %v11707_v5  ;;  %v11737_v4 = vld [vmem:[#allocation5 + $0x910] sm:$0xff]  }
 0x16c   :  { %10669 = vmatprep.subr.bf16.mxu1 %v11708_v6  ;;  %v11738_v5 = vld [vmem:[#allocation5 + $0x990] sm:$0xff]   ;;  %v11739_v6 = vld [vmem:[#allocation5 + $0x958] sm:$0xff]  }
 0x16e   :  { %10648 = vmatpush3.bf16.msra.mxu0 %v11709_v7  ;;  %v11740_v7 = vld [vmem:[#allocation5 + $0x9d8] sm:$0xff]  }
 0x16f   :  { %10670 = vmatpush3.bf16.msra.mxu1 %v11710_v8  ;;  %10649 = vmatprep.subr.bf16.mxu0 %v11711_v9  ;;  %v11741_v8 = vld [vmem:[#allocation5 + $0x918] sm:$0xff]  }
 0x170   :  { %10671 = vmatprep.subr.bf16.mxu1 %v11712_v10  ;;  %v11742_v9 = vld [vmem:[#allocation5 + $0x998] sm:$0xff]  }
 0x172   :  { %10650 = vmatpush3.bf16.msra.mxu0 %v11713_v13 }
 0x173   :  { %10672 = vmatpush3.bf16.msra.mxu1 %v11714_v16  ;;  %10651 = vmatprep.subr.bf16.mxu0 %v11715_v20  ;;  %v11746_v16 = vld [vmem:[#allocation5 + $0x9a0] sm:$0xff]  }
 0x174   :  { %v10349_v11 = vpop.f32.mrb[4].mxu0  ;;  %10673 = vmatprep.subr.bf16.mxu1 %v11716_v23  ;;  %v11747_v23 = vld [vmem:[#allocation5 + $0x968] sm:$0xff]  }
 0x175   :  { %v10371_v12 = vpop.f32.mrb[4].mxu1  ;;  %v10350_v14 = vpop.f32.mrb[5].mxu0 }
 0x176   :  { %v10372_v15 = vpop.f32.mrb[5].mxu1  ;;  %v10351_v17 = vadd.f32 %v10350_v14, %v10349_v11  ;;  %v10352_v19 = vpop.f32.mrb[6].mxu0  ;;  %10652 = vmatpush3.bf16.msra.mxu0 %v11717_v25  ;;  %v11743_v11 = vld [vmem:[#allocation5 + $0x960] sm:$0xff]   ;;  %v11748_v25 = vld [vmem:[#allocation5 + $0x9e8] sm:$0xff]  }
 0x177   :  { %v10373_v18 = vadd.f32 %v10372_v15, %v10371_v12  ;;  %v10374_v21 = vpop.f32.mrb[6].mxu1  ;;  %v10353_v24 = vpop.f32.mrb[7].mxu0  ;;  %10674 = vmatpush3.bf16.msra.mxu1 %v11718_v29  ;;  %10653 = vmatprep.subr.bf16.mxu0 %v11719_v30  ;;  %v11744_v12 = vld [vmem:[#allocation5 + $0x9e0] sm:$0xff]   ;;  %v11749_v30 = vld [vmem:[#allocation5 + $0x928] sm:$0xff]  }
 0x178   :  { %v7600_v22 = vadd.f32 %v10351_v17, %v12485_v27  ;;  %v10375_v26 = vpop.f32.mrb[7].mxu1  ;;  %10675 = vmatprep.subr.bf16.mxu1 %v11720_v31  ;;  %v11724_v27 = vld [vmem:[#allocation5 + $0x8f8] sm:$0xff]   ;;  %v11745_v15 = vld [vmem:[#allocation5 + $0x920] sm:$0xff]   ;;  %v11750_v31 = vld [vmem:[#allocation5 + $0x9a8] sm:$0xff]  }
 0x17a   :  { %v12492_v28 = vadd.f32 %v10373_v18, %v7600_v22  ;;  %10654 = vmatpush3.bf16.msra.mxu0 %v11721_v32  ;;  %v11751_v32 = vld [vmem:[#allocation5 + $0x970] sm:$0xff]  }
 0x17b   :  { %10676 = vmatpush3.bf16.msra.mxu1 %v11722_v33  ;;  %10655 = vmatprep.subr.bf16.mxu0 %v11723_v34  ;;  %v11752_v33 = vld [vmem:[#allocation5 + $0x9f0] sm:$0xff]  }
 0x17c   :  { %10677 = vmatprep.subr.bf16.mxu1 %v11724_v27  ;;  %v11753_v34 = vld [vmem:[#allocation5 + $0x930] sm:$0xff]  }
 0x17d   :  { %v11754_v27 = vld [vmem:[#allocation5 + $0x9b0] sm:$0xff]  }
 0x17e   :  { %10656 = vmatpush3.bf16.msra.mxu0 %v11725_v35  ;;  %v11756_v35 = vld [vmem:[#allocation5 + $0x9f8] sm:$0xff]  }
 0x17f   :  { %10678 = vmatpush3.bf16.msra.mxu1 %v11726_v36  ;;  %10685 = vmatprep.subr.bf16.mxu0 %v11727_v46  ;;  %v95_v36 = vld [vmem:[#allocation2 + $0x48] sm:$0xff]  ;;  %v605_v46 = vcombine.high %v143_v40, %v167_v41  ;;  %v120_v40 = vld [vmem:[#allocation2 + $0x110] sm:$0xff] }
 0x180   :  { %10707 = vmatprep.subr.bf16.mxu1 %v11728_v49  ;;  %v602_v43 = vcombine.low %v95_v36, %v119_v39  ;;  %v603_v45 = vcombine.high %v95_v36, %v119_v39  ;;  %v626_v49 = vrot.slane %v604_v44, %v12455_v37  ;;  %v11787_v36 = vld [vmem:[#allocation5 + $0xa78] sm:$0xff]   ;;  %v96_v39 = vld [vmem:[#allocation2 + $0x50] sm:$0xff] }
 0x181   :  { %8158 = vmatmul.mubr.bf16.vlgmr.msra.gmra.mrb[32].mxu0 %v1270_v60  ;;  %v633_v52 = vrot.slane %v605_v46, %v12455_v37  ;;  %v144_v41 = vld [vmem:[#allocation2 + $0x1d0] sm:$0xff]  ;;  %v639_v44 = vcombine.high %v96_v39, %v120_v40 }
 0x182   :  { %8198 = vmatmul.mubr.bf16.vlgmr.msra.gmra.mrb[32].mxu1 %v1272_v62  ;;  %10686 = vmatpush3.bf16.msra.mxu0 %v11729_v55  ;;  %v612_v48 = vrot.slane %v602_v43, %v12455_v37  ;;  %v619_v50 = vrot.slane %v603_v45, %v12455_v37  ;;  %v11761_v55 = vld [vmem:[#allocation5 + $0xa00] sm:$0xff]   ;;  %v638_v43 = vcombine.low %v96_v39, %v120_v40  ;;  %v11790_v45 = vld [vmem:[#allocation5 + $0xab8] sm:$0xff]  }
 0x183   :  { %10708 = vmatpush3.bf16.msra.mxu1 %v11730_v57  ;;  %10687 = vmatprep.subr.bf16.mxu0 %v11731_v61  ;;  %v11763_v61 = vld [vmem:[#allocation5 + $0xa48] sm:$0xff]   ;;  %v11821_v39 = vld [vmem:[#allocation5 + $0xb38] sm:$0xff]  }
 0x184   :  { %10709 = vmatprep.subr.bf16.mxu1 %v11732_v63  ;;  %v635_v53 = vcombine.high %v612_v48, %v626_v49  ;;  %v634_v54 = vcombine.low %v612_v48, %v626_v49  ;;  %v637_v56 = vcombine.high %v619_v50, %v633_v52  ;;  %v636_v57 = vcombine.low %v619_v50, %v633_v52  ;;  %v11791_v50 = vld [vmem:[#allocation5 + $0xb40] sm:$0xff]   ;;  %v11822_v40 = vld [vmem:[#allocation5 + $0xbb8] sm:$0xff]  }
 0x185   :  { %v648_v48 = vrot.slane %v638_v43, %v12455_v37  ;;  %v655_v49 = vrot.slane %v639_v44, %v12455_v37  ;;  %v145_v43 = vld [vmem:[#allocation2 + $0x1d8] sm:$0xff] }
 0x186   :  { %10688 = vmatpush3.bf16.msra.mxu0 %v11733_v0  ;;  %v1275_v59 = vpack.c.bf16 %v635_v53, %v635_v53  ;;  %v1274_v60 = vpack.c.bf16 %v634_v54, %v634_v54  ;;  %v1277_v62 = vpack.c.bf16 %v637_v56, %v637_v56  ;;  %v1276_v63 = vpack.c.bf16 %v636_v57, %v636_v57  ;;  %v11764_v0 = vld [vmem:[#allocation5 + $0xac8] sm:$0xff]   ;;  %v11792_v53 = vld [vmem:[#allocation5 + $0xbc0] sm:$0xff]   ;;  %v169_v44 = vld [vmem:[#allocation2 + $0x298] sm:$0xff] }
 0x187   :  { %10710 = vmatpush3.bf16.msra.mxu1 %v11734_v1  ;;  %10689 = vmatprep.subr.bf16.mxu0 %v11735_v2  ;;  %v11765_v1 = vld [vmem:[#allocation5 + $0xa08] sm:$0xff]  }
 0x188   :  { %10711 = vmatprep.subr.bf16.mxu1 %v11736_v3  ;;  %8237 = vmatprep.mubr.bf16.mxu0 %v1275_v59  ;;  %v11766_v2 = vld [vmem:[#allocation5 + $0xa88] sm:$0xff]   ;;  %v11767_v3 = vld [vmem:[#allocation5 + $0xa50] sm:$0xff]   ;;  %v11794_v59 = vld [vmem:[#allocation5 + $0xb80] sm:$0xff]  }
 0x189   :  { %8277 = vmatprep.mubr.bf16.mxu1 %v1277_v62 }
 0x18a   :  { %10690 = vmatpush3.bf16.msra.mxu0 %v11737_v4  ;;  %v11768_v4 = vld [vmem:[#allocation5 + $0xad0] sm:$0xff]  }
 0x18b   :  { %10712 = vmatpush3.bf16.msra.mxu1 %v11738_v5  ;;  %10691 = vmatprep.subr.bf16.mxu0 %v11739_v6  ;;  %v11769_v5 = vld [vmem:[#allocation5 + $0xa10] sm:$0xff]  }
 0x18c   :  { %10713 = vmatprep.subr.bf16.mxu1 %v11740_v7  ;;  %v11770_v6 = vld [vmem:[#allocation5 + $0xa90] sm:$0xff]   ;;  %v11771_v7 = vld [vmem:[#allocation5 + $0xa58] sm:$0xff]  }
 0x18e   :  { %10692 = vmatpush3.bf16.msra.mxu0 %v11741_v8  ;;  %v11772_v8 = vld [vmem:[#allocation5 + $0xad8] sm:$0xff]  }
 0x18f   :  { %10714 = vmatpush3.bf16.msra.mxu1 %v11742_v9  ;;  %10693 = vmatprep.subr.bf16.mxu0 %v11743_v11  ;;  %v11773_v9 = vld [vmem:[#allocation5 + $0xa18] sm:$0xff]   ;;  %v11775_v11 = vld [vmem:[#allocation5 + $0xa60] sm:$0xff]  }
 0x190   :  { %10715 = vmatprep.subr.bf16.mxu1 %v11744_v12  ;;  %v11776_v12 = vld [vmem:[#allocation5 + $0xae0] sm:$0xff]  }
 0x192   :  { %10694 = vmatpush3.bf16.msra.mxu0 %v11745_v15 }
 0x193   :  { %10716 = vmatpush3.bf16.msra.mxu1 %v11746_v16  ;;  %10695 = vmatprep.subr.bf16.mxu0 %v11747_v23  ;;  %v11777_v16 = vld [vmem:[#allocation5 + $0xa20] sm:$0xff]  }
 0x194   :  { %v10393_v10 = vpop.f32.mrb[8].mxu0  ;;  %10717 = vmatprep.subr.bf16.mxu1 %v11748_v25  ;;  %v11780_v25 = vld [vmem:[#allocation5 + $0xae8] sm:$0xff]  }
 0x195   :  { %v10415_v13 = vpop.f32.mrb[8].mxu1  ;;  %v10394_v14 = vpop.f32.mrb[9].mxu0 }
 0x196   :  { %v10395_v17 = vadd.f32 %v10394_v14, %v10393_v10  ;;  %v10416_v18 = vpop.f32.mrb[9].mxu1  ;;  %v10396_v20 = vpop.f32.mrb[10].mxu0  ;;  %10696 = vmatpush3.bf16.msra.mxu0 %v11749_v30  ;;  %v11774_v10 = vld [vmem:[#allocation5 + $0xa98] sm:$0xff]  }
 0x197   :  { %v10417_v19 = vadd.f32 %v10416_v18, %v10415_v13  ;;  %v10418_v21 = vpop.f32.mrb[10].mxu1  ;;  %v10397_v24 = vpop.f32.mrb[11].mxu0  ;;  %10718 = vmatpush3.bf16.msra.mxu1 %v11750_v31  ;;  %10697 = vmatprep.subr.bf16.mxu0 %v11751_v32 }
 0x198   :  { %v7680_v22 = vadd.f32 %v10395_v17, %v12492_v28  ;;  %v10419_v26 = vpop.f32.mrb[11].mxu1  ;;  %v11755_v28 = vld [vmem:[#allocation5 + $0x978] sm:$0xff]   ;;  %10719 = vmatprep.subr.bf16.mxu1 %v11752_v33  ;;  %v11779_v21 = vld [vmem:[#allocation5 + $0xa68] sm:$0xff]  }
 0x199   :  { %v11781_v26 = vld [vmem:[#allocation5 + $0xa28] sm:$0xff]  }
 0x19a   :  { %v12499_v29 = vadd.f32 %v10417_v19, %v7680_v22  ;;  %10698 = vmatpush3.bf16.msra.mxu0 %v11753_v34  ;;  %v11778_v19 = vld [vmem:[#allocation5 + $0xaa0] sm:$0xff]   ;;  %v11782_v33 = vld [vmem:[#allocation5 + $0xaa8] sm:$0xff]   ;;  %v11783_v34 = vld [vmem:[#allocation5 + $0xa70] sm:$0xff]  }
 0x19b   :  { %10720 = vmatpush3.bf16.msra.mxu1 %v11754_v27  ;;  %10699 = vmatprep.subr.bf16.mxu0 %v11755_v28  ;;  %v11784_v27 = vld [vmem:[#allocation5 + $0xaf0] sm:$0xff]  }
 0x19c   :  { %10721 = vmatprep.subr.bf16.mxu1 %v11756_v35  ;;  %v11785_v28 = vld [vmem:[#allocation5 + $0xa30] sm:$0xff]  }
 0x19d   :  { %v11786_v35 = vld [vmem:[#allocation5 + $0xab0] sm:$0xff]  }
 0x19e   :  { %10700 = vmatpush3.bf16.msra.mxu0 %v11757_v38  ;;  %v11789_v38 = vld [vmem:[#allocation5 + $0xa38] sm:$0xff]  }
 0x19f   :  { %10722 = vmatpush3.bf16.msra.mxu1 %v11758_v42  ;;  %10729 = vmatprep.subr.bf16.mxu0 %v11759_v47  ;;  %v168_v42 = vld [vmem:[#allocation2 + $0x290] sm:$0xff] }
 0x1a0   :  { %10751 = vmatprep.subr.bf16.mxu1 %v11760_v51  ;;  %v640_v46 = vcombine.low %v144_v41, %v168_v42  ;;  %v641_v47 = vcombine.high %v144_v41, %v168_v42  ;;  %v97_v41 = vld [vmem:[#allocation2 + $0x58] sm:$0xff] }
 0x1a1   :  { %8238 = vmatmul.mubr.bf16.vlgmr.msra.gmra.mrb[36].mxu0 %v1274_v60  ;;  %v121_v42 = vld [vmem:[#allocation2 + $0x118] sm:$0xff] }
 0x1a2   :  { %8278 = vmatmul.mubr.bf16.vlgmr.msra.gmra.mrb[36].mxu1 %v1276_v63  ;;  %10730 = vmatpush3.bf16.msra.mxu0 %v11761_v55  ;;  %v662_v51 = vrot.slane %v640_v46, %v12455_v37  ;;  %v669_v52 = vrot.slane %v641_v47, %v12455_v37  ;;  %v675_v46 = vcombine.high %v97_v41, %v121_v42 }
 0x1a3   :  { %10752 = vmatpush3.bf16.msra.mxu1 %v11762_v58  ;;  %10731 = vmatprep.subr.bf16.mxu0 %v11763_v61  ;;  %v11793_v58 = vld [vmem:[#allocation5 + $0xb00] sm:$0xff]   ;;  %v676_v47 = vcombine.low %v145_v43, %v169_v44 }
 0x1a4   :  { %10753 = vmatprep.subr.bf16.mxu1 %v11764_v0  ;;  %v671_v54 = vcombine.high %v648_v48, %v662_v51  ;;  %v673_v55 = vcombine.high %v655_v49, %v669_v52  ;;  %v670_v56 = vcombine.low %v648_v48, %v662_v51  ;;  %v672_v57 = vcombine.low %v655_v49, %v669_v52  ;;  %v11795_v0 = vld [vmem:[#allocation5 + $0xb48] sm:$0xff]   ;;  %v11823_v49 = vld [vmem:[#allocation5 + $0xc40] sm:$0xff]  }
 0x1a5   :  { %v677_v48 = vcombine.high %v145_v43, %v169_v44  ;;  %v691_v51 = vrot.slane %v675_v46, %v12455_v37  ;;  %v11824_v52 = vld [vmem:[#allocation5 + $0xcc0] sm:$0xff]   ;;  %v11853_v46 = vld [vmem:[#allocation5 + $0xc38] sm:$0xff]  }
 0x1a6   :  { %10732 = vmatpush3.bf16.msra.mxu0 %v11765_v1  ;;  %v1279_v60 = vpack.c.bf16 %v671_v54, %v671_v54  ;;  %v1281_v61 = vpack.c.bf16 %v673_v55, %v673_v55  ;;  %v1278_v62 = vpack.c.bf16 %v670_v56, %v670_v56  ;;  %v1280_v63 = vpack.c.bf16 %v672_v57, %v672_v57  ;;  %v11796_v1 = vld [vmem:[#allocation5 + $0xbc8] sm:$0xff]   ;;  %v170_v43 = vld [vmem:[#allocation2 + $0x2a0] sm:$0xff] }
 0x1a7   :  { %10754 = vmatpush3.bf16.msra.mxu1 %v11766_v2  ;;  %10733 = vmatprep.subr.bf16.mxu0 %v11767_v3  ;;  %v11797_v2 = vld [vmem:[#allocation5 + $0xb08] sm:$0xff]   ;;  %v705_v54 = vrot.slane %v677_v48, %v12455_v37 }
 0x1a8   :  { %10755 = vmatprep.subr.bf16.mxu1 %v11768_v4  ;;  %8317 = vmatprep.mubr.bf16.mxu0 %v1279_v60  ;;  %v11798_v3 = vld [vmem:[#allocation5 + $0xb88] sm:$0xff]   ;;  %v11799_v4 = vld [vmem:[#allocation5 + $0xb50] sm:$0xff]   ;;  %v11826_v60 = vld [vmem:[#allocation5 + $0xc80] sm:$0xff]  }
 0x1a9   :  { %8357 = vmatprep.mubr.bf16.mxu1 %v1281_v61  ;;  %v709_v56 = vcombine.high %v691_v51, %v705_v54 }
 0x1aa   :  { %10734 = vmatpush3.bf16.msra.mxu0 %v11769_v5  ;;  %v11800_v5 = vld [vmem:[#allocation5 + $0xbd0] sm:$0xff]  }
 0x1ab   :  { %10756 = vmatpush3.bf16.msra.mxu1 %v11770_v6  ;;  %10735 = vmatprep.subr.bf16.mxu0 %v11771_v7  ;;  %v11801_v6 = vld [vmem:[#allocation5 + $0xb10] sm:$0xff]  }
 0x1ac   :  { %10757 = vmatprep.subr.bf16.mxu1 %v11772_v8  ;;  %v11802_v7 = vld [vmem:[#allocation5 + $0xb90] sm:$0xff]   ;;  %v11803_v8 = vld [vmem:[#allocation5 + $0xb58] sm:$0xff]  }
 0x1ae   :  { %10736 = vmatpush3.bf16.msra.mxu0 %v11773_v9  ;;  %v11804_v9 = vld [vmem:[#allocation5 + $0xbd8] sm:$0xff]  }
 0x1af   :  { %10758 = vmatpush3.bf16.msra.mxu1 %v11774_v10  ;;  %10737 = vmatprep.subr.bf16.mxu0 %v11775_v11  ;;  %v11805_v10 = vld [vmem:[#allocation5 + $0xb18] sm:$0xff]  }
 0x1b0   :  { %10759 = vmatprep.subr.bf16.mxu1 %v11776_v12  ;;  %v11806_v11 = vld [vmem:[#allocation5 + $0xb98] sm:$0xff]  }
 0x1b2   :  { %10738 = vmatpush3.bf16.msra.mxu0 %v11777_v16 }
 0x1b3   :  { %10760 = vmatpush3.bf16.msra.mxu1 %v11778_v19  ;;  %10739 = vmatprep.subr.bf16.mxu0 %v11779_v21 }
 0x1b4   :  { %v10437_v13 = vpop.f32.mrb[12].mxu0  ;;  %10761 = vmatprep.subr.bf16.mxu1 %v11780_v25  ;;  %v11811_v25 = vld [vmem:[#allocation5 + $0xb68] sm:$0xff]  }
 0x1b5   :  { %v10459_v14 = vpop.f32.mrb[12].mxu1  ;;  %v10438_v15 = vpop.f32.mrb[13].mxu0 }
 0x1b6   :  { %v10439_v17 = vadd.f32 %v10438_v15, %v10437_v13  ;;  %v10460_v18 = vpop.f32.mrb[13].mxu1  ;;  %v10440_v22 = vpop.f32.mrb[14].mxu0  ;;  %10740 = vmatpush3.bf16.msra.mxu0 %v11781_v26  ;;  %v11807_v13 = vld [vmem:[#allocation5 + $0xb60] sm:$0xff]  }
 0x1b7   :  { %v10461_v20 = vadd.f32 %v10460_v18, %v10459_v14  ;;  %v10462_v23 = vpop.f32.mrb[14].mxu1  ;;  %v10441_v30 = vpop.f32.mrb[15].mxu0  ;;  %10762 = vmatpush3.bf16.msra.mxu1 %v11782_v33  ;;  %10741 = vmatprep.subr.bf16.mxu0 %v11783_v34  ;;  %v11808_v14 = vld [vmem:[#allocation5 + $0xbe0] sm:$0xff]   ;;  %v11813_v34 = vld [vmem:[#allocation5 + $0xb28] sm:$0xff]  }
 0x1b8   :  { %v7760_v24 = vadd.f32 %v10439_v17, %v12499_v29  ;;  %v10463_v31 = vpop.f32.mrb[15].mxu1  ;;  %v11788_v29 = vld [vmem:[#allocation5 + $0xaf8] sm:$0xff]   ;;  %10763 = vmatprep.subr.bf16.mxu1 %v11784_v27  ;;  %v11809_v17 = vld [vmem:[#allocation5 + $0xb20] sm:$0xff]   ;;  %v11812_v30 = vld [vmem:[#allocation5 + $0xbe8] sm:$0xff]  }
 0x1b9   :  { %v11810_v18 = vld [vmem:[#allocation5 + $0xba0] sm:$0xff]   ;;  %v11814_v27 = vld [vmem:[#allocation5 + $0xba8] sm:$0xff]  }
 0x1ba   :  { %v12506_v32 = vadd.f32 %v10461_v20, %v7760_v24  ;;  %10742 = vmatpush3.bf16.msra.mxu0 %v11785_v28  ;;  %v11815_v28 = vld [vmem:[#allocation5 + $0xb70] sm:$0xff]  }
 0x1bb   :  { %10764 = vmatpush3.bf16.msra.mxu1 %v11786_v35  ;;  %10743 = vmatprep.subr.bf16.mxu0 %v11787_v36  ;;  %v11816_v35 = vld [vmem:[#allocation5 + $0xbf0] sm:$0xff]  }
 0x1bc   :  { %10765 = vmatprep.subr.bf16.mxu1 %v11788_v29  ;;  %v11817_v36 = vld [vmem:[#allocation5 + $0xb30] sm:$0xff]  }
 0x1bd   :  { %v11818_v29 = vld [vmem:[#allocation5 + $0xbb0] sm:$0xff]  }
 0x1be   :  { %10744 = vmatpush3.bf16.msra.mxu0 %v11789_v38  ;;  %v11820_v38 = vld [vmem:[#allocation5 + $0xbf8] sm:$0xff]  }
 0x1bf   :  { %10766 = vmatpush3.bf16.msra.mxu1 %v11790_v45  ;;  %10773 = vmatprep.subr.bf16.mxu0 %v11791_v50  ;;  %v674_v45 = vcombine.low %v97_v41, %v121_v42  ;;  %v122_v41 = vld [vmem:[#allocation2 + $0x120] sm:$0xff] }
 0x1c0   :  { %10795 = vmatprep.subr.bf16.mxu1 %v11792_v53  ;;  %v698_v53 = vrot.slane %v676_v47, %v12455_v37  ;;  %v146_v42 = vld [vmem:[#allocation2 + $0x1e0] sm:$0xff] }
 0x1c1   :  { %8318 = vmatmul.mubr.bf16.vlgmr.msra.gmra.mrb[40].mxu0 %v1278_v62  ;;  %v684_v50 = vrot.slane %v674_v45, %v12455_v37  ;;  %v1285_v62 = vpack.c.bf16 %v709_v56, %v709_v56  ;;  %v712_v47 = vcombine.low %v146_v42, %v170_v43  ;;  %v713_v48 = vcombine.high %v146_v42, %v170_v43  ;;  %v11886_v42 = vld [vmem:[#allocation5 + $0xdb8] sm:$0xff]   ;;  %v99_v43 = vld [vmem:[#allocation2 + $0x68] sm:$0xff] }
 0x1c2   :  { %8358 = vmatmul.mubr.bf16.vlgmr.msra.gmra.mrb[40].mxu1 %v1280_v63  ;;  %10774 = vmatpush3.bf16.msra.mxu0 %v11793_v58  ;;  %v11825_v58 = vld [vmem:[#allocation5 + $0xc00] sm:$0xff]  }
 0x1c3   :  { %10796 = vmatpush3.bf16.msra.mxu1 %v11794_v59  ;;  %10775 = vmatprep.subr.bf16.mxu0 %v11795_v0  ;;  %v707_v55 = vcombine.high %v684_v50, %v698_v53  ;;  %v706_v57 = vcombine.low %v684_v50, %v698_v53  ;;  %v708_v59 = vcombine.low %v691_v51, %v705_v54  ;;  %v11827_v0 = vld [vmem:[#allocation5 + $0xc48] sm:$0xff]   ;;  %v11855_v54 = vld [vmem:[#allocation5 + $0xd40] sm:$0xff]  }
 0x1c4   :  { %10797 = vmatprep.subr.bf16.mxu1 %v11796_v1  ;;  %8437 = vmatprep.mubr.bf16.mxu1 %v1285_v62  ;;  %v741_v53 = vrot.slane %v713_v48, %v12455_v37 }
 0x1c5   :  { %v1283_v61 = vpack.c.bf16 %v707_v55, %v707_v55  ;;  %v1282_v63 = vpack.c.bf16 %v706_v57, %v706_v57  ;;  %v1284_v1 = vpack.c.bf16 %v708_v59, %v708_v59  ;;  %v11856_v55 = vld [vmem:[#allocation5 + $0xdc0] sm:$0xff]  }
 0x1c6   :  { %10776 = vmatpush3.bf16.msra.mxu0 %v11797_v2  ;;  %v11828_v2 = vld [vmem:[#allocation5 + $0xcc8] sm:$0xff]  }
 0x1c7   :  { %10798 = vmatpush3.bf16.msra.mxu1 %v11798_v3  ;;  %10777 = vmatprep.subr.bf16.mxu0 %v11799_v4  ;;  %v11829_v3 = vld [vmem:[#allocation5 + $0xc08] sm:$0xff]  }
 0x1c8   :  { %10799 = vmatprep.subr.bf16.mxu1 %v11800_v5  ;;  %8397 = vmatprep.mubr.bf16.mxu0 %v1283_v61  ;;  %v11830_v4 = vld [vmem:[#allocation5 + $0xc88] sm:$0xff]   ;;  %v11831_v5 = vld [vmem:[#allocation5 + $0xc50] sm:$0xff]   ;;  %v11858_v61 = vld [vmem:[#allocation5 + $0xd80] sm:$0xff]  }
 0x1ca   :  { %10778 = vmatpush3.bf16.msra.mxu0 %v11801_v6  ;;  %v11832_v6 = vld [vmem:[#allocation5 + $0xcd0] sm:$0xff]  }
 0x1cb   :  { %10800 = vmatpush3.bf16.msra.mxu1 %v11802_v7  ;;  %10779 = vmatprep.subr.bf16.mxu0 %v11803_v8  ;;  %v11833_v7 = vld [vmem:[#allocation5 + $0xc10] sm:$0xff]  }
 0x1cc   :  { %10801 = vmatprep.subr.bf16.mxu1 %v11804_v9  ;;  %v11834_v8 = vld [vmem:[#allocation5 + $0xc90] sm:$0xff]   ;;  %v11835_v9 = vld [vmem:[#allocation5 + $0xc58] sm:$0xff]  }
 0x1ce   :  { %10780 = vmatpush3.bf16.msra.mxu0 %v11805_v10  ;;  %v11836_v10 = vld [vmem:[#allocation5 + $0xcd8] sm:$0xff]  }
 0x1cf   :  { %10802 = vmatpush3.bf16.msra.mxu1 %v11806_v11  ;;  %10781 = vmatprep.subr.bf16.mxu0 %v11807_v13  ;;  %v11837_v11 = vld [vmem:[#allocation5 + $0xc18] sm:$0xff]  }
 0x1d0   :  { %10803 = vmatprep.subr.bf16.mxu1 %v11808_v14  ;;  %v11838_v13 = vld [vmem:[#allocation5 + $0xc98] sm:$0xff]  }
 0x1d2   :  { %10782 = vmatpush3.bf16.msra.mxu0 %v11809_v17 }
 0x1d3   :  { %10804 = vmatpush3.bf16.msra.mxu1 %v11810_v18  ;;  %10783 = vmatprep.subr.bf16.mxu0 %v11811_v25 }
 0x1d4   :  { %v10481_v12 = vpop.f32.mrb[16].mxu0  ;;  %10805 = vmatprep.subr.bf16.mxu1 %v11812_v30  ;;  %v11844_v30 = vld [vmem:[#allocation5 + $0xce8] sm:$0xff]  }
 0x1d5   :  { %v10503_v15 = vpop.f32.mrb[16].mxu1  ;;  %v10482_v16 = vpop.f32.mrb[17].mxu0 }
 0x1d6   :  { %v10483_v19 = vadd.f32 %v10482_v16, %v10481_v12  ;;  %v10504_v20 = vpop.f32.mrb[17].mxu1  ;;  %v10484_v22 = vpop.f32.mrb[18].mxu0  ;;  %10784 = vmatpush3.bf16.msra.mxu0 %v11813_v34  ;;  %v11840_v16 = vld [vmem:[#allocation5 + $0xce0] sm:$0xff]  }
 0x1d7   :  { %v10505_v21 = vadd.f32 %v10504_v20, %v10503_v15  ;;  %v10506_v23 = vpop.f32.mrb[18].mxu1  ;;  %v10485_v26 = vpop.f32.mrb[19].mxu0  ;;  %10806 = vmatpush3.bf16.msra.mxu1 %v11814_v27  ;;  %10785 = vmatprep.subr.bf16.mxu0 %v11815_v28  ;;  %v11839_v15 = vld [vmem:[#allocation5 + $0xc60] sm:$0xff]   ;;  %v11845_v28 = vld [vmem:[#allocation5 + $0xc28] sm:$0xff]  }
 0x1d8   :  { %v7840_v24 = vadd.f32 %v10483_v19, %v12506_v32  ;;  %v10507_v31 = vpop.f32.mrb[19].mxu1  ;;  %v11819_v32 = vld [vmem:[#allocation5 + $0xb78] sm:$0xff]   ;;  %10807 = vmatprep.subr.bf16.mxu1 %v11816_v35  ;;  %v11842_v22 = vld [vmem:[#allocation5 + $0xca0] sm:$0xff]   ;;  %v11843_v26 = vld [vmem:[#allocation5 + $0xc68] sm:$0xff]  }
 0x1d9   :  { %v11846_v35 = vld [vmem:[#allocation5 + $0xca8] sm:$0xff]  }
 0x1da   :  { %v12513_v33 = vadd.f32 %v10505_v21, %v7840_v24  ;;  %10786 = vmatpush3.bf16.msra.mxu0 %v11817_v36  ;;  %v11841_v21 = vld [vmem:[#allocation5 + $0xc20] sm:$0xff]   ;;  %v11847_v36 = vld [vmem:[#allocation5 + $0xc70] sm:$0xff]  }
 0x1db   :  { %10808 = vmatpush3.bf16.msra.mxu1 %v11818_v29  ;;  %10787 = vmatprep.subr.bf16.mxu0 %v11819_v32  ;;  %v11848_v29 = vld [vmem:[#allocation5 + $0xcf0] sm:$0xff]  }
 0x1dc   :  { %10809 = vmatprep.subr.bf16.mxu1 %v11820_v38  ;;  %v11849_v32 = vld [vmem:[#allocation5 + $0xc30] sm:$0xff]  }
 0x1dd   :  { %v11850_v38 = vld [vmem:[#allocation5 + $0xcb0] sm:$0xff]  }
 0x1de   :  { %10788 = vmatpush3.bf16.msra.mxu0 %v11821_v39  ;;  %v11852_v39 = vld [vmem:[#allocation5 + $0xcf8] sm:$0xff]  }
 0x1df   :  { %10810 = vmatpush3.bf16.msra.mxu1 %v11822_v40  ;;  %10817 = vmatprep.subr.bf16.mxu0 %v11823_v49  ;;  %v98_v40 = vld [vmem:[#allocation2 + $0x60] sm:$0xff]  ;;  %v11854_v49 = vld [vmem:[#allocation5 + $0xcb8] sm:$0xff]  }
 0x1e0   :  { %10839 = vmatprep.subr.bf16.mxu1 %v11824_v52  ;;  %v710_v44 = vcombine.low %v98_v40, %v122_v41  ;;  %v711_v45 = vcombine.high %v98_v40, %v122_v41  ;;  %v734_v52 = vrot.slane %v712_v47, %v12455_v37  ;;  %v11884_v40 = vld [vmem:[#allocation5 + $0xdf8] sm:$0xff]  }
 0x1e1   :  { %8398 = vmatmul.mubr.bf16.vlgmr.msra.gmra.mrb[44].mxu0 %v1282_v63  ;;  %v11885_v41 = vld [vmem:[#allocation5 + $0xd38] sm:$0xff]  }
 0x1e2   :  { %8438 = vmatmul.mubr.bf16.vlgmr.msra.gmra.mrb[44].mxu1 %v1284_v1  ;;  %10818 = vmatpush3.bf16.msra.mxu0 %v11825_v58  ;;  %v720_v50 = vrot.slane %v710_v44, %v12455_v37  ;;  %v727_v51 = vrot.slane %v711_v45, %v12455_v37  ;;  %v123_v44 = vld [vmem:[#allocation2 + $0x128] sm:$0xff] }
 0x1e3   :  { %10840 = vmatpush3.bf16.msra.mxu1 %v11826_v60  ;;  %10819 = vmatprep.subr.bf16.mxu0 %v11827_v0  ;;  %v11857_v60 = vld [vmem:[#allocation5 + $0xd00] sm:$0xff]   ;;  %v147_v45 = vld [vmem:[#allocation2 + $0x1e8] sm:$0xff]  ;;  %v746_v47 = vcombine.low %v99_v43, %v123_v44  ;;  %v747_v48 = vcombine.high %v99_v43, %v123_v44  ;;  %v11917_v43 = vld [vmem:[#allocation5 + $0xe38] sm:$0xff]  }
 0x1e4   :  { %10841 = vmatprep.subr.bf16.mxu1 %v11828_v2  ;;  %v743_v56 = vcombine.high %v720_v50, %v734_v52  ;;  %v745_v57 = vcombine.high %v727_v51, %v741_v53  ;;  %v742_v58 = vcombine.low %v720_v50, %v734_v52  ;;  %v744_v59 = vcombine.low %v727_v51, %v741_v53  ;;  %v11859_v2 = vld [vmem:[#allocation5 + $0xd48] sm:$0xff]   ;;  %v11887_v51 = vld [vmem:[#allocation5 + $0xe40] sm:$0xff]   ;;  %v124_v44 = vld [vmem:[#allocation2 + $0x130] sm:$0xff] }
 0x1e5   :  { %v756_v52 = vrot.slane %v746_v47, %v12455_v37  ;;  %v763_v53 = vrot.slane %v747_v48, %v12455_v37  ;;  %v11918_v47 = vld [vmem:[#allocation5 + $0xeb8] sm:$0xff]  }
 0x1e6   :  { %10820 = vmatpush3.bf16.msra.mxu0 %v11829_v3  ;;  %v1287_v62 = vpack.c.bf16 %v743_v56, %v743_v56  ;;  %v1289_v63 = vpack.c.bf16 %v745_v57, %v745_v57  ;;  %v1286_v0 = vpack.c.bf16 %v742_v58, %v742_v58  ;;  %v1288_v1 = vpack.c.bf16 %v744_v59, %v744_v59  ;;  %v11860_v3 = vld [vmem:[#allocation5 + $0xdc8] sm:$0xff]  }
 0x1e7   :  { %10842 = vmatpush3.bf16.msra.mxu1 %v11830_v4  ;;  %10821 = vmatprep.subr.bf16.mxu0 %v11831_v5  ;;  %v11861_v4 = vld [vmem:[#allocation5 + $0xd08] sm:$0xff]  }
 0x1e8   :  { %10843 = vmatprep.subr.bf16.mxu1 %v11832_v6  ;;  %8477 = vmatprep.mubr.bf16.mxu0 %v1287_v62  ;;  %v11862_v5 = vld [vmem:[#allocation5 + $0xd88] sm:$0xff]   ;;  %v11863_v6 = vld [vmem:[#allocation5 + $0xd50] sm:$0xff]   ;;  %v11890_v62 = vld [vmem:[#allocation5 + $0xe80] sm:$0xff]  }
 0x1e9   :  { %8517 = vmatprep.mubr.bf16.mxu1 %v1289_v63 }
 0x1ea   :  { %10822 = vmatpush3.bf16.msra.mxu0 %v11833_v7  ;;  %v11864_v7 = vld [vmem:[#allocation5 + $0xdd0] sm:$0xff]  }
 0x1eb   :  { %10844 = vmatpush3.bf16.msra.mxu1 %v11834_v8  ;;  %10823 = vmatprep.subr.bf16.mxu0 %v11835_v9  ;;  %v11865_v8 = vld [vmem:[#allocation5 + $0xd10] sm:$0xff]  }
 0x1ec   :  { %10845 = vmatprep.subr.bf16.mxu1 %v11836_v10  ;;  %v11866_v9 = vld [vmem:[#allocation5 + $0xd90] sm:$0xff]   ;;  %v11867_v10 = vld [vmem:[#allocation5 + $0xd58] sm:$0xff]  }
 0x1ee   :  { %10824 = vmatpush3.bf16.msra.mxu0 %v11837_v11  ;;  %v11868_v11 = vld [vmem:[#allocation5 + $0xdd8] sm:$0xff]  }
 0x1ef   :  { %10846 = vmatpush3.bf16.msra.mxu1 %v11838_v13  ;;  %10825 = vmatprep.subr.bf16.mxu0 %v11839_v15  ;;  %v11870_v13 = vld [vmem:[#allocation5 + $0xd98] sm:$0xff]   ;;  %v11871_v15 = vld [vmem:[#allocation5 + $0xd60] sm:$0xff]  }
 0x1f0   :  { %10847 = vmatprep.subr.bf16.mxu1 %v11840_v16  ;;  %v11872_v16 = vld [vmem:[#allocation5 + $0xde0] sm:$0xff]  }
 0x1f2   :  { %10826 = vmatpush3.bf16.msra.mxu0 %v11841_v21 }
 0x1f3   :  { %10848 = vmatpush3.bf16.msra.mxu1 %v11842_v22  ;;  %10827 = vmatprep.subr.bf16.mxu0 %v11843_v26 }
 0x1f4   :  { %v10525_v12 = vpop.f32.mrb[20].mxu0  ;;  %10849 = vmatprep.subr.bf16.mxu1 %v11844_v30  ;;  %v11875_v30 = vld [vmem:[#allocation5 + $0xd68] sm:$0xff]  }
 0x1f5   :  { %v10547_v14 = vpop.f32.mrb[20].mxu1  ;;  %v10526_v17 = vpop.f32.mrb[21].mxu0 }
 0x1f6   :  { %v10548_v18 = vpop.f32.mrb[21].mxu1  ;;  %v10527_v19 = vadd.f32 %v10526_v17, %v10525_v12  ;;  %v10528_v23 = vpop.f32.mrb[22].mxu0  ;;  %10828 = vmatpush3.bf16.msra.mxu0 %v11845_v28  ;;  %v11869_v12 = vld [vmem:[#allocation5 + $0xd18] sm:$0xff]  }
 0x1f7   :  { %v10549_v20 = vadd.f32 %v10548_v18, %v10547_v14  ;;  %v10550_v24 = vpop.f32.mrb[22].mxu1  ;;  %v10529_v31 = vpop.f32.mrb[23].mxu0  ;;  %10850 = vmatpush3.bf16.msra.mxu1 %v11846_v35  ;;  %10829 = vmatprep.subr.bf16.mxu0 %v11847_v36  ;;  %v11877_v36 = vld [vmem:[#allocation5 + $0xd28] sm:$0xff]  }
 0x1f8   :  { %v7920_v25 = vadd.f32 %v10527_v19, %v12513_v33  ;;  %v10551_v34 = vpop.f32.mrb[23].mxu1  ;;  %v11851_v33 = vld [vmem:[#allocation5 + $0xc78] sm:$0xff]   ;;  %10851 = vmatprep.subr.bf16.mxu1 %v11848_v29  ;;  %v11873_v19 = vld [vmem:[#allocation5 + $0xd20] sm:$0xff]   ;;  %v11878_v29 = vld [vmem:[#allocation5 + $0xda8] sm:$0xff]  }
 0x1f9   :  { %v11876_v34 = vld [vmem:[#allocation5 + $0xde8] sm:$0xff]  }
 0x1fa   :  { %v12520_v27 = vadd.f32 %v10549_v20, %v7920_v25  ;;  %10830 = vmatpush3.bf16.msra.mxu0 %v11849_v32  ;;  %v11874_v20 = vld [vmem:[#allocation5 + $0xda0] sm:$0xff]   ;;  %v11879_v32 = vld [vmem:[#allocation5 + $0xd70] sm:$0xff]  }
 0x1fb   :  { %10852 = vmatpush3.bf16.msra.mxu1 %v11850_v38  ;;  %10831 = vmatprep.subr.bf16.mxu0 %v11851_v33  ;;  %v11880_v38 = vld [vmem:[#allocation5 + $0xdf0] sm:$0xff]  }
 0x1fc   :  { %10853 = vmatprep.subr.bf16.mxu1 %v11852_v39  ;;  %v11881_v33 = vld [vmem:[#allocation5 + $0xd30] sm:$0xff]  }
 0x1fd   :  { %v11882_v39 = vld [vmem:[#allocation5 + $0xdb0] sm:$0xff]  }
 0x1fe   :  { %10832 = vmatpush3.bf16.msra.mxu0 %v11853_v46  ;;  %v171_v46 = vld [vmem:[#allocation2 + $0x2a8] sm:$0xff] }
 0x1ff   :  { %10854 = vmatpush3.bf16.msra.mxu1 %v11854_v49  ;;  %10861 = vmatprep.subr.bf16.mxu0 %v11855_v54  ;;  %v748_v49 = vcombine.low %v147_v45, %v171_v46  ;;  %v749_v50 = vcombine.high %v147_v45, %v171_v46  ;;  %v11888_v54 = vld [vmem:[#allocation5 + $0xec0] sm:$0xff]   ;;  %v148_v45 = vld [vmem:[#allocation2 + $0x1f0] sm:$0xff] }
 0x200   :  { %10883 = vmatprep.subr.bf16.mxu1 %v11856_v55  ;;  %v172_v46 = vld [vmem:[#allocation2 + $0x2b0] sm:$0xff] }
 0x201   :  { %8478 = vmatmul.mubr.bf16.vlgmr.msra.gmra.mrb[48].mxu0 %v1286_v0  ;;  %v770_v55 = vrot.slane %v748_v49, %v12455_v37  ;;  %v777_v56 = vrot.slane %v749_v50, %v12455_v37  ;;  %v784_v49 = vcombine.low %v148_v45, %v172_v46 }
 0x202   :  { %8518 = vmatmul.mubr.bf16.vlgmr.msra.gmra.mrb[48].mxu1 %v1288_v1  ;;  %10862 = vmatpush3.bf16.msra.mxu0 %v11857_v60  ;;  %v11889_v60 = vld [vmem:[#allocation5 + $0xe00] sm:$0xff]  }
 0x203   :  { %10884 = vmatpush3.bf16.msra.mxu1 %v11858_v61  ;;  %10863 = vmatprep.subr.bf16.mxu0 %v11859_v2  ;;  %v779_v57 = vcombine.high %v756_v52, %v770_v55  ;;  %v781_v58 = vcombine.high %v763_v53, %v777_v56  ;;  %v778_v59 = vcombine.low %v756_v52, %v770_v55  ;;  %v11891_v2 = vld [vmem:[#allocation5 + $0xe48] sm:$0xff]   ;;  %v11919_v52 = vld [vmem:[#allocation5 + $0xf40] sm:$0xff]  }
 0x204   :  { %10885 = vmatprep.subr.bf16.mxu1 %v11860_v3  ;;  %v780_v61 = vcombine.low %v763_v53, %v777_v56  ;;  %v11920_v56 = vld [vmem:[#allocation5 + $0xfc0] sm:$0xff]  }
 0x205   :  { %v1291_v63 = vpack.c.bf16 %v779_v57, %v779_v57  ;;  %v1293_v0 = vpack.c.bf16 %v781_v58, %v781_v58  ;;  %v1290_v1 = vpack.c.bf16 %v778_v59, %v778_v59 }
 0x206   :  { %10864 = vmatpush3.bf16.msra.mxu0 %v11861_v4  ;;  %v1292_v3 = vpack.c.bf16 %v780_v61, %v780_v61  ;;  %v11892_v4 = vld [vmem:[#allocation5 + $0xec8] sm:$0xff]  }
 0x207   :  { %10886 = vmatpush3.bf16.msra.mxu1 %v11862_v5  ;;  %10865 = vmatprep.subr.bf16.mxu0 %v11863_v6  ;;  %v11893_v5 = vld [vmem:[#allocation5 + $0xe08] sm:$0xff]  }
 0x208   :  { %10887 = vmatprep.subr.bf16.mxu1 %v11864_v7  ;;  %8557 = vmatprep.mubr.bf16.mxu0 %v1291_v63  ;;  %v11894_v6 = vld [vmem:[#allocation5 + $0xe88] sm:$0xff]   ;;  %v11895_v7 = vld [vmem:[#allocation5 + $0xe50] sm:$0xff]   ;;  %v11922_v63 = vld [vmem:[#allocation5 + $0xf80] sm:$0xff]  }
 0x209   :  { %8597 = vmatprep.mubr.bf16.mxu1 %v1293_v0 }
 0x20a   :  { %10866 = vmatpush3.bf16.msra.mxu0 %v11865_v8  ;;  %v11896_v8 = vld [vmem:[#allocation5 + $0xed0] sm:$0xff]  }
 0x20b   :  { %10888 = vmatpush3.bf16.msra.mxu1 %v11866_v9  ;;  %10867 = vmatprep.subr.bf16.mxu0 %v11867_v10  ;;  %v11897_v9 = vld [vmem:[#allocation5 + $0xe10] sm:$0xff]  }
 0x20c   :  { %10889 = vmatprep.subr.bf16.mxu1 %v11868_v11  ;;  %v11898_v10 = vld [vmem:[#allocation5 + $0xe90] sm:$0xff]   ;;  %v11899_v11 = vld [vmem:[#allocation5 + $0xe58] sm:$0xff]  }
 0x20e   :  { %10868 = vmatpush3.bf16.msra.mxu0 %v11869_v12  ;;  %v11900_v12 = vld [vmem:[#allocation5 + $0xed8] sm:$0xff]  }
 0x20f   :  { %10890 = vmatpush3.bf16.msra.mxu1 %v11870_v13  ;;  %10869 = vmatprep.subr.bf16.mxu0 %v11871_v15  ;;  %v11901_v13 = vld [vmem:[#allocation5 + $0xe18] sm:$0xff]  }
 0x210   :  { %10891 = vmatprep.subr.bf16.mxu1 %v11872_v16  ;;  %v11903_v16 = vld [vmem:[#allocation5 + $0xe60] sm:$0xff]  }
 0x212   :  { %10870 = vmatpush3.bf16.msra.mxu0 %v11873_v19 }
 0x213   :  { %10892 = vmatpush3.bf16.msra.mxu1 %v11874_v20  ;;  %10871 = vmatprep.subr.bf16.mxu0 %v11875_v30  ;;  %v11905_v20 = vld [vmem:[#allocation5 + $0xe20] sm:$0xff]  }
 0x214   :  { %v10569_v14 = vpop.f32.mrb[24].mxu0  ;;  %10893 = vmatprep.subr.bf16.mxu1 %v11876_v34 }
 0x215   :  { %v10591_v17 = vpop.f32.mrb[24].mxu1  ;;  %v10570_v18 = vpop.f32.mrb[25].mxu0 }
 0x216   :  { %v10571_v21 = vadd.f32 %v10570_v18, %v10569_v14  ;;  %v10592_v22 = vpop.f32.mrb[25].mxu1  ;;  %v10572_v24 = vpop.f32.mrb[26].mxu0  ;;  %10872 = vmatpush3.bf16.msra.mxu0 %v11877_v36  ;;  %v11902_v14 = vld [vmem:[#allocation5 + $0xe98] sm:$0xff]  }
 0x217   :  { %v10593_v23 = vadd.f32 %v10592_v22, %v10591_v17  ;;  %v10594_v25 = vpop.f32.mrb[26].mxu1  ;;  %v10573_v31 = vpop.f32.mrb[27].mxu0  ;;  %10894 = vmatpush3.bf16.msra.mxu1 %v11878_v29  ;;  %10873 = vmatprep.subr.bf16.mxu0 %v11879_v32  ;;  %v11904_v17 = vld [vmem:[#allocation5 + $0xee0] sm:$0xff]   ;;  %v11909_v32 = vld [vmem:[#allocation5 + $0xe28] sm:$0xff]  }
 0x218   :  { %v8000_v26 = vadd.f32 %v10571_v21, %v12520_v27  ;;  %v10595_v28 = vpop.f32.mrb[27].mxu1  ;;  %v11883_v27 = vld [vmem:[#allocation5 + $0xd78] sm:$0xff]   ;;  %10895 = vmatprep.subr.bf16.mxu1 %v11880_v38  ;;  %v11906_v21 = vld [vmem:[#allocation5 + $0xea0] sm:$0xff]   ;;  %v11907_v31 = vld [vmem:[#allocation5 + $0xe68] sm:$0xff]  }
 0x219   :  { %v11908_v28 = vld [vmem:[#allocation5 + $0xee8] sm:$0xff]  }
 0x21a   :  { %v12527_v35 = vadd.f32 %v10593_v23, %v8000_v26  ;;  %10874 = vmatpush3.bf16.msra.mxu0 %v11881_v33  ;;  %v11910_v38 = vld [vmem:[#allocation5 + $0xea8] sm:$0xff]   ;;  %v11911_v33 = vld [vmem:[#allocation5 + $0xe70] sm:$0xff]  }
 0x21b   :  { %10896 = vmatpush3.bf16.msra.mxu1 %v11882_v39  ;;  %10875 = vmatprep.subr.bf16.mxu0 %v11883_v27  ;;  %v11912_v39 = vld [vmem:[#allocation5 + $0xef0] sm:$0xff]  }
 0x21c   :  { %10897 = vmatprep.subr.bf16.mxu1 %v11884_v40  ;;  %v11913_v27 = vld [vmem:[#allocation5 + $0xe30] sm:$0xff]  }
 0x21d   :  { %v11914_v40 = vld [vmem:[#allocation5 + $0xeb0] sm:$0xff]  }
 0x21e   :  { %10876 = vmatpush3.bf16.msra.mxu0 %v11885_v41  ;;  %v11916_v41 = vld [vmem:[#allocation5 + $0xef8] sm:$0xff]  }
 0x21f   :  { %10898 = vmatpush3.bf16.msra.mxu1 %v11886_v42  ;;  %10905 = vmatprep.subr.bf16.mxu0 %v11887_v51  ;;  %v100_v42 = vld [vmem:[#allocation2 + $0x70] sm:$0xff]  ;;  %v785_v51 = vcombine.high %v148_v45, %v172_v46  ;;  %v125_v45 = vld [vmem:[#allocation2 + $0x138] sm:$0xff] }
 0x220   :  { %10927 = vmatprep.subr.bf16.mxu1 %v11888_v54  ;;  %v782_v48 = vcombine.low %v100_v42, %v124_v44  ;;  %v783_v50 = vcombine.high %v100_v42, %v124_v44  ;;  %v806_v54 = vrot.slane %v784_v49, %v12455_v37  ;;  %v11947_v42 = vld [vmem:[#allocation5 + $0xf78] sm:$0xff]  }
 0x221   :  { %8558 = vmatmul.mubr.bf16.vlgmr.msra.gmra.mrb[52].mxu0 %v1290_v1  ;;  %v813_v57 = vrot.slane %v785_v51, %v12455_v37  ;;  %v101_v44 = vld [vmem:[#allocation2 + $0x78] sm:$0xff] }
 0x222   :  { %8598 = vmatmul.mubr.bf16.vlgmr.msra.gmra.mrb[52].mxu1 %v1292_v3  ;;  %10906 = vmatpush3.bf16.msra.mxu0 %v11889_v60  ;;  %v792_v53 = vrot.slane %v782_v48, %v12455_v37  ;;  %v799_v55 = vrot.slane %v783_v50, %v12455_v37  ;;  %v11921_v60 = vld [vmem:[#allocation5 + $0xf00] sm:$0xff]   ;;  %v149_v46 = vld [vmem:[#allocation2 + $0x1f8] sm:$0xff]  ;;  %v818_v48 = vcombine.low %v101_v44, %v125_v45 }
 0x223   :  { %10928 = vmatpush3.bf16.msra.mxu1 %v11890_v62  ;;  %10907 = vmatprep.subr.bf16.mxu0 %v11891_v2  ;;  %v11923_v2 = vld [vmem:[#allocation5 + $0xf48] sm:$0xff]   ;;  %v819_v49 = vcombine.high %v101_v44, %v125_v45  ;;  %v11950_v50 = vld [vmem:[#allocation5 + $0xfb8] sm:$0xff]  }
 0x224   :  { %10929 = vmatprep.subr.bf16.mxu1 %v11892_v4  ;;  %v815_v58 = vcombine.high %v792_v53, %v806_v54  ;;  %v814_v59 = vcombine.low %v792_v53, %v806_v54  ;;  %v817_v61 = vcombine.high %v799_v55, %v813_v57  ;;  %v816_v62 = vcombine.low %v799_v55, %v813_v57  ;;  %v11951_v55 = vld [vmem:[#allocation5 + $0x1040] sm:$0xff]   ;;  %v11981_v44 = vld [vmem:[#allocation5 + $0x1038] sm:$0xff]  }
 0x225   :  { %v828_v53 = vrot.slane %v818_v48, %v12455_v37  ;;  %v835_v54 = vrot.slane %v819_v49, %v12455_v37  ;;  %v11982_v45 = vld [vmem:[#allocation5 + $0x10b8] sm:$0xff]   ;;  %v150_v48 = vld [vmem:[#allocation2 + $0x200] sm:$0xff] }
 0x226   :  { %10908 = vmatpush3.bf16.msra.mxu0 %v11893_v5  ;;  %v1295_v0 = vpack.c.bf16 %v815_v58, %v815_v58  ;;  %v1294_v1 = vpack.c.bf16 %v814_v59, %v814_v59  ;;  %v1297_v3 = vpack.c.bf16 %v817_v61, %v817_v61  ;;  %v1296_v4 = vpack.c.bf16 %v816_v62, %v816_v62  ;;  %v11924_v5 = vld [vmem:[#allocation5 + $0xfc8] sm:$0xff]   ;;  %v11952_v58 = vld [vmem:[#allocation5 + $0x10c0] sm:$0xff]  }
 0x227   :  { %10930 = vmatpush3.bf16.msra.mxu1 %v11894_v6  ;;  %10909 = vmatprep.subr.bf16.mxu0 %v11895_v7  ;;  %v11925_v6 = vld [vmem:[#allocation5 + $0xf08] sm:$0xff]   ;;  %v174_v49 = vld [vmem:[#allocation2 + $0x2c0] sm:$0xff] }
 0x228   :  { %10931 = vmatprep.subr.bf16.mxu1 %v11896_v8  ;;  %8637 = vmatprep.mubr.bf16.mxu0 %v1295_v0  ;;  %v11926_v7 = vld [vmem:[#allocation5 + $0xf88] sm:$0xff]   ;;  %v11927_v8 = vld [vmem:[#allocation5 + $0xf50] sm:$0xff]   ;;  %v11954_v0 = vld [vmem:[#allocation5 + $0x1080] sm:$0xff]  }
 0x229   :  { %8677 = vmatprep.mubr.bf16.mxu1 %v1297_v3 }
 0x22a   :  { %10910 = vmatpush3.bf16.msra.mxu0 %v11897_v9  ;;  %v11928_v9 = vld [vmem:[#allocation5 + $0xfd0] sm:$0xff]  }
 0x22b   :  { %10932 = vmatpush3.bf16.msra.mxu1 %v11898_v10  ;;  %10911 = vmatprep.subr.bf16.mxu0 %v11899_v11  ;;  %v11929_v10 = vld [vmem:[#allocation5 + $0xf10] sm:$0xff]  }
 0x22c   :  { %10933 = vmatprep.subr.bf16.mxu1 %v11900_v12  ;;  %v11930_v11 = vld [vmem:[#allocation5 + $0xf90] sm:$0xff]   ;;  %v11931_v12 = vld [vmem:[#allocation5 + $0xf58] sm:$0xff]  }
 0x22e   :  { %10912 = vmatpush3.bf16.msra.mxu0 %v11901_v13  ;;  %v11932_v13 = vld [vmem:[#allocation5 + $0xfd8] sm:$0xff]  }
 0x22f   :  { %10934 = vmatpush3.bf16.msra.mxu1 %v11902_v14  ;;  %10913 = vmatprep.subr.bf16.mxu0 %v11903_v16  ;;  %v11933_v14 = vld [vmem:[#allocation5 + $0xf18] sm:$0xff]   ;;  %v11935_v16 = vld [vmem:[#allocation5 + $0xf60] sm:$0xff]  }
 0x230   :  { %10935 = vmatprep.subr.bf16.mxu1 %v11904_v17  ;;  %v11936_v17 = vld [vmem:[#allocation5 + $0xfe0] sm:$0xff]  }
 0x232   :  { %10914 = vmatpush3.bf16.msra.mxu0 %v11905_v20 }
 0x233   :  { %10936 = vmatpush3.bf16.msra.mxu1 %v11906_v21  ;;  %10915 = vmatprep.subr.bf16.mxu0 %v11907_v31  ;;  %v11937_v21 = vld [vmem:[#allocation5 + $0xf20] sm:$0xff]  }
 0x234   :  { %v10613_v15 = vpop.f32.mrb[28].mxu0  ;;  %10937 = vmatprep.subr.bf16.mxu1 %v11908_v28  ;;  %v11940_v28 = vld [vmem:[#allocation5 + $0xfe8] sm:$0xff]  }
 0x235   :  { %v10635_v18 = vpop.f32.mrb[28].mxu1  ;;  %v10614_v19 = vpop.f32.mrb[29].mxu0 }
 0x236   :  { %v10615_v22 = vadd.f32 %v10614_v19, %v10613_v15  ;;  %v10636_v23 = vpop.f32.mrb[29].mxu1  ;;  %v10616_v25 = vpop.f32.mrb[30].mxu0  ;;  %10916 = vmatpush3.bf16.msra.mxu0 %v11909_v32  ;;  %v11934_v15 = vld [vmem:[#allocation5 + $0xf98] sm:$0xff]  }
 0x237   :  { %v10637_v24 = vadd.f32 %v10636_v23, %v10635_v18  ;;  %v10638_v26 = vpop.f32.mrb[30].mxu1  ;;  %v10617_v34 = vpop.f32.mrb[31].mxu0  ;;  %10938 = vmatpush3.bf16.msra.mxu1 %v11910_v38  ;;  %10917 = vmatprep.subr.bf16.mxu0 %v11911_v33 }
 0x238   :  { %v8080_v30 = vadd.f32 %v10615_v22, %v12527_v35  ;;  %v10639_v36 = vpop.f32.mrb[31].mxu1  ;;  %v11915_v35 = vld [vmem:[#allocation5 + $0xe78] sm:$0xff]   ;;  %10939 = vmatprep.subr.bf16.mxu1 %v11912_v39  ;;  %v11939_v26 = vld [vmem:[#allocation5 + $0xf68] sm:$0xff]  }
 0x239   :  { %v11941_v36 = vld [vmem:[#allocation5 + $0xf28] sm:$0xff]  }
 0x23a   :  { %v12534_v29 = vadd.f32 %v10637_v24, %v8080_v30  ;;  %10918 = vmatpush3.bf16.msra.mxu0 %v11913_v27  ;;  %v11938_v24 = vld [vmem:[#allocation5 + $0xfa0] sm:$0xff]   ;;  %v11942_v39 = vld [vmem:[#allocation5 + $0xfa8] sm:$0xff]   ;;  %v11943_v27 = vld [vmem:[#allocation5 + $0xf70] sm:$0xff]  }
 0x23b   :  { %10940 = vmatpush3.bf16.msra.mxu1 %v11914_v40  ;;  %10919 = vmatprep.subr.bf16.mxu0 %v11915_v35  ;;  %v11944_v40 = vld [vmem:[#allocation5 + $0xff0] sm:$0xff]  }
 0x23c   :  { %10941 = vmatprep.subr.bf16.mxu1 %v11916_v41  ;;  %v11945_v35 = vld [vmem:[#allocation5 + $0xf30] sm:$0xff]  }
 0x23d   :  { %v11946_v41 = vld [vmem:[#allocation5 + $0xfb0] sm:$0xff]  }
 0x23e   :  { %10920 = vmatpush3.bf16.msra.mxu0 %v11917_v43  ;;  %v11949_v43 = vld [vmem:[#allocation5 + $0xf38] sm:$0xff]  }
 0x23f   :  { %10942 = vmatpush3.bf16.msra.mxu1 %v11918_v47  ;;  %10949 = vmatprep.subr.bf16.mxu0 %v11919_v52  ;;  %v173_v47 = vld [vmem:[#allocation2 + $0x2b8] sm:$0xff] }
 0x240   :  { %10971 = vmatprep.subr.bf16.mxu1 %v11920_v56  ;;  %v820_v51 = vcombine.low %v149_v46, %v173_v47  ;;  %v821_v52 = vcombine.high %v149_v46, %v173_v47  ;;  %v102_v46 = vld [vmem:[#allocation2 + $0x80] sm:$0xff] }
 0x241   :  { %8638 = vmatmul.mubr.bf16.vlgmr.msra.gmra.mrb[56].mxu0 %v1294_v1  ;;  %v126_v47 = vld [vmem:[#allocation2 + $0x140] sm:$0xff] }
 0x242   :  { %8678 = vmatmul.mubr.bf16.vlgmr.msra.gmra.mrb[56].mxu1 %v1296_v4  ;;  %10950 = vmatpush3.bf16.msra.mxu0 %v11921_v60  ;;  %v842_v56 = vrot.slane %v820_v51, %v12455_v37  ;;  %v849_v57 = vrot.slane %v821_v52, %v12455_v37  ;;  %v855_v51 = vcombine.high %v102_v46, %v126_v47 }
 0x243   :  { %10972 = vmatpush3.bf16.msra.mxu1 %v11922_v63  ;;  %10951 = vmatprep.subr.bf16.mxu0 %v11923_v2  ;;  %v11953_v63 = vld [vmem:[#allocation5 + $0x1000] sm:$0xff]   ;;  %v856_v52 = vcombine.low %v150_v48, %v174_v49 }
 0x244   :  { %10973 = vmatprep.subr.bf16.mxu1 %v11924_v5  ;;  %v851_v59 = vcombine.high %v828_v53, %v842_v56  ;;  %v853_v60 = vcombine.high %v835_v54, %v849_v57  ;;  %v850_v61 = vcombine.low %v828_v53, %v842_v56  ;;  %v852_v62 = vcombine.low %v835_v54, %v849_v57  ;;  %v11955_v5 = vld [vmem:[#allocation5 + $0x1048] sm:$0xff]   ;;  %v11983_v54 = vld [vmem:[#allocation5 + $0x1140] sm:$0xff]  }
 0x245   :  { %v857_v53 = vcombine.high %v150_v48, %v174_v49  ;;  %v871_v56 = vrot.slane %v855_v51, %v12455_v37  ;;  %v11984_v57 = vld [vmem:[#allocation5 + $0x11c0] sm:$0xff]   ;;  %v151_v48 = vld [vmem:[#allocation2 + $0x208] sm:$0xff] }
 0x246   :  { %10952 = vmatpush3.bf16.msra.mxu0 %v11925_v6  ;;  %v1299_v1 = vpack.c.bf16 %v851_v59, %v851_v59  ;;  %v1301_v2 = vpack.c.bf16 %v853_v60, %v853_v60  ;;  %v1298_v3 = vpack.c.bf16 %v850_v61, %v850_v61  ;;  %v1300_v4 = vpack.c.bf16 %v852_v62, %v852_v62  ;;  %v11956_v6 = vld [vmem:[#allocation5 + $0x10c8] sm:$0xff]  }
 0x247   :  { %10974 = vmatpush3.bf16.msra.mxu1 %v11926_v7  ;;  %10953 = vmatprep.subr.bf16.mxu0 %v11927_v8  ;;  %v11957_v7 = vld [vmem:[#allocation5 + $0x1008] sm:$0xff]   ;;  %v885_v59 = vrot.slane %v857_v53, %v12455_v37 }
 0x248   :  { %10975 = vmatprep.subr.bf16.mxu1 %v11928_v9  ;;  %8717 = vmatprep.mubr.bf16.mxu0 %v1299_v1  ;;  %v11958_v8 = vld [vmem:[#allocation5 + $0x1088] sm:$0xff]   ;;  %v11959_v9 = vld [vmem:[#allocation5 + $0x1050] sm:$0xff]   ;;  %v11986_v1 = vld [vmem:[#allocation5 + $0x1180] sm:$0xff]  }
 0x249   :  { %8757 = vmatprep.mubr.bf16.mxu1 %v1301_v2  ;;  %v889_v61 = vcombine.high %v871_v56, %v885_v59  ;;  %v175_v49 = vld [vmem:[#allocation2 + $0x2c8] sm:$0xff] }
 0x24a   :  { %10954 = vmatpush3.bf16.msra.mxu0 %v11929_v10  ;;  %v11960_v10 = vld [vmem:[#allocation5 + $0x10d0] sm:$0xff]  }
 0x24b   :  { %10976 = vmatpush3.bf16.msra.mxu1 %v11930_v11  ;;  %10955 = vmatprep.subr.bf16.mxu0 %v11931_v12  ;;  %v11961_v11 = vld [vmem:[#allocation5 + $0x1010] sm:$0xff]  }
 0x24c   :  { %10977 = vmatprep.subr.bf16.mxu1 %v11932_v13  ;;  %v11962_v12 = vld [vmem:[#allocation5 + $0x1090] sm:$0xff]   ;;  %v11963_v13 = vld [vmem:[#allocation5 + $0x1058] sm:$0xff]  }
 0x24e   :  { %10956 = vmatpush3.bf16.msra.mxu0 %v11933_v14  ;;  %v11964_v14 = vld [vmem:[#allocation5 + $0x10d8] sm:$0xff]  }
 0x24f   :  { %10978 = vmatpush3.bf16.msra.mxu1 %v11934_v15  ;;  %10957 = vmatprep.subr.bf16.mxu0 %v11935_v16  ;;  %v11965_v15 = vld [vmem:[#allocation5 + $0x1018] sm:$0xff]  }
 0x250   :  { %10979 = vmatprep.subr.bf16.mxu1 %v11936_v17  ;;  %v11966_v16 = vld [vmem:[#allocation5 + $0x1098] sm:$0xff]  }
 0x252   :  { %10958 = vmatpush3.bf16.msra.mxu0 %v11937_v21 }
 0x253   :  { %10980 = vmatpush3.bf16.msra.mxu1 %v11938_v24  ;;  %10959 = vmatprep.subr.bf16.mxu0 %v11939_v26 }
 0x254   :  { %v10657_v18 = vpop.f32.mrb[32].mxu0  ;;  %10981 = vmatprep.subr.bf16.mxu1 %v11940_v28  ;;  %v11971_v28 = vld [vmem:[#allocation5 + $0x1068] sm:$0xff]  }
 0x255   :  { %v10679_v19 = vpop.f32.mrb[32].mxu1  ;;  %v10658_v20 = vpop.f32.mrb[33].mxu0 }
 0x256   :  { %v10659_v22 = vadd.f32 %v10658_v20, %v10657_v18  ;;  %v10680_v23 = vpop.f32.mrb[33].mxu1  ;;  %v10660_v30 = vpop.f32.mrb[34].mxu0  ;;  %10960 = vmatpush3.bf16.msra.mxu0 %v11941_v36  ;;  %v11967_v18 = vld [vmem:[#allocation5 + $0x1060] sm:$0xff]  }
 0x257   :  { %v10681_v25 = vadd.f32 %v10680_v23, %v10679_v19  ;;  %v10682_v31 = vpop.f32.mrb[34].mxu1  ;;  %v10661_v32 = vpop.f32.mrb[35].mxu0  ;;  %10982 = vmatpush3.bf16.msra.mxu1 %v11942_v39  ;;  %10961 = vmatprep.subr.bf16.mxu0 %v11943_v27  ;;  %v11968_v19 = vld [vmem:[#allocation5 + $0x10e0] sm:$0xff]   ;;  %v11973_v27 = vld [vmem:[#allocation5 + $0x1028] sm:$0xff]  }
 0x258   :  { %v8160_v34 = vadd.f32 %v10659_v22, %v12534_v29  ;;  %v10683_v38 = vpop.f32.mrb[35].mxu1  ;;  %v11948_v29 = vld [vmem:[#allocation5 + $0xff8] sm:$0xff]   ;;  %10983 = vmatprep.subr.bf16.mxu1 %v11944_v40  ;;  %v11969_v22 = vld [vmem:[#allocation5 + $0x1020] sm:$0xff]   ;;  %v11972_v32 = vld [vmem:[#allocation5 + $0x10e8] sm:$0xff]  }
 0x259   :  { %v11970_v23 = vld [vmem:[#allocation5 + $0x10a0] sm:$0xff]   ;;  %v11974_v40 = vld [vmem:[#allocation5 + $0x10a8] sm:$0xff]  }
 0x25a   :  { %v12541_v33 = vadd.f32 %v10681_v25, %v8160_v34  ;;  %10962 = vmatpush3.bf16.msra.mxu0 %v11945_v35  ;;  %v11975_v35 = vld [vmem:[#allocation5 + $0x1070] sm:$0xff]  }
 0x25b   :  { %10984 = vmatpush3.bf16.msra.mxu1 %v11946_v41  ;;  %10963 = vmatprep.subr.bf16.mxu0 %v11947_v42  ;;  %v11976_v41 = vld [vmem:[#allocation5 + $0x10f0] sm:$0xff]  }
 0x25c   :  { %10985 = vmatprep.subr.bf16.mxu1 %v11948_v29  ;;  %v11977_v42 = vld [vmem:[#allocation5 + $0x1030] sm:$0xff]  }
 0x25d   :  { %v11978_v29 = vld [vmem:[#allocation5 + $0x10b0] sm:$0xff]  }
 0x25e   :  { %10964 = vmatpush3.bf16.msra.mxu0 %v11949_v43  ;;  %v11980_v43 = vld [vmem:[#allocation5 + $0x10f8] sm:$0xff]  }
 0x25f   :  { %10986 = vmatpush3.bf16.msra.mxu1 %v11950_v50  ;;  %10993 = vmatprep.subr.bf16.mxu0 %v11951_v55  ;;  %v854_v50 = vcombine.low %v102_v46, %v126_v47  ;;  %v12013_v46 = vld [vmem:[#allocation5 + $0x1138] sm:$0xff]   ;;  %v127_v47 = vld [vmem:[#allocation2 + $0x148] sm:$0xff] }
 0x260   :  { %11015 = vmatprep.subr.bf16.mxu1 %v11952_v58  ;;  %v878_v58 = vrot.slane %v856_v52, %v12455_v37  ;;  %v892_v52 = vcombine.low %v151_v48, %v175_v49 }
 0x261   :  { %8718 = vmatmul.mubr.bf16.vlgmr.msra.gmra.mrb[60].mxu0 %v1298_v3  ;;  %v864_v55 = vrot.slane %v854_v50, %v12455_v37  ;;  %v1305_v3 = vpack.c.bf16 %v889_v61, %v889_v61  ;;  %v12014_v50 = vld [vmem:[#allocation5 + $0x11b8] sm:$0xff]  }
 0x262   :  { %8758 = vmatmul.mubr.bf16.vlgmr.msra.gmra.mrb[60].mxu1 %v1300_v4  ;;  %10994 = vmatpush3.bf16.msra.mxu0 %v11953_v63  ;;  %v11985_v63 = vld [vmem:[#allocation5 + $0x1100] sm:$0xff]  }
 0x263   :  { %11016 = vmatpush3.bf16.msra.mxu1 %v11954_v0  ;;  %10995 = vmatprep.subr.bf16.mxu0 %v11955_v5  ;;  %v887_v60 = vcombine.high %v864_v55, %v878_v58  ;;  %v886_v62 = vcombine.low %v864_v55, %v878_v58  ;;  %v888_v0 = vcombine.low %v871_v56, %v885_v59  ;;  %v11987_v5 = vld [vmem:[#allocation5 + $0x1148] sm:$0xff]   ;;  %v12015_v55 = vld [vmem:[#allocation5 + $0x1240] sm:$0xff]  }
 0x264   :  { %11017 = vmatprep.subr.bf16.mxu1 %v11956_v6  ;;  %8837 = vmatprep.mubr.bf16.mxu1 %v1305_v3  ;;  %v12016_v59 = vld [vmem:[#allocation5 + $0x12c0] sm:$0xff]  }
 0x265   :  { %v1303_v2 = vpack.c.bf16 %v887_v60, %v887_v60  ;;  %v1302_v4 = vpack.c.bf16 %v886_v62, %v886_v62  ;;  %v1304_v6 = vpack.c.bf16 %v888_v0, %v888_v0 }
 0x266   :  { %10996 = vmatpush3.bf16.msra.mxu0 %v11957_v7  ;;  %v11988_v7 = vld [vmem:[#allocation5 + $0x11c8] sm:$0xff]  }
 0x267   :  { %11018 = vmatpush3.bf16.msra.mxu1 %v11958_v8  ;;  %10997 = vmatprep.subr.bf16.mxu0 %v11959_v9  ;;  %v11989_v8 = vld [vmem:[#allocation5 + $0x1108] sm:$0xff]  }
 0x268   :  { %11019 = vmatprep.subr.bf16.mxu1 %v11960_v10  ;;  %8797 = vmatprep.mubr.bf16.mxu0 %v1303_v2  ;;  %v11990_v9 = vld [vmem:[#allocation5 + $0x1188] sm:$0xff]   ;;  %v11991_v10 = vld [vmem:[#allocation5 + $0x1150] sm:$0xff]   ;;  %v12018_v2 = vld [vmem:[#allocation5 + $0x1280] sm:$0xff]  }
 0x26a   :  { %10998 = vmatpush3.bf16.msra.mxu0 %v11961_v11  ;;  %v11992_v11 = vld [vmem:[#allocation5 + $0x11d0] sm:$0xff]  }
 0x26b   :  { %11020 = vmatpush3.bf16.msra.mxu1 %v11962_v12  ;;  %10999 = vmatprep.subr.bf16.mxu0 %v11963_v13  ;;  %v11993_v12 = vld [vmem:[#allocation5 + $0x1110] sm:$0xff]  }
 0x26c   :  { %11021 = vmatprep.subr.bf16.mxu1 %v11964_v14  ;;  %v11994_v13 = vld [vmem:[#allocation5 + $0x1190] sm:$0xff]   ;;  %v11995_v14 = vld [vmem:[#allocation5 + $0x1158] sm:$0xff]  }
 0x26e   :  { %11000 = vmatpush3.bf16.msra.mxu0 %v11965_v15  ;;  %v11996_v15 = vld [vmem:[#allocation5 + $0x11d8] sm:$0xff]  }
 0x26f   :  { %11022 = vmatpush3.bf16.msra.mxu1 %v11966_v16  ;;  %11001 = vmatprep.subr.bf16.mxu0 %v11967_v18  ;;  %v11997_v16 = vld [vmem:[#allocation5 + $0x1118] sm:$0xff]  }
 0x270   :  { %11023 = vmatprep.subr.bf16.mxu1 %v11968_v19  ;;  %v11999_v19 = vld [vmem:[#allocation5 + $0x1160] sm:$0xff]  }
 0x272   :  { %11002 = vmatpush3.bf16.msra.mxu0 %v11969_v22 }
 0x273   :  { %11024 = vmatpush3.bf16.msra.mxu1 %v11970_v23  ;;  %11003 = vmatprep.subr.bf16.mxu0 %v11971_v28  ;;  %v12001_v23 = vld [vmem:[#allocation5 + $0x1120] sm:$0xff]  }
 0x274   :  { %v10701_v17 = vpop.f32.mrb[36].mxu0  ;;  %11025 = vmatprep.subr.bf16.mxu1 %v11972_v32 }
 0x275   :  { %v10723_v20 = vpop.f32.mrb[36].mxu1  ;;  %v10702_v21 = vpop.f32.mrb[37].mxu0 }
 0x276   :  { %v10703_v24 = vadd.f32 %v10702_v21, %v10701_v17  ;;  %v10724_v25 = vpop.f32.mrb[37].mxu1  ;;  %v10704_v30 = vpop.f32.mrb[38].mxu0  ;;  %11004 = vmatpush3.bf16.msra.mxu0 %v11973_v27  ;;  %v11998_v17 = vld [vmem:[#allocation5 + $0x1198] sm:$0xff]  }
 0x277   :  { %v10725_v26 = vadd.f32 %v10724_v25, %v10723_v20  ;;  %v10726_v31 = vpop.f32.mrb[38].mxu1  ;;  %v10705_v36 = vpop.f32.mrb[39].mxu0  ;;  %11026 = vmatpush3.bf16.msra.mxu1 %v11974_v40  ;;  %11005 = vmatprep.subr.bf16.mxu0 %v11975_v35  ;;  %v12000_v20 = vld [vmem:[#allocation5 + $0x11e0] sm:$0xff]   ;;  %v12005_v35 = vld [vmem:[#allocation5 + $0x1128] sm:$0xff]  }
 0x278   :  { %v8240_v34 = vadd.f32 %v10703_v24, %v12541_v33  ;;  %v10727_v38 = vpop.f32.mrb[39].mxu1  ;;  %v11979_v33 = vld [vmem:[#allocation5 + $0x1078] sm:$0xff]   ;;  %11027 = vmatprep.subr.bf16.mxu1 %v11976_v41  ;;  %v12002_v24 = vld [vmem:[#allocation5 + $0x11a0] sm:$0xff]   ;;  %v12003_v36 = vld [vmem:[#allocation5 + $0x1168] sm:$0xff]  }
 0x279   :  { %v12004_v38 = vld [vmem:[#allocation5 + $0x11e8] sm:$0xff]  }
 0x27a   :  { %v12548_v39 = vadd.f32 %v10725_v26, %v8240_v34  ;;  %11006 = vmatpush3.bf16.msra.mxu0 %v11977_v42  ;;  %v12006_v41 = vld [vmem:[#allocation5 + $0x11a8] sm:$0xff]   ;;  %v12007_v42 = vld [vmem:[#allocation5 + $0x1170] sm:$0xff]  }
 0x27b   :  { %11028 = vmatpush3.bf16.msra.mxu1 %v11978_v29  ;;  %11007 = vmatprep.subr.bf16.mxu0 %v11979_v33  ;;  %v12008_v29 = vld [vmem:[#allocation5 + $0x11f0] sm:$0xff]  }
 0x27c   :  { %11029 = vmatprep.subr.bf16.mxu1 %v11980_v43  ;;  %v12009_v33 = vld [vmem:[#allocation5 + $0x1130] sm:$0xff]  }
 0x27d   :  { %v12010_v43 = vld [vmem:[#allocation5 + $0x11b0] sm:$0xff]  }
 0x27e   :  { %11008 = vmatpush3.bf16.msra.mxu0 %v11981_v44  ;;  %v12012_v44 = vld [vmem:[#allocation5 + $0x11f8] sm:$0xff]  }
 0x27f   :  { %11030 = vmatpush3.bf16.msra.mxu1 %v11982_v45  ;;  %11037 = vmatprep.subr.bf16.mxu0 %v11983_v54  ;;  %v103_v45 = vld [vmem:[#allocation2 + $0x88] sm:$0xff]  ;;  %v893_v54 = vcombine.high %v151_v48, %v175_v49  ;;  %v128_v48 = vld [vmem:[#allocation2 + $0x150] sm:$0xff] }
 0x280   :  { %11059 = vmatprep.subr.bf16.mxu1 %v11984_v57  ;;  %v890_v51 = vcombine.low %v103_v45, %v127_v47  ;;  %v891_v53 = vcombine.high %v103_v45, %v127_v47  ;;  %v914_v57 = vrot.slane %v892_v52, %v12455_v37  ;;  %v12043_v45 = vld [vmem:[#allocation5 + $0x1278] sm:$0xff]   ;;  %v104_v47 = vld [vmem:[#allocation2 + $0x90] sm:$0xff] }
 0x281   :  { %8798 = vmatmul.mubr.bf16.vlgmr.msra.gmra.mrb[64].mxu0 %v1302_v4  ;;  %v921_v60 = vrot.slane %v893_v54, %v12455_v37  ;;  %v152_v49 = vld [vmem:[#allocation2 + $0x210] sm:$0xff]  ;;  %v927_v52 = vcombine.high %v104_v47, %v128_v48 }
 0x282   :  { %8838 = vmatmul.mubr.bf16.vlgmr.msra.gmra.mrb[64].mxu1 %v1304_v6  ;;  %11038 = vmatpush3.bf16.msra.mxu0 %v11985_v63  ;;  %v900_v56 = vrot.slane %v890_v51, %v12455_v37  ;;  %v907_v58 = vrot.slane %v891_v53, %v12455_v37  ;;  %v12017_v63 = vld [vmem:[#allocation5 + $0x1200] sm:$0xff]   ;;  %v926_v51 = vcombine.low %v104_v47, %v128_v48  ;;  %v12046_v53 = vld [vmem:[#allocation5 + $0x12b8] sm:$0xff]  }
 0x283   :  { %11060 = vmatpush3.bf16.msra.mxu1 %v11986_v1  ;;  %11039 = vmatprep.subr.bf16.mxu0 %v11987_v5  ;;  %v12019_v5 = vld [vmem:[#allocation5 + $0x1248] sm:$0xff]   ;;  %v12077_v47 = vld [vmem:[#allocation5 + $0x1338] sm:$0xff]  }
 0x284   :  { %11061 = vmatprep.subr.bf16.mxu1 %v11988_v7  ;;  %v923_v61 = vcombine.high %v900_v56, %v914_v57  ;;  %v922_v62 = vcombine.low %v900_v56, %v914_v57  ;;  %v925_v0 = vcombine.high %v907_v58, %v921_v60  ;;  %v924_v1 = vcombine.low %v907_v58, %v921_v60  ;;  %v12047_v58 = vld [vmem:[#allocation5 + $0x1340] sm:$0xff]   ;;  %v12078_v48 = vld [vmem:[#allocation5 + $0x13b8] sm:$0xff]  }
 0x285   :  { %v936_v56 = vrot.slane %v926_v51, %v12455_v37  ;;  %v943_v57 = vrot.slane %v927_v52, %v12455_v37  ;;  %v153_v51 = vld [vmem:[#allocation2 + $0x218] sm:$0xff] }
 0x286   :  { %11040 = vmatpush3.bf16.msra.mxu0 %v11989_v8  ;;  %v1307_v3 = vpack.c.bf16 %v923_v61, %v923_v61  ;;  %v1306_v4 = vpack.c.bf16 %v922_v62, %v922_v62  ;;  %v1309_v6 = vpack.c.bf16 %v925_v0, %v925_v0  ;;  %v1308_v7 = vpack.c.bf16 %v924_v1, %v924_v1  ;;  %v12020_v8 = vld [vmem:[#allocation5 + $0x12c8] sm:$0xff]   ;;  %v12048_v61 = vld [vmem:[#allocation5 + $0x13c0] sm:$0xff]   ;;  %v177_v52 = vld [vmem:[#allocation2 + $0x2d8] sm:$0xff] }
 0x287   :  { %11062 = vmatpush3.bf16.msra.mxu1 %v11990_v9  ;;  %11041 = vmatprep.subr.bf16.mxu0 %v11991_v10  ;;  %v12021_v9 = vld [vmem:[#allocation5 + $0x1208] sm:$0xff]  }
 0x288   :  { %11063 = vmatprep.subr.bf16.mxu1 %v11992_v11  ;;  %8877 = vmatprep.mubr.bf16.mxu0 %v1307_v3  ;;  %v12022_v10 = vld [vmem:[#allocation5 + $0x1288] sm:$0xff]   ;;  %v12023_v11 = vld [vmem:[#allocation5 + $0x1250] sm:$0xff]   ;;  %v12050_v3 = vld [vmem:[#allocation5 + $0x1380] sm:$0xff]  }
 0x289   :  { %8917 = vmatprep.mubr.bf16.mxu1 %v1309_v6 }
 0x28a   :  { %11042 = vmatpush3.bf16.msra.mxu0 %v11993_v12  ;;  %v12024_v12 = vld [vmem:[#allocation5 + $0x12d0] sm:$0xff]  }
 0x28b   :  { %11064 = vmatpush3.bf16.msra.mxu1 %v11994_v13  ;;  %11043 = vmatprep.subr.bf16.mxu0 %v11995_v14  ;;  %v12025_v13 = vld [vmem:[#allocation5 + $0x1210] sm:$0xff]  }
 0x28c   :  { %11065 = vmatprep.subr.bf16.mxu1 %v11996_v15  ;;  %v12026_v14 = vld [vmem:[#allocation5 + $0x1290] sm:$0xff]   ;;  %v12027_v15 = vld [vmem:[#allocation5 + $0x1258] sm:$0xff]  }
 0x28e   :  { %11044 = vmatpush3.bf16.msra.mxu0 %v11997_v16  ;;  %v12028_v16 = vld [vmem:[#allocation5 + $0x12d8] sm:$0xff]  }
 0x28f   :  { %11066 = vmatpush3.bf16.msra.mxu1 %v11998_v17  ;;  %11045 = vmatprep.subr.bf16.mxu0 %v11999_v19  ;;  %v12029_v17 = vld [vmem:[#allocation5 + $0x1218] sm:$0xff]   ;;  %v12031_v19 = vld [vmem:[#allocation5 + $0x1260] sm:$0xff]  }
 0x290   :  { %11067 = vmatprep.subr.bf16.mxu1 %v12000_v20  ;;  %v12032_v20 = vld [vmem:[#allocation5 + $0x12e0] sm:$0xff]  }
 0x292   :  { %11046 = vmatpush3.bf16.msra.mxu0 %v12001_v23 }
 0x293   :  { %11068 = vmatpush3.bf16.msra.mxu1 %v12002_v24  ;;  %11047 = vmatprep.subr.bf16.mxu0 %v12003_v36  ;;  %v12033_v24 = vld [vmem:[#allocation5 + $0x1220] sm:$0xff]  }
 0x294   :  { %v10745_v18 = vpop.f32.mrb[40].mxu0  ;;  %11069 = vmatprep.subr.bf16.mxu1 %v12004_v38  ;;  %v12036_v38 = vld [vmem:[#allocation5 + $0x12e8] sm:$0xff]  }
 0x295   :  { %v10767_v21 = vpop.f32.mrb[40].mxu1  ;;  %v10746_v22 = vpop.f32.mrb[41].mxu0 }
 0x296   :  { %v10747_v25 = vadd.f32 %v10746_v22, %v10745_v18  ;;  %v10768_v26 = vpop.f32.mrb[41].mxu1  ;;  %v10748_v31 = vpop.f32.mrb[42].mxu0  ;;  %11048 = vmatpush3.bf16.msra.mxu0 %v12005_v35  ;;  %v12030_v18 = vld [vmem:[#allocation5 + $0x1298] sm:$0xff]  }
 0x297   :  { %v10769_v30 = vadd.f32 %v10768_v26, %v10767_v21  ;;  %v10770_v34 = vpop.f32.mrb[42].mxu1  ;;  %v10749_v32 = vpop.f32.mrb[43].mxu0  ;;  %11070 = vmatpush3.bf16.msra.mxu1 %v12006_v41  ;;  %11049 = vmatprep.subr.bf16.mxu0 %v12007_v42 }
 0x298   :  { %v8320_v28 = vadd.f32 %v10747_v25, %v12548_v39  ;;  %v10771_v27 = vpop.f32.mrb[43].mxu1  ;;  %v12011_v39 = vld [vmem:[#allocation5 + $0x1178] sm:$0xff]   ;;  %11071 = vmatprep.subr.bf16.mxu1 %v12008_v29  ;;  %v12035_v34 = vld [vmem:[#allocation5 + $0x1268] sm:$0xff]  }
 0x299   :  { %v12037_v27 = vld [vmem:[#allocation5 + $0x1228] sm:$0xff]  }
 0x29a   :  { %v12555_v40 = vadd.f32 %v10769_v30, %v8320_v28  ;;  %11050 = vmatpush3.bf16.msra.mxu0 %v12009_v33  ;;  %v12034_v30 = vld [vmem:[#allocation5 + $0x12a0] sm:$0xff]   ;;  %v12038_v29 = vld [vmem:[#allocation5 + $0x12a8] sm:$0xff]   ;;  %v12039_v33 = vld [vmem:[#allocation5 + $0x1270] sm:$0xff]  }
 0x29b   :  { %11072 = vmatpush3.bf16.msra.mxu1 %v12010_v43  ;;  %11051 = vmatprep.subr.bf16.mxu0 %v12011_v39  ;;  %v12040_v43 = vld [vmem:[#allocation5 + $0x12f0] sm:$0xff]  }
 0x29c   :  { %11073 = vmatprep.subr.bf16.mxu1 %v12012_v44  ;;  %v12041_v39 = vld [vmem:[#allocation5 + $0x1230] sm:$0xff]  }
 0x29d   :  { %v12042_v44 = vld [vmem:[#allocation5 + $0x12b0] sm:$0xff]  }
 0x29e   :  { %11052 = vmatpush3.bf16.msra.mxu0 %v12013_v46  ;;  %v12045_v46 = vld [vmem:[#allocation5 + $0x1238] sm:$0xff]  }
 0x29f   :  { %11074 = vmatpush3.bf16.msra.mxu1 %v12014_v50  ;;  %11081 = vmatprep.subr.bf16.mxu0 %v12015_v55  ;;  %v176_v50 = vld [vmem:[#allocation2 + $0x2d0] sm:$0xff] }
 0x2a0   :  { %11103 = vmatprep.subr.bf16.mxu1 %v12016_v59  ;;  %v928_v54 = vcombine.low %v152_v49, %v176_v50  ;;  %v929_v55 = vcombine.high %v152_v49, %v176_v50  ;;  %v105_v49 = vld [vmem:[#allocation2 + $0x98] sm:$0xff] }
 0x2a1   :  { %8878 = vmatmul.mubr.bf16.vlgmr.msra.gmra.mrb[68].mxu0 %v1306_v4  ;;  %v129_v50 = vld [vmem:[#allocation2 + $0x158] sm:$0xff] }
 0x2a2   :  { %8918 = vmatmul.mubr.bf16.vlgmr.msra.gmra.mrb[68].mxu1 %v1308_v7  ;;  %11082 = vmatpush3.bf16.msra.mxu0 %v12017_v63  ;;  %v950_v59 = vrot.slane %v928_v54, %v12455_v37  ;;  %v957_v60 = vrot.slane %v929_v55, %v12455_v37  ;;  %v963_v54 = vcombine.high %v105_v49, %v129_v50 }
 0x2a3   :  { %11104 = vmatpush3.bf16.msra.mxu1 %v12018_v2  ;;  %11083 = vmatprep.subr.bf16.mxu0 %v12019_v5  ;;  %v12049_v2 = vld [vmem:[#allocation5 + $0x1300] sm:$0xff]   ;;  %v964_v55 = vcombine.low %v153_v51, %v177_v52 }
 0x2a4   :  { %11105 = vmatprep.subr.bf16.mxu1 %v12020_v8  ;;  %v959_v62 = vcombine.high %v936_v56, %v950_v59  ;;  %v961_v63 = vcombine.high %v943_v57, %v957_v60  ;;  %v958_v0 = vcombine.low %v936_v56, %v950_v59  ;;  %v960_v1 = vcombine.low %v943_v57, %v957_v60  ;;  %v12051_v8 = vld [vmem:[#allocation5 + $0x1348] sm:$0xff]   ;;  %v12079_v57 = vld [vmem:[#allocation5 + $0x1440] sm:$0xff]  }
 0x2a5   :  { %v965_v56 = vcombine.high %v153_v51, %v177_v52  ;;  %v979_v59 = vrot.slane %v963_v54, %v12455_v37  ;;  %v12080_v60 = vld [vmem:[#allocation5 + $0x14c0] sm:$0xff]  }
 0x2a6   :  { %11084 = vmatpush3.bf16.msra.mxu0 %v12021_v9  ;;  %v1311_v4 = vpack.c.bf16 %v959_v62, %v959_v62  ;;  %v1313_v5 = vpack.c.bf16 %v961_v63, %v961_v63  ;;  %v1310_v6 = vpack.c.bf16 %v958_v0, %v958_v0  ;;  %v1312_v7 = vpack.c.bf16 %v960_v1, %v960_v1  ;;  %v12052_v9 = vld [vmem:[#allocation5 + $0x13c8] sm:$0xff]   ;;  %v154_v51 = vld [vmem:[#allocation2 + $0x220] sm:$0xff] }
 0x2a7   :  { %11106 = vmatpush3.bf16.msra.mxu1 %v12022_v10  ;;  %11085 = vmatprep.subr.bf16.mxu0 %v12023_v11  ;;  %v12053_v10 = vld [vmem:[#allocation5 + $0x1308] sm:$0xff]   ;;  %v993_v62 = vrot.slane %v965_v56, %v12455_v37  ;;  %v178_v52 = vld [vmem:[#allocation2 + $0x2e0] sm:$0xff] }
 0x2a8   :  { %11107 = vmatprep.subr.bf16.mxu1 %v12024_v12  ;;  %8957 = vmatprep.mubr.bf16.mxu0 %v1311_v4  ;;  %v12054_v11 = vld [vmem:[#allocation5 + $0x1388] sm:$0xff]   ;;  %v12055_v12 = vld [vmem:[#allocation5 + $0x1350] sm:$0xff]   ;;  %v12082_v4 = vld [vmem:[#allocation5 + $0x1480] sm:$0xff]  }
 0x2a9   :  { %8997 = vmatprep.mubr.bf16.mxu1 %v1313_v5  ;;  %v997_v0 = vcombine.high %v979_v59, %v993_v62 }
 0x2aa   :  { %11086 = vmatpush3.bf16.msra.mxu0 %v12025_v13  ;;  %v12056_v13 = vld [vmem:[#allocation5 + $0x13d0] sm:$0xff]  }
 0x2ab   :  { %11108 = vmatpush3.bf16.msra.mxu1 %v12026_v14  ;;  %11087 = vmatprep.subr.bf16.mxu0 %v12027_v15  ;;  %v12057_v14 = vld [vmem:[#allocation5 + $0x1310] sm:$0xff]  }
 0x2ac   :  { %11109 = vmatprep.subr.bf16.mxu1 %v12028_v16  ;;  %v12058_v15 = vld [vmem:[#allocation5 + $0x1390] sm:$0xff]   ;;  %v12059_v16 = vld [vmem:[#allocation5 + $0x1358] sm:$0xff]  }
 0x2ae   :  { %11088 = vmatpush3.bf16.msra.mxu0 %v12029_v17  ;;  %v12060_v17 = vld [vmem:[#allocation5 + $0x13d8] sm:$0xff]  }
 0x2af   :  { %11110 = vmatpush3.bf16.msra.mxu1 %v12030_v18  ;;  %11089 = vmatprep.subr.bf16.mxu0 %v12031_v19  ;;  %v12061_v18 = vld [vmem:[#allocation5 + $0x1318] sm:$0xff]  }
 0x2b0   :  { %11111 = vmatprep.subr.bf16.mxu1 %v12032_v20  ;;  %v12062_v19 = vld [vmem:[#allocation5 + $0x1398] sm:$0xff]  }
 0x2b2   :  { %11090 = vmatpush3.bf16.msra.mxu0 %v12033_v24 }
 0x2b3   :  { %11112 = vmatpush3.bf16.msra.mxu1 %v12034_v30  ;;  %11091 = vmatprep.subr.bf16.mxu0 %v12035_v34 }
 0x2b4   :  { %v10789_v21 = vpop.f32.mrb[44].mxu0  ;;  %11113 = vmatprep.subr.bf16.mxu1 %v12036_v38  ;;  %v12067_v38 = vld [vmem:[#allocation5 + $0x1368] sm:$0xff]  }
 0x2b5   :  { %v10811_v22 = vpop.f32.mrb[44].mxu1  ;;  %v10790_v23 = vpop.f32.mrb[45].mxu0 }
 0x2b6   :  { %v10791_v25 = vadd.f32 %v10790_v23, %v10789_v21  ;;  %v10812_v26 = vpop.f32.mrb[45].mxu1  ;;  %v10792_v28 = vpop.f32.mrb[46].mxu0  ;;  %11092 = vmatpush3.bf16.msra.mxu0 %v12037_v27  ;;  %v12063_v21 = vld [vmem:[#allocation5 + $0x1360] sm:$0xff]  }
 0x2b7   :  { %v10813_v31 = vadd.f32 %v10812_v26, %v10811_v22  ;;  %v10814_v36 = vpop.f32.mrb[46].mxu1  ;;  %v10793_v35 = vpop.f32.mrb[47].mxu0  ;;  %11114 = vmatpush3.bf16.msra.mxu1 %v12038_v29  ;;  %11093 = vmatprep.subr.bf16.mxu0 %v12039_v33  ;;  %v12064_v22 = vld [vmem:[#allocation5 + $0x13e0] sm:$0xff]   ;;  %v12069_v33 = vld [vmem:[#allocation5 + $0x1328] sm:$0xff]  }
 0x2b8   :  { %v8400_v32 = vadd.f32 %v10791_v25, %v12555_v40  ;;  %v10815_v41 = vpop.f32.mrb[47].mxu1  ;;  %v12044_v40 = vld [vmem:[#allocation5 + $0x12f8] sm:$0xff]   ;;  %11115 = vmatprep.subr.bf16.mxu1 %v12040_v43  ;;  %v12065_v25 = vld [vmem:[#allocation5 + $0x1320] sm:$0xff]   ;;  %v12068_v35 = vld [vmem:[#allocation5 + $0x13e8] sm:$0xff]  }
 0x2b9   :  { %v12066_v26 = vld [vmem:[#allocation5 + $0x13a0] sm:$0xff]   ;;  %v12070_v43 = vld [vmem:[#allocation5 + $0x13a8] sm:$0xff]  }
 0x2ba   :  { %v12562_v42 = vadd.f32 %v10813_v31, %v8400_v32  ;;  %11094 = vmatpush3.bf16.msra.mxu0 %v12041_v39  ;;  %v12071_v39 = vld [vmem:[#allocation5 + $0x1370] sm:$0xff]  }
 0x2bb   :  { %11116 = vmatpush3.bf16.msra.mxu1 %v12042_v44  ;;  %11095 = vmatprep.subr.bf16.mxu0 %v12043_v45  ;;  %v12072_v44 = vld [vmem:[#allocation5 + $0x13f0] sm:$0xff]  }
 0x2bc   :  { %11117 = vmatprep.subr.bf16.mxu1 %v12044_v40  ;;  %v12073_v45 = vld [vmem:[#allocation5 + $0x1330] sm:$0xff]  }
 0x2bd   :  { %v12074_v40 = vld [vmem:[#allocation5 + $0x13b0] sm:$0xff]  }
 0x2be   :  { %11096 = vmatpush3.bf16.msra.mxu0 %v12045_v46  ;;  %v12076_v46 = vld [vmem:[#allocation5 + $0x13f8] sm:$0xff]  }
 0x2bf   :  { %11118 = vmatpush3.bf16.msra.mxu1 %v12046_v53  ;;  %11125 = vmatprep.subr.bf16.mxu0 %v12047_v58  ;;  %v962_v53 = vcombine.low %v105_v49, %v129_v50  ;;  %v12109_v49 = vld [vmem:[#allocation5 + $0x1438] sm:$0xff]   ;;  %v130_v50 = vld [vmem:[#allocation2 + $0x160] sm:$0xff] }
 0x2c0   :  { %11147 = vmatprep.subr.bf16.mxu1 %v12048_v61  ;;  %v986_v61 = vrot.slane %v964_v55, %v12455_v37  ;;  %v1000_v55 = vcombine.low %v154_v51, %v178_v52 }
 0x2c1   :  { %8958 = vmatmul.mubr.bf16.vlgmr.msra.gmra.mrb[72].mxu0 %v1310_v6  ;;  %v972_v58 = vrot.slane %v962_v53, %v12455_v37  ;;  %v1317_v6 = vpack.c.bf16 %v997_v0, %v997_v0  ;;  %v12110_v53 = vld [vmem:[#allocation5 + $0x14b8] sm:$0xff]  }
 0x2c2   :  { %8998 = vmatmul.mubr.bf16.vlgmr.msra.gmra.mrb[72].mxu1 %v1312_v7  ;;  %11126 = vmatpush3.bf16.msra.mxu0 %v12049_v2  ;;  %v12081_v2 = vld [vmem:[#allocation5 + $0x1400] sm:$0xff]  }
 0x2c3   :  { %11148 = vmatpush3.bf16.msra.mxu1 %v12050_v3  ;;  %11127 = vmatprep.subr.bf16.mxu0 %v12051_v8  ;;  %v995_v63 = vcombine.high %v972_v58, %v986_v61  ;;  %v994_v1 = vcombine.low %v972_v58, %v986_v61  ;;  %v996_v3 = vcombine.low %v979_v59, %v993_v62  ;;  %v12083_v8 = vld [vmem:[#allocation5 + $0x1448] sm:$0xff]   ;;  %v12111_v58 = vld [vmem:[#allocation5 + $0x1540] sm:$0xff]  }
 0x2c4   :  { %11149 = vmatprep.subr.bf16.mxu1 %v12052_v9  ;;  %9077 = vmatprep.mubr.bf16.mxu1 %v1317_v6  ;;  %v12112_v62 = vld [vmem:[#allocation5 + $0x15c0] sm:$0xff]  }
 0x2c5   :  { %v1315_v5 = vpack.c.bf16 %v995_v63, %v995_v63  ;;  %v1314_v7 = vpack.c.bf16 %v994_v1, %v994_v1  ;;  %v1316_v9 = vpack.c.bf16 %v996_v3, %v996_v3 }
 0x2c6   :  { %11128 = vmatpush3.bf16.msra.mxu0 %v12053_v10  ;;  %v12084_v10 = vld [vmem:[#allocation5 + $0x14c8] sm:$0xff]  }
 0x2c7   :  { %11150 = vmatpush3.bf16.msra.mxu1 %v12054_v11  ;;  %11129 = vmatprep.subr.bf16.mxu0 %v12055_v12  ;;  %v12085_v11 = vld [vmem:[#allocation5 + $0x1408] sm:$0xff]  }
 0x2c8   :  { %11151 = vmatprep.subr.bf16.mxu1 %v12056_v13  ;;  %9037 = vmatprep.mubr.bf16.mxu0 %v1315_v5  ;;  %v12086_v12 = vld [vmem:[#allocation5 + $0x1488] sm:$0xff]   ;;  %v12087_v13 = vld [vmem:[#allocation5 + $0x1450] sm:$0xff]   ;;  %v12114_v5 = vld [vmem:[#allocation5 + $0x1580] sm:$0xff]  }
 0x2ca   :  { %11130 = vmatpush3.bf16.msra.mxu0 %v12057_v14  ;;  %v12088_v14 = vld [vmem:[#allocation5 + $0x14d0] sm:$0xff]  }
 0x2cb   :  { %11152 = vmatpush3.bf16.msra.mxu1 %v12058_v15  ;;  %11131 = vmatprep.subr.bf16.mxu0 %v12059_v16  ;;  %v12089_v15 = vld [vmem:[#allocation5 + $0x1410] sm:$0xff]  }
 0x2cc   :  { %11153 = vmatprep.subr.bf16.mxu1 %v12060_v17  ;;  %v12090_v16 = vld [vmem:[#allocation5 + $0x1490] sm:$0xff]   ;;  %v12091_v17 = vld [vmem:[#allocation5 + $0x1458] sm:$0xff]  }
 0x2ce   :  { %11132 = vmatpush3.bf16.msra.mxu0 %v12061_v18  ;;  %v12092_v18 = vld [vmem:[#allocation5 + $0x14d8] sm:$0xff]  }
 0x2cf   :  { %11154 = vmatpush3.bf16.msra.mxu1 %v12062_v19  ;;  %11133 = vmatprep.subr.bf16.mxu0 %v12063_v21  ;;  %v12093_v19 = vld [vmem:[#allocation5 + $0x1418] sm:$0xff]  }
 0x2d0   :  { %11155 = vmatprep.subr.bf16.mxu1 %v12064_v22  ;;  %v12095_v22 = vld [vmem:[#allocation5 + $0x1460] sm:$0xff]  }
 0x2d2   :  { %11134 = vmatpush3.bf16.msra.mxu0 %v12065_v25 }
 0x2d3   :  { %11156 = vmatpush3.bf16.msra.mxu1 %v12066_v26  ;;  %11135 = vmatprep.subr.bf16.mxu0 %v12067_v38  ;;  %v12097_v26 = vld [vmem:[#allocation5 + $0x1420] sm:$0xff]  }
 0x2d4   :  { %v10833_v20 = vpop.f32.mrb[48].mxu0  ;;  %11157 = vmatprep.subr.bf16.mxu1 %v12068_v35 }
 0x2d5   :  { %v10855_v23 = vpop.f32.mrb[48].mxu1  ;;  %v10834_v24 = vpop.f32.mrb[49].mxu0 }
 0x2d6   :  { %v10835_v30 = vadd.f32 %v10834_v24, %v10833_v20  ;;  %v10856_v31 = vpop.f32.mrb[49].mxu1  ;;  %v10836_v28 = vpop.f32.mrb[50].mxu0  ;;  %11136 = vmatpush3.bf16.msra.mxu0 %v12069_v33  ;;  %v12094_v20 = vld [vmem:[#allocation5 + $0x1498] sm:$0xff]  }
 0x2d7   :  { %v10857_v34 = vadd.f32 %v10856_v31, %v10855_v23  ;;  %v10858_v36 = vpop.f32.mrb[50].mxu1  ;;  %v10837_v27 = vpop.f32.mrb[51].mxu0  ;;  %11158 = vmatpush3.bf16.msra.mxu1 %v12070_v43  ;;  %11137 = vmatprep.subr.bf16.mxu0 %v12071_v39  ;;  %v12096_v23 = vld [vmem:[#allocation5 + $0x14e0] sm:$0xff]   ;;  %v12101_v39 = vld [vmem:[#allocation5 + $0x1428] sm:$0xff]  }
 0x2d8   :  { %v8480_v32 = vadd.f32 %v10835_v30, %v12562_v42  ;;  %v10859_v41 = vpop.f32.mrb[51].mxu1  ;;  %v12075_v42 = vld [vmem:[#allocation5 + $0x1378] sm:$0xff]   ;;  %11159 = vmatprep.subr.bf16.mxu1 %v12072_v44  ;;  %v12098_v30 = vld [vmem:[#allocation5 + $0x14a0] sm:$0xff]   ;;  %v12099_v27 = vld [vmem:[#allocation5 + $0x1468] sm:$0xff]  }
 0x2d9   :  { %v12100_v41 = vld [vmem:[#allocation5 + $0x14e8] sm:$0xff]  }
 0x2da   :  { %v12569_v29 = vadd.f32 %v10857_v34, %v8480_v32  ;;  %11138 = vmatpush3.bf16.msra.mxu0 %v12073_v45  ;;  %v12102_v44 = vld [vmem:[#allocation5 + $0x14a8] sm:$0xff]   ;;  %v12103_v45 = vld [vmem:[#allocation5 + $0x1470] sm:$0xff]  }
 0x2db   :  { %11160 = vmatpush3.bf16.msra.mxu1 %v12074_v40  ;;  %11139 = vmatprep.subr.bf16.mxu0 %v12075_v42  ;;  %v12104_v40 = vld [vmem:[#allocation5 + $0x14f0] sm:$0xff]  }
 0x2dc   :  { %11161 = vmatprep.subr.bf16.mxu1 %v12076_v46  ;;  %v12105_v42 = vld [vmem:[#allocation5 + $0x1430] sm:$0xff]  }
 0x2dd   :  { %v12106_v46 = vld [vmem:[#allocation5 + $0x14b0] sm:$0xff]  }
 0x2de   :  { %11140 = vmatpush3.bf16.msra.mxu0 %v12077_v47  ;;  %v12108_v47 = vld [vmem:[#allocation5 + $0x14f8] sm:$0xff]  }
 0x2df   :  { %11162 = vmatpush3.bf16.msra.mxu1 %v12078_v48  ;;  %11169 = vmatprep.subr.bf16.mxu0 %v12079_v57  ;;  %v106_v48 = vld [vmem:[#allocation2 + $0xa0] sm:$0xff]  ;;  %v1001_v57 = vcombine.high %v154_v51, %v178_v52  ;;  %v131_v51 = vld [vmem:[#allocation2 + $0x168] sm:$0xff] }
 0x2e0   :  { %11191 = vmatprep.subr.bf16.mxu1 %v12080_v60  ;;  %v998_v54 = vcombine.low %v106_v48, %v130_v50  ;;  %v999_v56 = vcombine.high %v106_v48, %v130_v50  ;;  %v1022_v60 = vrot.slane %v1000_v55, %v12455_v37  ;;  %v12139_v48 = vld [vmem:[#allocation5 + $0x1578] sm:$0xff]   ;;  %v107_v50 = vld [vmem:[#allocation2 + $0xa8] sm:$0xff] }
 0x2e1   :  { %9038 = vmatmul.mubr.bf16.vlgmr.msra.gmra.mrb[76].mxu0 %v1314_v7  ;;  %v1029_v63 = vrot.slane %v1001_v57, %v12455_v37  ;;  %v155_v52 = vld [vmem:[#allocation2 + $0x228] sm:$0xff]  ;;  %v1035_v55 = vcombine.high %v107_v50, %v131_v51 }
 0x2e2   :  { %9078 = vmatmul.mubr.bf16.vlgmr.msra.gmra.mrb[76].mxu1 %v1316_v9  ;;  %11170 = vmatpush3.bf16.msra.mxu0 %v12081_v2  ;;  %v1008_v59 = vrot.slane %v998_v54, %v12455_v37  ;;  %v1015_v61 = vrot.slane %v999_v56, %v12455_v37  ;;  %v12113_v2 = vld [vmem:[#allocation5 + $0x1500] sm:$0xff]   ;;  %v1034_v54 = vcombine.low %v107_v50, %v131_v51  ;;  %v12142_v56 = vld [vmem:[#allocation5 + $0x15b8] sm:$0xff]  }
 0x2e3   :  { %11192 = vmatpush3.bf16.msra.mxu1 %v12082_v4  ;;  %11171 = vmatprep.subr.bf16.mxu0 %v12083_v8  ;;  %v12115_v8 = vld [vmem:[#allocation5 + $0x1548] sm:$0xff]   ;;  %v12173_v50 = vld [vmem:[#allocation5 + $0x1638] sm:$0xff]  }
 0x2e4   :  { %11193 = vmatprep.subr.bf16.mxu1 %v12084_v10  ;;  %v1031_v0 = vcombine.high %v1008_v59, %v1022_v60  ;;  %v1030_v1 = vcombine.low %v1008_v59, %v1022_v60  ;;  %v1033_v3 = vcombine.high %v1015_v61, %v1029_v63  ;;  %v1032_v4 = vcombine.low %v1015_v61, %v1029_v63  ;;  %v12143_v61 = vld [vmem:[#allocation5 + $0x1640] sm:$0xff]   ;;  %v12174_v51 = vld [vmem:[#allocation5 + $0x16b8] sm:$0xff]  }
 0x2e5   :  { %v1044_v59 = vrot.slane %v1034_v54, %v12455_v37  ;;  %v1051_v60 = vrot.slane %v1035_v55, %v12455_v37  ;;  %v156_v54 = vld [vmem:[#allocation2 + $0x230] sm:$0xff] }
 0x2e6   :  { %11172 = vmatpush3.bf16.msra.mxu0 %v12085_v11  ;;  %v1319_v6 = vpack.c.bf16 %v1031_v0, %v1031_v0  ;;  %v1318_v7 = vpack.c.bf16 %v1030_v1, %v1030_v1  ;;  %v1321_v9 = vpack.c.bf16 %v1033_v3, %v1033_v3  ;;  %v1320_v10 = vpack.c.bf16 %v1032_v4, %v1032_v4  ;;  %v12116_v11 = vld [vmem:[#allocation5 + $0x15c8] sm:$0xff]   ;;  %v12144_v0 = vld [vmem:[#allocation5 + $0x16c0] sm:$0xff]   ;;  %v180_v55 = vld [vmem:[#allocation2 + $0x2f0] sm:$0xff] }
 0x2e7   :  { %11194 = vmatpush3.bf16.msra.mxu1 %v12086_v12  ;;  %11173 = vmatprep.subr.bf16.mxu0 %v12087_v13  ;;  %v12117_v12 = vld [vmem:[#allocation5 + $0x1508] sm:$0xff]  }
 0x2e8   :  { %11195 = vmatprep.subr.bf16.mxu1 %v12088_v14  ;;  %9117 = vmatprep.mubr.bf16.mxu0 %v1319_v6  ;;  %v12118_v13 = vld [vmem:[#allocation5 + $0x1588] sm:$0xff]   ;;  %v12119_v14 = vld [vmem:[#allocation5 + $0x1550] sm:$0xff]   ;;  %v12146_v6 = vld [vmem:[#allocation5 + $0x1680] sm:$0xff]  }
 0x2e9   :  { %9157 = vmatprep.mubr.bf16.mxu1 %v1321_v9 }
 0x2ea   :  { %11174 = vmatpush3.bf16.msra.mxu0 %v12089_v15  ;;  %v12120_v15 = vld [vmem:[#allocation5 + $0x15d0] sm:$0xff]  }
 0x2eb   :  { %11196 = vmatpush3.bf16.msra.mxu1 %v12090_v16  ;;  %11175 = vmatprep.subr.bf16.mxu0 %v12091_v17  ;;  %v12121_v16 = vld [vmem:[#allocation5 + $0x1510] sm:$0xff]  }
 0x2ec   :  { %11197 = vmatprep.subr.bf16.mxu1 %v12092_v18  ;;  %v12122_v17 = vld [vmem:[#allocation5 + $0x1590] sm:$0xff]   ;;  %v12123_v18 = vld [vmem:[#allocation5 + $0x1558] sm:$0xff]  }
 0x2ee   :  { %11176 = vmatpush3.bf16.msra.mxu0 %v12093_v19  ;;  %v12124_v19 = vld [vmem:[#allocation5 + $0x15d8] sm:$0xff]  }
 0x2ef   :  { %11198 = vmatpush3.bf16.msra.mxu1 %v12094_v20  ;;  %11177 = vmatprep.subr.bf16.mxu0 %v12095_v22  ;;  %v12125_v20 = vld [vmem:[#allocation5 + $0x1518] sm:$0xff]   ;;  %v12127_v22 = vld [vmem:[#allocation5 + $0x1560] sm:$0xff]  }
 0x2f0   :  { %11199 = vmatprep.subr.bf16.mxu1 %v12096_v23 }
 0x2f2   :  { %11178 = vmatpush3.bf16.msra.mxu0 %v12097_v26  ;;  %v12129_v26 = vld [vmem:[#allocation5 + $0x1520] sm:$0xff]  }
 0x2f3   :  { %11200 = vmatpush3.bf16.msra.mxu1 %v12098_v30  ;;  %11179 = vmatprep.subr.bf16.mxu0 %v12099_v27 }
 0x2f4   :  { %v10877_v21 = vpop.f32.mrb[52].mxu0  ;;  %11201 = vmatprep.subr.bf16.mxu1 %v12100_v41  ;;  %v12132_v41 = vld [vmem:[#allocation5 + $0x15e8] sm:$0xff]  }
 0x2f5   :  { %v10899_v24 = vpop.f32.mrb[52].mxu1  ;;  %v10878_v25 = vpop.f32.mrb[53].mxu0 }
 0x2f6   :  { %v10879_v31 = vadd.f32 %v10878_v25, %v10877_v21  ;;  %v10900_v34 = vpop.f32.mrb[53].mxu1  ;;  %v10880_v36 = vpop.f32.mrb[54].mxu0  ;;  %11180 = vmatpush3.bf16.msra.mxu0 %v12101_v39  ;;  %v12126_v21 = vld [vmem:[#allocation5 + $0x1598] sm:$0xff]   ;;  %v12133_v39 = vld [vmem:[#allocation5 + $0x1528] sm:$0xff]  }
 0x2f7   :  { %v10901_v28 = vadd.f32 %v10900_v34, %v10899_v24  ;;  %v10902_v32 = vpop.f32.mrb[54].mxu1  ;;  %v10881_v35 = vpop.f32.mrb[55].mxu0  ;;  %11202 = vmatpush3.bf16.msra.mxu1 %v12102_v44  ;;  %11181 = vmatprep.subr.bf16.mxu0 %v12103_v45  ;;  %v12128_v24 = vld [vmem:[#allocation5 + $0x15e0] sm:$0xff]  }
 0x2f8   :  { %v8560_v38 = vadd.f32 %v10879_v31, %v12569_v29  ;;  %v10903_v33 = vpop.f32.mrb[55].mxu1  ;;  %v12107_v29 = vld [vmem:[#allocation5 + $0x1478] sm:$0xff]   ;;  %11203 = vmatprep.subr.bf16.mxu1 %v12104_v40  ;;  %v12130_v34 = vld [vmem:[#allocation5 + $0x15a0] sm:$0xff]   ;;  %v12134_v40 = vld [vmem:[#allocation5 + $0x15a8] sm:$0xff]  }
 0x2fa   :  { %v12576_v43 = vadd.f32 %v10901_v28, %v8560_v38  ;;  %11182 = vmatpush3.bf16.msra.mxu0 %v12105_v42  ;;  %v12131_v38 = vld [vmem:[#allocation5 + $0x1568] sm:$0xff]   ;;  %v12135_v42 = vld [vmem:[#allocation5 + $0x1570] sm:$0xff]  }
 0x2fb   :  { %11204 = vmatpush3.bf16.msra.mxu1 %v12106_v46  ;;  %11183 = vmatprep.subr.bf16.mxu0 %v12107_v29  ;;  %v12136_v46 = vld [vmem:[#allocation5 + $0x15f0] sm:$0xff]  }
 0x2fc   :  { %11205 = vmatprep.subr.bf16.mxu1 %v12108_v47  ;;  %v12137_v29 = vld [vmem:[#allocation5 + $0x1530] sm:$0xff]  }
 0x2fd   :  { %v12138_v47 = vld [vmem:[#allocation5 + $0x15b0] sm:$0xff]  }
 0x2fe   :  { %11184 = vmatpush3.bf16.msra.mxu0 %v12109_v49  ;;  %v12141_v49 = vld [vmem:[#allocation5 + $0x1538] sm:$0xff]  }
 0x2ff   :  { %11206 = vmatpush3.bf16.msra.mxu1 %v12110_v53  ;;  %11213 = vmatprep.subr.bf16.mxu0 %v12111_v58  ;;  %v179_v53 = vld [vmem:[#allocation2 + $0x2e8] sm:$0xff] }
 0x300   :  { %11235 = vmatprep.subr.bf16.mxu1 %v12112_v62  ;;  %v1036_v57 = vcombine.low %v155_v52, %v179_v53  ;;  %v1037_v58 = vcombine.high %v155_v52, %v179_v53  ;;  %v108_v52 = vld [vmem:[#allocation2 + $0xb0] sm:$0xff] }
 0x301   :  { %9118 = vmatmul.mubr.bf16.vlgmr.msra.gmra.mrb[80].mxu0 %v1318_v7  ;;  %v132_v53 = vld [vmem:[#allocation2 + $0x170] sm:$0xff] }
 0x302   :  { %9158 = vmatmul.mubr.bf16.vlgmr.msra.gmra.mrb[80].mxu1 %v1320_v10  ;;  %11214 = vmatpush3.bf16.msra.mxu0 %v12113_v2  ;;  %v1058_v62 = vrot.slane %v1036_v57, %v12455_v37  ;;  %v1065_v63 = vrot.slane %v1037_v58, %v12455_v37  ;;  %v1071_v57 = vcombine.high %v108_v52, %v132_v53 }
 0x303   :  { %11236 = vmatpush3.bf16.msra.mxu1 %v12114_v5  ;;  %11215 = vmatprep.subr.bf16.mxu0 %v12115_v8  ;;  %v12145_v5 = vld [vmem:[#allocation5 + $0x1600] sm:$0xff]   ;;  %v1072_v58 = vcombine.low %v156_v54, %v180_v55 }
 0x304   :  { %11237 = vmatprep.subr.bf16.mxu1 %v12116_v11  ;;  %v1067_v1 = vcombine.high %v1044_v59, %v1058_v62  ;;  %v1069_v2 = vcombine.high %v1051_v60, %v1065_v63  ;;  %v1066_v3 = vcombine.low %v1044_v59, %v1058_v62  ;;  %v1068_v4 = vcombine.low %v1051_v60, %v1065_v63  ;;  %v12147_v11 = vld [vmem:[#allocation5 + $0x1648] sm:$0xff]   ;;  %v12175_v60 = vld [vmem:[#allocation5 + $0x1740] sm:$0xff]  }
 0x305   :  { %v1073_v59 = vcombine.high %v156_v54, %v180_v55  ;;  %v1087_v62 = vrot.slane %v1071_v57, %v12455_v37  ;;  %v12176_v63 = vld [vmem:[#allocation5 + $0x17c0] sm:$0xff]   ;;  %v181_v54 = vld [vmem:[#allocation2 + $0x2f8] sm:$0xff] }
 0x306   :  { %11216 = vmatpush3.bf16.msra.mxu0 %v12117_v12  ;;  %v1323_v7 = vpack.c.bf16 %v1067_v1, %v1067_v1  ;;  %v1325_v8 = vpack.c.bf16 %v1069_v2, %v1069_v2  ;;  %v1322_v9 = vpack.c.bf16 %v1066_v3, %v1066_v3  ;;  %v1324_v10 = vpack.c.bf16 %v1068_v4, %v1068_v4  ;;  %v12148_v12 = vld [vmem:[#allocation5 + $0x16c8] sm:$0xff]  }
 0x307   :  { %11238 = vmatpush3.bf16.msra.mxu1 %v12118_v13  ;;  %11217 = vmatprep.subr.bf16.mxu0 %v12119_v14  ;;  %v12149_v13 = vld [vmem:[#allocation5 + $0x1608] sm:$0xff]   ;;  %v1101_v1 = vrot.slane %v1073_v59, %v12455_v37  ;;  %v12205_v59 = vld [vmem:[#allocation5 + $0x1738] sm:$0xff]  }
 0x308   :  { %11239 = vmatprep.subr.bf16.mxu1 %v12120_v15  ;;  %9197 = vmatprep.mubr.bf16.mxu0 %v1323_v7  ;;  %v12150_v14 = vld [vmem:[#allocation5 + $0x1688] sm:$0xff]   ;;  %v12151_v15 = vld [vmem:[#allocation5 + $0x1650] sm:$0xff]   ;;  %v12178_v7 = vld [vmem:[#allocation5 + $0x1780] sm:$0xff]  }
 0x309   :  { %9237 = vmatprep.mubr.bf16.mxu1 %v1325_v8  ;;  %v1105_v3 = vcombine.high %v1087_v62, %v1101_v1 }
 0x30a   :  { %11218 = vmatpush3.bf16.msra.mxu0 %v12121_v16  ;;  %v12152_v16 = vld [vmem:[#allocation5 + $0x16d0] sm:$0xff]  }
 0x30b   :  { %11240 = vmatpush3.bf16.msra.mxu1 %v12122_v17  ;;  %11219 = vmatprep.subr.bf16.mxu0 %v12123_v18  ;;  %v12153_v17 = vld [vmem:[#allocation5 + $0x1610] sm:$0xff]  }
 0x30c   :  { %11241 = vmatprep.subr.bf16.mxu1 %v12124_v19  ;;  %v12154_v18 = vld [vmem:[#allocation5 + $0x1690] sm:$0xff]   ;;  %v12155_v19 = vld [vmem:[#allocation5 + $0x1658] sm:$0xff]  }
 0x30e   :  { %11220 = vmatpush3.bf16.msra.mxu0 %v12125_v20  ;;  %v12156_v20 = vld [vmem:[#allocation5 + $0x16d8] sm:$0xff]  }
 0x30f   :  { %11242 = vmatpush3.bf16.msra.mxu1 %v12126_v21  ;;  %11221 = vmatprep.subr.bf16.mxu0 %v12127_v22  ;;  %v12157_v21 = vld [vmem:[#allocation5 + $0x1618] sm:$0xff]  }
 0x310   :  { %11243 = vmatprep.subr.bf16.mxu1 %v12128_v24  ;;  %v12158_v22 = vld [vmem:[#allocation5 + $0x1698] sm:$0xff]   ;;  %v12159_v24 = vld [vmem:[#allocation5 + $0x1660] sm:$0xff]  }
 0x312   :  { %11222 = vmatpush3.bf16.msra.mxu0 %v12129_v26 }
 0x313   :  { %11244 = vmatpush3.bf16.msra.mxu1 %v12130_v34  ;;  %11223 = vmatprep.subr.bf16.mxu0 %v12131_v38  ;;  %v12162_v34 = vld [vmem:[#allocation5 + $0x16a0] sm:$0xff]  }
 0x314   :  { %v10921_v23 = vpop.f32.mrb[56].mxu0  ;;  %11245 = vmatprep.subr.bf16.mxu1 %v12132_v41  ;;  %v12163_v41 = vld [vmem:[#allocation5 + $0x1668] sm:$0xff]  }
 0x315   :  { %v10943_v25 = vpop.f32.mrb[56].mxu1  ;;  %v10922_v30 = vpop.f32.mrb[57].mxu0 }
 0x316   :  { %v10944_v31 = vpop.f32.mrb[57].mxu1  ;;  %v10923_v28 = vadd.f32 %v10922_v30, %v10921_v23  ;;  %v10924_v32 = vpop.f32.mrb[58].mxu0  ;;  %11224 = vmatpush3.bf16.msra.mxu0 %v12133_v39  ;;  %v12164_v39 = vld [vmem:[#allocation5 + $0x16e8] sm:$0xff]  }
 0x317   :  { %v10945_v36 = vadd.f32 %v10944_v31, %v10943_v25  ;;  %v10946_v27 = vpop.f32.mrb[58].mxu1  ;;  %v10925_v33 = vpop.f32.mrb[59].mxu0  ;;  %11246 = vmatpush3.bf16.msra.mxu1 %v12134_v40  ;;  %11225 = vmatprep.subr.bf16.mxu0 %v12135_v42  ;;  %v12160_v25 = vld [vmem:[#allocation5 + $0x16e0] sm:$0xff]   ;;  %v12165_v42 = vld [vmem:[#allocation5 + $0x1628] sm:$0xff]  }
 0x318   :  { %v8640_v35 = vadd.f32 %v10923_v28, %v12576_v43  ;;  %v10947_v44 = vpop.f32.mrb[59].mxu1  ;;  %v12140_v43 = vld [vmem:[#allocation5 + $0x15f8] sm:$0xff]   ;;  %11247 = vmatprep.subr.bf16.mxu1 %v12136_v46  ;;  %v12161_v31 = vld [vmem:[#allocation5 + $0x1620] sm:$0xff]   ;;  %v12166_v46 = vld [vmem:[#allocation5 + $0x16a8] sm:$0xff]  }
 0x31a   :  { %v12583_v45 = vadd.f32 %v10945_v36, %v8640_v35  ;;  %11226 = vmatpush3.bf16.msra.mxu0 %v12137_v29  ;;  %v12167_v29 = vld [vmem:[#allocation5 + $0x1670] sm:$0xff]  }
 0x31b   :  { %11248 = vmatpush3.bf16.msra.mxu1 %v12138_v47  ;;  %11227 = vmatprep.subr.bf16.mxu0 %v12139_v48  ;;  %v12168_v47 = vld [vmem:[#allocation5 + $0x16f0] sm:$0xff]  }
 0x31c   :  { %11249 = vmatprep.subr.bf16.mxu1 %v12140_v43  ;;  %v12169_v48 = vld [vmem:[#allocation5 + $0x1630] sm:$0xff]  }
 0x31d   :  { %v12170_v43 = vld [vmem:[#allocation5 + $0x16b0] sm:$0xff]  }
 0x31e   :  { %11228 = vmatpush3.bf16.msra.mxu0 %v12141_v49  ;;  %v12172_v49 = vld [vmem:[#allocation5 + $0x16f8] sm:$0xff]  }
 0x31f   :  { %11250 = vmatpush3.bf16.msra.mxu1 %v12142_v56  ;;  %11257 = vmatprep.subr.bf16.mxu0 %v12143_v61  ;;  %v1070_v56 = vcombine.low %v108_v52, %v132_v53  ;;  %v133_v52 = vld [vmem:[#allocation2 + $0x178] sm:$0xff] }
 0x320   :  { %11279 = vmatprep.subr.bf16.mxu1 %v12144_v0  ;;  %v1094_v0 = vrot.slane %v1072_v58, %v12455_v37  ;;  %v157_v53 = vld [vmem:[#allocation2 + $0x238] sm:$0xff] }
 0x321   :  { %9198 = vmatmul.mubr.bf16.vlgmr.msra.gmra.mrb[84].mxu0 %v1322_v9  ;;  %v1080_v61 = vrot.slane %v1070_v56, %v12455_v37  ;;  %v1329_v9 = vpack.c.bf16 %v1105_v3, %v1105_v3  ;;  %v1108_v56 = vcombine.low %v157_v53, %v181_v54  ;;  %v1109_v58 = vcombine.high %v157_v53, %v181_v54 }
 0x322   :  { %9238 = vmatmul.mubr.bf16.vlgmr.msra.gmra.mrb[84].mxu1 %v1324_v10  ;;  %11258 = vmatpush3.bf16.msra.mxu0 %v12145_v5  ;;  %v12177_v5 = vld [vmem:[#allocation5 + $0x1700] sm:$0xff]  }
 0x323   :  { %11280 = vmatpush3.bf16.msra.mxu1 %v12146_v6  ;;  %11259 = vmatprep.subr.bf16.mxu0 %v12147_v11  ;;  %v1103_v2 = vcombine.high %v1080_v61, %v1094_v0  ;;  %v1102_v4 = vcombine.low %v1080_v61, %v1094_v0  ;;  %v1104_v6 = vcombine.low %v1087_v62, %v1101_v1  ;;  %v12179_v11 = vld [vmem:[#allocation5 + $0x1748] sm:$0xff]  }
 0x324   :  { %11281 = vmatprep.subr.bf16.mxu1 %v12148_v12  ;;  %9317 = vmatprep.mubr.bf16.mxu1 %v1329_v9  ;;  %v1130_v62 = vrot.slane %v1108_v56, %v12455_v37  ;;  %v1137_v0 = vrot.slane %v1109_v58, %v12455_v37 }
 0x325   :  { %v1327_v8 = vpack.c.bf16 %v1103_v2, %v1103_v2  ;;  %v1326_v10 = vpack.c.bf16 %v1102_v4, %v1102_v4  ;;  %v1328_v12 = vpack.c.bf16 %v1104_v6, %v1104_v6 }
 0x326   :  { %11260 = vmatpush3.bf16.msra.mxu0 %v12149_v13  ;;  %v12180_v13 = vld [vmem:[#allocation5 + $0x17c8] sm:$0xff]  }
 0x327   :  { %11282 = vmatpush3.bf16.msra.mxu1 %v12150_v14  ;;  %11261 = vmatprep.subr.bf16.mxu0 %v12151_v15  ;;  %v12181_v14 = vld [vmem:[#allocation5 + $0x1708] sm:$0xff]  }
 0x328   :  { %11283 = vmatprep.subr.bf16.mxu1 %v12152_v16  ;;  %9277 = vmatprep.mubr.bf16.mxu0 %v1327_v8  ;;  %v12182_v15 = vld [vmem:[#allocation5 + $0x1788] sm:$0xff]   ;;  %v12183_v16 = vld [vmem:[#allocation5 + $0x1750] sm:$0xff]  }
 0x32a   :  { %11262 = vmatpush3.bf16.msra.mxu0 %v12153_v17  ;;  %v12184_v17 = vld [vmem:[#allocation5 + $0x17d0] sm:$0xff]  }
 0x32b   :  { %11284 = vmatpush3.bf16.msra.mxu1 %v12154_v18  ;;  %11263 = vmatprep.subr.bf16.mxu0 %v12155_v19  ;;  %v12185_v18 = vld [vmem:[#allocation5 + $0x1710] sm:$0xff]  }
 0x32c   :  { %11285 = vmatprep.subr.bf16.mxu1 %v12156_v20  ;;  %v12186_v19 = vld [vmem:[#allocation5 + $0x1790] sm:$0xff]   ;;  %v12187_v20 = vld [vmem:[#allocation5 + $0x1758] sm:$0xff]  }
 0x32e   :  { %11264 = vmatpush3.bf16.msra.mxu0 %v12157_v21  ;;  %v12188_v21 = vld [vmem:[#allocation5 + $0x17d8] sm:$0xff]  }
 0x32f   :  { %11286 = vmatpush3.bf16.msra.mxu1 %v12158_v22  ;;  %11265 = vmatprep.subr.bf16.mxu0 %v12159_v24  ;;  %v12189_v22 = vld [vmem:[#allocation5 + $0x1718] sm:$0xff]  }
 0x330   :  { %11287 = vmatprep.subr.bf16.mxu1 %v12160_v25  ;;  %v12191_v25 = vld [vmem:[#allocation5 + $0x1760] sm:$0xff]  }
 0x332   :  { %11266 = vmatpush3.bf16.msra.mxu0 %v12161_v31 }
 0x333   :  { %11288 = vmatpush3.bf16.msra.mxu1 %v12162_v34  ;;  %11267 = vmatprep.subr.bf16.mxu0 %v12163_v41  ;;  %v12193_v34 = vld [vmem:[#allocation5 + $0x1720] sm:$0xff]  }
 0x334   :  { %v10965_v23 = vpop.f32.mrb[60].mxu0  ;;  %11289 = vmatprep.subr.bf16.mxu1 %v12164_v39 }
 0x335   :  { %v10987_v26 = vpop.f32.mrb[60].mxu1  ;;  %v10966_v30 = vpop.f32.mrb[61].mxu0 }
 0x336   :  { %v10967_v28 = vadd.f32 %v10966_v30, %v10965_v23  ;;  %v10988_v36 = vpop.f32.mrb[61].mxu1  ;;  %v10968_v38 = vpop.f32.mrb[62].mxu0  ;;  %11268 = vmatpush3.bf16.msra.mxu0 %v12165_v42  ;;  %v12190_v23 = vld [vmem:[#allocation5 + $0x1798] sm:$0xff]  }
 0x337   :  { %v10989_v32 = vadd.f32 %v10988_v36, %v10987_v26  ;;  %v10990_v27 = vpop.f32.mrb[62].mxu1  ;;  %v10969_v33 = vpop.f32.mrb[63].mxu0  ;;  %11290 = vmatpush3.bf16.msra.mxu1 %v12166_v46  ;;  %11269 = vmatprep.subr.bf16.mxu0 %v12167_v29  ;;  %v12192_v26 = vld [vmem:[#allocation5 + $0x17e0] sm:$0xff]   ;;  %v12197_v29 = vld [vmem:[#allocation5 + $0x1728] sm:$0xff]  }
 0x338   :  { %v8720_v35 = vadd.f32 %v10967_v28, %v12583_v45  ;;  %v10991_v44 = vpop.f32.mrb[63].mxu1  ;;  %v12171_v45 = vld [vmem:[#allocation5 + $0x1678] sm:$0xff]   ;;  %11291 = vmatprep.subr.bf16.mxu1 %v12168_v47  ;;  %v12194_v28 = vld [vmem:[#allocation5 + $0x17a0] sm:$0xff]   ;;  %v12195_v33 = vld [vmem:[#allocation5 + $0x1768] sm:$0xff]  }
 0x339   :  { %v12196_v44 = vld [vmem:[#allocation5 + $0x17e8] sm:$0xff]  }
 0x33a   :  { %v12590_v40 = vadd.f32 %v10989_v32, %v8720_v35  ;;  %11270 = vmatpush3.bf16.msra.mxu0 %v12169_v48  ;;  %v12198_v47 = vld [vmem:[#allocation5 + $0x17a8] sm:$0xff]   ;;  %v12199_v48 = vld [vmem:[#allocation5 + $0x1770] sm:$0xff]  }
 0x33b   :  { %11292 = vmatpush3.bf16.msra.mxu1 %v12170_v43  ;;  %11271 = vmatprep.subr.bf16.mxu0 %v12171_v45  ;;  %v12200_v43 = vld [vmem:[#allocation5 + $0x17f0] sm:$0xff]  }
 0x33c   :  { %11293 = vmatprep.subr.bf16.mxu1 %v12172_v49  ;;  %v12201_v45 = vld [vmem:[#allocation5 + $0x1730] sm:$0xff]  }
 0x33d   :  { %v12202_v49 = vld [vmem:[#allocation5 + $0x17b0] sm:$0xff]  }
 0x33e   :  { %11272 = vmatpush3.bf16.msra.mxu0 %v12173_v50  ;;  %v12204_v50 = vld [vmem:[#allocation5 + $0x17f8] sm:$0xff]  }
 0x33f   :  { %11294 = vmatpush3.bf16.msra.mxu1 %v12174_v51  ;;  %11301 = vmatprep.subr.bf16.mxu0 %v12175_v60  ;;  %v109_v51 = vld [vmem:[#allocation2 + $0xb8] sm:$0xff] }
 0x340   :  { %11323 = vmatprep.subr.bf16.mxu1 %v12176_v63  ;;  %v1106_v55 = vcombine.low %v109_v51, %v133_v52  ;;  %v1107_v57 = vcombine.high %v109_v51, %v133_v52  ;;  %v12206_v60 = vld [vmem:[#allocation5 + $0x17b8] sm:$0xff]  }
 0x341   :  { %9278 = vmatmul.mubr.bf16.vlgmr.msra.gmra.mrb[88].mxu0 %v1326_v10 }
 0x342   :  { %9318 = vmatmul.mubr.bf16.vlgmr.msra.gmra.mrb[88].mxu1 %v1328_v12  ;;  %11302 = vmatpush3.bf16.msra.mxu0 %v12177_v5  ;;  %v1116_v61 = vrot.slane %v1106_v55, %v12455_v37  ;;  %v1123_v63 = vrot.slane %v1107_v57, %v12455_v37 }
 0x343   :  { %11324 = vmatpush3.bf16.msra.mxu1 %v12178_v7  ;;  %11303 = vmatprep.subr.bf16.mxu0 %v12179_v11 }
 0x344   :  { %11325 = vmatprep.subr.bf16.mxu1 %v12180_v13  ;;  %v1139_v1 = vcombine.high %v1116_v61, %v1130_v62  ;;  %v1138_v2 = vcombine.low %v1116_v61, %v1130_v62  ;;  %v1141_v3 = vcombine.high %v1123_v63, %v1137_v0  ;;  %v1140_v4 = vcombine.low %v1123_v63, %v1137_v0  ;;  %v9418_v0 = vld [vmem:[#allocation8 + $0x60] sm:$0xff] }
 0x346   :  { %11304 = vmatpush3.bf16.msra.mxu0 %v12181_v14  ;;  %v1331_v5 = vpack.c.bf16 %v1139_v1, %v1139_v1  ;;  %v1330_v6 = vpack.c.bf16 %v1138_v2, %v1138_v2  ;;  %v1333_v7 = vpack.c.bf16 %v1141_v3, %v1141_v3  ;;  %v1332_v8 = vpack.c.bf16 %v1140_v4, %v1140_v4  ;;  %v9419_v1 = vld [vmem:[#allocation8 + $0x68] sm:$0xff]  ;;  %v9420_v3 = vld [vmem:[#allocation8 + $0x70] sm:$0xff]  ;;  %v9421_v4 = vld [vmem:[#allocation8 + $0x78] sm:$0xff] }
 0x347   :  { %11326 = vmatpush3.bf16.msra.mxu1 %v12182_v15  ;;  %11305 = vmatprep.subr.bf16.mxu0 %v12183_v16  ;;  %v11416_v2 = vpack.c.bf16 %v9419_v1, %v9418_v0 }
 0x348   :  { %11327 = vmatprep.subr.bf16.mxu1 %v12184_v17  ;;  %9357 = vmatprep.mubr.bf16.mxu0 %v1331_v5  ;;  %v11419_v5 = vpack.c.bf16 %v9421_v4, %v9420_v3 }
 0x349   :  { %9397 = vmatprep.mubr.bf16.mxu1 %v1333_v7 }
 0x34a   :  { %11306 = vmatpush3.bf16.msra.mxu0 %v12185_v18 }
 0x34b   :  { %11328 = vmatpush3.bf16.msra.mxu1 %v12186_v19  ;;  %11307 = vmatprep.subr.bf16.mxu0 %v12187_v20 }
 0x34c   :  { %11329 = vmatprep.subr.bf16.mxu1 %v12188_v21 }
 0x34e   :  { %11308 = vmatpush3.bf16.msra.mxu0 %v12189_v22 }
 0x34f   :  { %11330 = vmatpush3.bf16.msra.mxu1 %v12190_v23  ;;  %11309 = vmatprep.subr.bf16.mxu0 %v12191_v25 }
 0x350   :  { %11331 = vmatprep.subr.bf16.mxu1 %v12192_v26 }
 0x352   :  { %11310 = vmatpush3.bf16.msra.mxu0 %v12193_v34 }
 0x353   :  { %11332 = vmatpush3.bf16.msra.mxu1 %v12194_v28  ;;  %11311 = vmatprep.subr.bf16.mxu0 %v12195_v33  ;;  %v9409_v33 = vld [vmem:[#allocation8 + $0x18] sm:$0xff] }
 0x354   :  { %v11009_v24 = vpop.f32.mrb[64].mxu0  ;;  %11333 = vmatprep.subr.bf16.mxu1 %v12196_v44  ;;  %v9410_v44 = vld [vmem:[#allocation8 + $0x20] sm:$0xff] }
 0x355   :  { %v11031_v30 = vpop.f32.mrb[64].mxu1  ;;  %v11010_v31 = vpop.f32.mrb[65].mxu0 }
 0x356   :  { %v11011_v36 = vadd.f32 %v11010_v31, %v11009_v24  ;;  %v11032_v32 = vpop.f32.mrb[65].mxu1  ;;  %v11012_v27 = vpop.f32.mrb[66].mxu0  ;;  %11312 = vmatpush3.bf16.msra.mxu0 %v12197_v29  ;;  %v9412_v29 = vld [vmem:[#allocation8 + $0x30] sm:$0xff] }
 0x357   :  { %v11033_v38 = vadd.f32 %v11032_v32, %v11031_v30  ;;  %v11034_v35 = vpop.f32.mrb[66].mxu1  ;;  %v11013_v39 = vpop.f32.mrb[67].mxu0  ;;  %11334 = vmatpush3.bf16.msra.mxu1 %v12198_v47  ;;  %11313 = vmatprep.subr.bf16.mxu0 %v12199_v48  ;;  %v9406_v32 = vld [vmem:[#allocation8] sm:$0xff]  ;;  %v9408_v27 = vld [vmem:[#allocation8 + $0x10] sm:$0xff]  ;;  %v9413_v47 = vld [vmem:[#allocation8 + $0x38] sm:$0xff] }
 0x358   :  { %v8800_v41 = vadd.f32 %v11011_v36, %v12590_v40  ;;  %v11035_v42 = vpop.f32.mrb[67].mxu1  ;;  %v12203_v40 = vld [vmem:[#allocation5 + $0x1778] sm:$0xff]   ;;  %11335 = vmatprep.subr.bf16.mxu1 %v12200_v43  ;;  %v12359_v35 = vmov 0.0|0.0   ;;  %v11401_v39 = vpack.c.bf16 %v9409_v33, %v9408_v27  ;;  %v11407_v48 = vpack.c.bf16 %v9413_v47, %v9412_v29  ;;  %v9414_v43 = vld [vmem:[#allocation8 + $0x40] sm:$0xff] }
 0x359   :  { %v9411_v42 = vld [vmem:[#allocation8 + $0x28] sm:$0xff] }
 0x35a   :  { %v8840_v46 = vadd.f32 %v11033_v38, %v8800_v41  ;;  %11314 = vmatpush3.bf16.msra.mxu0 %v12201_v45  ;;  %v9407_v38 = vld [vmem:[#allocation8 + $0x8] sm:$0xff] }
 0x35b   :  { %11336 = vmatpush3.bf16.msra.mxu1 %v12202_v49  ;;  %11315 = vmatprep.subr.bf16.mxu0 %v12203_v40  ;;  %v11398_v41 = vpack.c.bf16 %v9407_v38, %v9406_v32  ;;  %v9415_v45 = vld [vmem:[#allocation8 + $0x48] sm:$0xff]  ;;  %v9416_v40 = vld [vmem:[#allocation8 + $0x50] sm:$0xff] }
 0x35c   :  { %11337 = vmatprep.subr.bf16.mxu1 %v12204_v50  ;;  %v11410_v49 = vpack.c.bf16 %v9415_v45, %v9414_v43  ;;  %v9417_v50 = vld [vmem:[#allocation8 + $0x58] sm:$0xff] }
 0x35d   :  { %v11413_v51 = vpack.c.bf16 %v9417_v50, %v9416_v40 }
 0x35e   :  { %11316 = vmatpush3.bf16.msra.mxu0 %v12205_v59 }
 0x35f   :  { %11338 = vmatpush3.bf16.msra.mxu1 %v12206_v60  ;;  %11397 = vmatprep.subr.bf16.mxu0 %v12359_v35 }
 0x361   :  { %9358 = vmatmul.mubr.bf16.vlgmr.msra.gmra.mrb[92].mxu0 %v1330_v6  ;;  %v12361_v6 = vmov 0.0  }
 0x362   :  { %9398 = vmatmul.mubr.bf16.vlgmr.msra.gmra.mrb[92].mxu1 %v1332_v8  ;;  %11399 = vmatpush3.bf16.msra.mxu0 %v11398_v41 }
 0x363   :  { %11400 = vmatprep.subr.bf16.mxu0 %v12359_v35  ;;  %11394 = vmatprep.mubr.msk.f32.mxu0 %vm12360_vm0, %v12361_v6 }
 0x366   :  { %11402 = vmatpush3.bf16.msra.mxu0 %v11401_v39 }
 0x367   :  { %11403 = vmatprep.subr.bf16.mxu0 %v12359_v35 }
 0x374   :  { %v11053_v9 = vpop.f32.mrb[68].mxu0 }
 0x375   :  { %v11075_v10 = vpop.f32.mrb[68].mxu1  ;;  %v11054_v11 = vpop.f32.mrb[69].mxu0 }
 0x376   :  { %v11055_v12 = vadd.f32 %v11054_v11, %v11053_v9  ;;  %v11076_v13 = vpop.f32.mrb[69].mxu1  ;;  %v11056_v37 = vpop.f32.mrb[70].mxu0 }
 0x377   :  { %v11077_v14 = vadd.f32 %v11076_v13, %v11075_v10  ;;  %v11078_v15 = vpop.f32.mrb[70].mxu1  ;;  %v11057_v16 = vpop.f32.mrb[71].mxu0 }
 0x378   :  { %v8880_v17 = vadd.f32 %v11055_v12, %v8840_v46  ;;  %v11079_v18 = vpop.f32.mrb[71].mxu1  ;;  %v11404_v46 = vpack.c.bf16 %v9411_v42, %v9410_v44 }
 0x37a   :  { %v8920_v19 = vadd.f32 %v11077_v14, %v8880_v17  ;;  %11405 = vmatpush3.bf16.msra.mxu0 %v11404_v46 }
 0x37b   :  { %11406 = vmatprep.subr.bf16.mxu0 %v12359_v35 }
 0x37e   :  { %11408 = vmatpush3.bf16.msra.mxu0 %v11407_v48 }
 0x37f   :  { %11409 = vmatprep.subr.bf16.mxu0 %v12359_v35 }
 0x382   :  { %11411 = vmatpush3.bf16.msra.mxu0 %v11410_v49 }
 0x383   :  { %11412 = vmatprep.subr.bf16.mxu0 %v12359_v35 }
 0x386   :  { %11414 = vmatpush3.bf16.msra.mxu0 %v11413_v51 }
 0x387   :  { %11415 = vmatprep.subr.bf16.mxu0 %v12359_v35 }
 0x38a   :  { %11417 = vmatpush3.bf16.msra.mxu0 %v11416_v2 }
 0x38b   :  { %11418 = vmatprep.subr.bf16.mxu0 %v12359_v35 }
 0x38e   :  { %11420 = vmatpush3.bf16.msra.mxu0 %v11419_v5 }
 0x394   :  { %v11097_v20 = vpop.f32.mrb[72].mxu0 }
 0x395   :  { %v11119_v21 = vpop.f32.mrb[72].mxu1  ;;  %v11098_v22 = vpop.f32.mrb[73].mxu0 }
 0x396   :  { %v11120_v23 = vpop.f32.mrb[73].mxu1  ;;  %v11099_v24 = vadd.f32 %v11098_v22, %v11097_v20  ;;  %v11100_v26 = vpop.f32.mrb[74].mxu0 }
 0x397   :  { %v11121_v25 = vadd.f32 %v11120_v23, %v11119_v21  ;;  %v11122_v30 = vpop.f32.mrb[74].mxu1  ;;  %v11101_v31 = vpop.f32.mrb[75].mxu0 }
 0x398   :  { %v11123_v34 = vpop.f32.mrb[75].mxu1  ;;  %v8960_v28 = vadd.f32 %v11099_v24, %v8920_v19 }
 0x39a   :  { %v9000_v36 = vadd.f32 %v11121_v25, %v8960_v28 }
 0x3b4   :  { %v11141_v52 = vpop.f32.mrb[76].mxu0 }
 0x3b5   :  { %v11163_v53 = vpop.f32.mrb[76].mxu1  ;;  %v11142_v54 = vpop.f32.mrb[77].mxu0 }
 0x3b6   :  { %v11164_v55 = vpop.f32.mrb[77].mxu1  ;;  %v11143_v56 = vadd.f32 %v11142_v54, %v11141_v52  ;;  %v11144_v58 = vpop.f32.mrb[78].mxu0 }
 0x3b7   :  { %v11165_v57 = vadd.f32 %v11164_v55, %v11163_v53  ;;  %v11166_v59 = vpop.f32.mrb[78].mxu1  ;;  %v11145_v60 = vpop.f32.mrb[79].mxu0 }
 0x3b8   :  { %v11167_v61 = vpop.f32.mrb[79].mxu1  ;;  %v9040_v62 = vadd.f32 %v11143_v56, %v9000_v36  ;;  %v10288_v56 = vld [vmem:[#allocation10] ss:$0 sm:$0xff] }
 0x3ba   :  { %v9080_v63 = vadd.f32 %v11165_v57, %v9040_v62 }
 0x3d4   :  { %v11185_v7 = vpop.f32.mrb[80].mxu0 }
 0x3d5   :  { %v11207_v8 = vpop.f32.mrb[80].mxu1  ;;  %v11186_v9 = vpop.f32.mrb[81].mxu0 }
 0x3d6   :  { %v11187_v10 = vadd.f32 %v11186_v9, %v11185_v7  ;;  %v11208_v11 = vpop.f32.mrb[81].mxu1  ;;  %v11188_v12 = vpop.f32.mrb[82].mxu0 }
 0x3d7   :  { %v11209_v13 = vadd.f32 %v11208_v11, %v11207_v8  ;;  %v11210_v37 = vpop.f32.mrb[82].mxu1  ;;  %v11189_v14 = vpop.f32.mrb[83].mxu0 }
 0x3d8   :  { %v9120_v15 = vadd.f32 %v11187_v10, %v9080_v63  ;;  %v11211_v16 = vpop.f32.mrb[83].mxu1 }
 0x3da   :  { %v9160_v17 = vadd.f32 %v11209_v13, %v9120_v15 }
 0x3f4   :  { %v11229_v18 = vpop.f32.mrb[84].mxu0 }
 0x3f5   :  { %v11251_v19 = vpop.f32.mrb[84].mxu1  ;;  %v11230_v20 = vpop.f32.mrb[85].mxu0 }
 0x3f6   :  { %v11252_v21 = vpop.f32.mrb[85].mxu1  ;;  %v11231_v22 = vadd.f32 %v11230_v20, %v11229_v18  ;;  %v11232_v24 = vpop.f32.mrb[86].mxu0 }
 0x3f7   :  { %v11253_v23 = vadd.f32 %v11252_v21, %v11251_v19  ;;  %v11254_v25 = vpop.f32.mrb[86].mxu1  ;;  %v11233_v26 = vpop.f32.mrb[87].mxu0 }
 0x3f8   :  { %v11255_v30 = vpop.f32.mrb[87].mxu1  ;;  %v9200_v31 = vadd.f32 %v11231_v22, %v9160_v17 }
 0x3fa   :  { %v9240_v34 = vadd.f32 %v11253_v23, %v9200_v31 }
 0x414   :  { %v11273_v28 = vpop.f32.mrb[88].mxu0 }
 0x415   :  { %v11295_v36 = vpop.f32.mrb[88].mxu1  ;;  %v11274_v32 = vpop.f32.mrb[89].mxu0 }
 0x416   :  { %v11296_v38 = vpop.f32.mrb[89].mxu1  ;;  %v11275_v27 = vadd.f32 %v11274_v32, %v11273_v28  ;;  %v11276_v41 = vpop.f32.mrb[90].mxu0 }
 0x417   :  { %v11297_v35 = vadd.f32 %v11296_v38, %v11295_v36  ;;  %v11298_v33 = vpop.f32.mrb[90].mxu1  ;;  %v11277_v39 = vpop.f32.mrb[91].mxu0 }
 0x418   :  { %v11299_v44 = vpop.f32.mrb[91].mxu1  ;;  %v9280_v42 = vadd.f32 %v11275_v27, %v9240_v34 }
 0x41a   :  { %v9320_v46 = vadd.f32 %v11297_v35, %v9280_v42 }
 0x434   :  { %v11317_v29 = vpop.f32.mrb[92].mxu0 }
 0x435   :  { %v11339_v47 = vpop.f32.mrb[92].mxu1  ;;  %v11318_v48 = vpop.f32.mrb[93].mxu0 }
 0x436   :  { %v11319_v43 = vadd.f32 %v11318_v48, %v11317_v29  ;;  %v11340_v45 = vpop.f32.mrb[93].mxu1  ;;  %v11320_v49 = vpop.f32.mrb[94].mxu0 }
 0x437   :  { %v11341_v40 = vadd.f32 %v11340_v45, %v11339_v47  ;;  %v11342_v50 = vpop.f32.mrb[94].mxu1  ;;  %v11321_v51 = vpop.f32.mrb[95].mxu0 }
 0x438   :  { %v9360_v52 = vadd.f32 %v11319_v43, %v9320_v46  ;;  %v11343_v53 = vpop.f32.mrb[95].mxu1 }
 0x43a   :  { %v9400_v54 = vadd.f32 %v11341_v40, %v9360_v52 }
 0x43c   :  { %v9405_v55 = vmax.f32 %v9400_v54, 0.0 }
 0x43e   :  { %11395 = vmatmul.mubr.f32.vlgmr.msra.gmra.mrb[96].mxu0 %v9405_v55 }
 0x511   :  { %v9495_v57 = vpop.f32.mrb[96].mxu0 }
 0x512   :  { %v9496_v58 = vadd.f32 %v10288_v56, %v9495_v57  ;;  %v11396_v59 = vpop.f32.mrb[97].mxu0 }
 0x514   :  { %9499 = vst [vmem:[#allocation11] sm:$0xff] %v9496_v58 }
 0x515   :  { %9504 = vsyncadd [#allocation4], 96  ;;  %s12362_s4 = smov [#allocation11]  }
 0x516   :  { %s9505_s6 = sshll.u32 %s12362_s4, 4  ;;  %s9506_s6 = int_to_ptr.vmem [resolvable:$true] %s9505_s6 }
 0x517   :  { %s12317_s7 = scalar_lea.vmem %s9506_s6, 32  ;;  %s12321_s8 = scalar_lea.vmem %s9506_s6, 128 }
 0x518   :  { %p12318_p12 = scmp.ne.s32.totalorder %s9506_s6, %s12317_s7  ;;  %p12322_p13 = scmp.lt.s32.totalorder %s9506_s6, %s9506_s6 }
 0x519   :  { %p12323_p0 = scmp.lt.s32.totalorder %s12321_s8, %s12317_s7 }
 0x51b   :  { %p12324_p1 = por %p12323_p0, %p12322_p13 }
 0x51d   :  { %p12325_p2 = pnand %p12324_p1, %p12318_p12 }
 0x51f   :  { %12328 = shalt.err (!%p12325_p2)
}
 0x520   :  { %s12329_s11 = scalar_lea.hbm %s12618_s5, 32 }
 0x521   :  { %p12330_p3 = scmp.ne.s32.totalorder %s12618_s5, %s12329_s11  ;;  %p12333_p4 = scmp.lt.u32.totalorder %s12329_s11, %s12618_s5 }
 0x523   :  { %p12335_p5 = pnand %p12333_p4, %p12330_p3 }
 0x525   :  { %12338 = shalt.err (!%p12335_p5)
}
 0x526   :  { %s12363_s16 = smov 32   ;;  %s12364_s1 = smov 2  }
 0x527   :  { %9511 = dma.vmem_to_hbm [thread:$0]  %s9506_s6, 32, %s12618_s5, [#allocation4], %s12363_s16, %s12363_s16, %s12364_s1  }
 0x528   :  { %12345 = dma.done.wait [#allocation4], 128  }
 0x529   :  { %12346 = vsyncadd [#allocation4], 4294967168 }
 0x52a   :  { %9515 = vsyncpa [#allocation3], 1 }
 0x52b   :  { %9516 = vsyncpa [#allocation6], 1 }
 0x52c   :  { %9517 = vsyncpa [#allocation9], 1 }
 0x52d   :  { %9518 = vsyncpa [#allocation4], 1 }

</bundles_post_ra>
